<compile_context>
chip_gen: v6e
topology: v6e:2x2x1
jax: 0.10.0
libtpu: 0.0.40
codegen_flags: <defaults>
</compile_context>

<pallas_src>
import functools

import jax
import jax.numpy as jnp
from jax import lax
from jax.experimental import pallas as pl
from jax.experimental.pallas import tpu as pltpu


def _periodic_knn_kernel(box_ref, inv_box_ref, pos_qt_ref, pos_k_ref, nbr_ref,
                         *, k, k_pad, idx_bits):
    """One grid step handles a TILE_M-column tile of query nodes vs. all N key nodes.

    box_ref    : SMEM f32[D]              periodic box lengths
    inv_box_ref: SMEM f32[D]              precomputed reciprocals 1/box
    pos_qt_ref : VMEM f32[D, TILE_M]      query positions, transposed (queries lane-dense)
    pos_k_ref  : VMEM f32[N, D]           all node positions (keys on the sublane axis)
    nbr_ref    : VMEM i32[K_PAD, TILE_M]  neighbor indices (first k sublanes valid, sorted)
    """
    d_dims, tile_m = pos_qt_ref.shape
    n_all = pos_k_ref.shape[0]

    # --- pairwise squared minimum-image distances, (N, TILE_M), pure VPU ---
    d2 = jnp.zeros((n_all, tile_m), jnp.float32)
    for dd in range(d_dims):
        qd = pos_qt_ref[dd:dd + 1, :]        # (1, TILE_M)
        kd = pos_k_ref[:, dd:dd + 1]         # (N, 1)
        delta = kd - qd                      # (N, TILE_M)
        box_l = box_ref[dd]
        inv_l = inv_box_ref[dd]              # no scalar divide in-kernel
        delta = delta - box_l * jnp.round(delta * inv_l)
        d2 = d2 + delta * delta

    # --- pack (dist2, key index) into one monotone int32 sort key ---
    # d2 >= 0, so its f32 bit pattern viewed as int32 is nonnegative and monotone
    # in d2.  Clearing the low idx_bits bits and OR-ing in the key (sublane) index
    # keeps the ordering (only sub-2^(idx_bits-23)-relative ties reorder) and lets
    # a SINGLE integer min act as a fused min+argmin.
    low_mask = (1 << idx_bits) - 1
    key_ids = lax.broadcasted_iota(jnp.int32, (n_all, tile_m), 0)
    keys = (pltpu.bitcast(d2, jnp.int32) & jnp.int32(~low_mask)) | key_ids

    # Exclude self-edges (loop=False): push the diagonal to INT_MAX.
    query_ids = (pl.program_id(0) * tile_m
                 + lax.broadcasted_iota(jnp.int32, (n_all, tile_m), 1))
    int_max = jnp.int32(jnp.iinfo(jnp.int32).max)
    keys = jnp.where(key_ids == query_ids, int_max, keys)
    # key_ids / query_ids are dead past this point -> no persistent iota arrays.

    # --- greedy top-k: one sublane-axis min per step (mostly elementwise VALU) ---
    sub = lax.broadcasted_iota(jnp.int32, (k_pad, tile_m), 0)

    def body(j, carry):
        keys, idx_acc = carry
        min_key = jnp.min(keys, axis=0, keepdims=True)     # (1, TILE_M) fused min+argmin
        min_ix = min_key & jnp.int32(low_mask)             # recover argmin by AND
        idx_acc = jnp.where(sub == j, min_ix, idx_acc)     # cheap VPU accumulate
        keys = jnp.where(keys == min_key, int_max, keys)   # packed key unique -> 1 hit/column
        return keys, idx_acc

    # fori_loop (not a statically-unrolled Python loop) bounds the live range of
    # the >=32-vreg `keys` array; unroll factor can be swept (1/2/4) if profiling
    # shows scheduling headroom.
    _, idx_acc = lax.fori_loop(
        0, k, body, (keys, jnp.zeros((k_pad, tile_m), jnp.int32)))

    # Single lane-dense (TILE_M = 128 lanes) unmasked store.
    nbr_ref[...] = idx_acc


def periodic_knn_graph(datapoint, k: int = 19, tile_m: int = 128):
    """JAX/Pallas equivalent of PeriodicKNN_PyG(k).forward(datapoint)."""
    pos = datapoint["pos"].astype(jnp.float32)     # (N, D)
    box = datapoint["box"].astype(jnp.float32)     # (D,)
    n, d = pos.shape
    assert k <= n - 1, "k must be smaller than the number of nodes (loop=False)"
    tile_m = min(tile_m, n)
    assert n % tile_m == 0, "N must be a multiple of the row tile"
    # TODO(synk): arbitrary N needs key padding (INT_MAX keys); very large N needs a second
    # 'arbitrary' grid axis over key-row blocks with a running top-k merge (at half the N
    # threshold on v7x, 64 MiB VMEM), an explicit vmem_limit_bytes, and pl.Buffered(1) on
    # the grid-constant key slab; at small/moderate N the full (N, D) key slab stays resident.

    pos_t = jnp.transpose(pos)                     # (D, N): query tiles are lane-dense
    inv_box = 1.0 / box
    idx_bits = max(1, int(n - 1).bit_length())     # bits needed to embed a key index
    k_pad = max(8, ((k + 7) // 8) * 8)             # sublane-padded output height

    kernel = functools.partial(_periodic_knn_kernel, k=k, k_pad=k_pad,
                               idx_bits=idx_bits)
    nbr_t = pl.pallas_call(
        kernel,
        out_shape=jax.ShapeDtypeStruct((k_pad, n), jnp.int32),
        grid_spec=pltpu.PrefetchScalarGridSpec(
            num_scalar_prefetch=0,
            grid=(n // tile_m,),
            in_specs=[
                pl.BlockSpec(memory_space=pltpu.MemorySpace.SMEM),   # box lengths
                pl.BlockSpec(memory_space=pltpu.MemorySpace.SMEM),   # 1/box
                pl.BlockSpec((d, tile_m), lambda i: (0, i)),         # query tile (transposed)
                pl.BlockSpec((n, d), lambda i: (0, 0)),              # all keys (grid-constant)
            ],
            out_specs=pl.BlockSpec((k_pad, tile_m), lambda i: (0, i)),
        ),
        compiler_params=pltpu.CompilerParams(
            dimension_semantics=("parallel",)),     # row-tile grid shards across v7x's 2 TCs
    )(box, inv_box, pos_t, pos)

    nbr = jnp.transpose(nbr_t)[:, :k]              # (N, k) int32, sorted ascending

    # Exact edge distances recomputed in the wrapper: cheap N*k*D gather, keeps the
    # sqrt/EUP work and a second output stream out of the kernel entirely.
    nbr_pos = pos[nbr]                                              # (N, k, D)
    delta = pos[:, None, :] - nbr_pos
    delta = delta - box * jnp.round(delta * inv_box)
    dist = jnp.sqrt(jnp.sum(delta * delta, axis=-1))                # (N, k)

    # Assemble PyG-style graph (glue, plain JAX).
    # TODO(synk): original `create_periodic_knn_graph` / `Graph` sources were not
    # provided; return a plain dict with torch_cluster knn_graph source->target flow.
    src = nbr.reshape(-1)                                           # neighbors (source)
    dst = jnp.repeat(jnp.arange(n, dtype=jnp.int32), k)             # centers (target)
    edge_index = jnp.stack([src, dst], axis=0)                      # (2, N*k)
    return {
        "edge_index": edge_index,
        "edge_dist": dist.reshape(-1),
        "pos": pos,
        "num_nodes": n,
    }


def _reference_knn(pos, box, k):
    """Pure-JAX reference for correctness checking."""
    delta = pos[:, None, :] - pos[None, :, :]
    delta = delta - box * jnp.round(delta / box)
    d2 = jnp.sum(delta * delta, axis=-1)
    n = pos.shape[0]
    d2 = jnp.where(jnp.eye(n, dtype=bool), jnp.inf, d2)
    neg_top, idx = lax.top_k(-d2, k)
    return idx, jnp.sqrt(-neg_top)


if __name__ == "__main__":
    key = jax.random.PRNGKey(0)
    N, D, K = 256, 3, 19
    box = jnp.array([10.0, 10.0, 10.0], dtype=jnp.float32)
    pos = jax.random.uniform(key, (N, D), dtype=jnp.float32) * box

    datapoint = {"pos": pos, "box": box}
    graph = periodic_knn_graph(datapoint, k=K)
    jax.block_until_ready(graph["edge_index"])

    # Sanity-check distances against a pure-JAX reference (sorted ascending in both).
    ref_idx, ref_dist = _reference_knn(pos, box, K)
    got_dist = graph["edge_dist"].reshape(N, K)
    assert jnp.allclose(got_dist, ref_dist, atol=1e-4, rtol=1e-4), "distance mismatch"
    assert graph["edge_index"].shape == (2, N * K)

    print("KERNEL_OK")
</pallas_src>

<mosaic_0001>
module attributes {stable_mosaic.version = 11 : i64} {
  func.func @_periodic_knn_kernel(%arg0: i32, %arg1: memref<3xf32, #tpu.memory_space<smem>>, %arg2: memref<3xf32, #tpu.memory_space<smem>>, %arg3: memref<3x128xf32, #tpu.memory_space<vmem>>, %arg4: memref<256x3xf32, #tpu.memory_space<vmem>>, %arg5: memref<24x128xi32, #tpu.memory_space<vmem>>) attributes {dimension_semantics = [#tpu.dimension_semantics<parallel>], iteration_bounds = array<i64: 2>, scalar_prefetch = 0 : i64, scratch_operands = 0 : i64, tpu.core_type = #tpu.core_type<tc>, window_params = [{transform_indices = @transform_0, window_bounds = array<i64: 3>}, {transform_indices = @transform_1, window_bounds = array<i64: 3>}, {transform_indices = @transform_2, window_bounds = array<i64: 3, 128>}, {pipeline_mode = #tpu.pipeline_mode<synchronous>, transform_indices = @transform_3, window_bounds = array<i64: 256, 3>}, {transform_indices = @transform_4, window_bounds = array<i64: 24, 128>}]} {
    %cst = arith.constant 0.000000e+00 : f32
    %0 = vector.broadcast %cst : f32 to vector<256x128xf32>
    %c0 = arith.constant 0 : index
    %c0_0 = arith.constant 0 : index
    %1 = vector.load %arg3[%c0, %c0_0] : memref<3x128xf32, #tpu.memory_space<vmem>>, vector<1x128xf32>
    %c0_1 = arith.constant 0 : index
    %c0_2 = arith.constant 0 : index
    %2 = vector.load %arg4[%c0_1, %c0_2] : memref<256x3xf32, #tpu.memory_space<vmem>>, vector<256x1xf32>
    %3 = vector.broadcast %2 : vector<256x1xf32> to vector<256x128xf32>
    %4 = vector.broadcast %1 : vector<1x128xf32> to vector<256x128xf32>
    %5 = arith.subf %3, %4 : vector<256x128xf32>
    %c0_3 = arith.constant 0 : index
    %6 = memref.load %arg1[%c0_3] : memref<3xf32, #tpu.memory_space<smem>>
    %c0_4 = arith.constant 0 : index
    %7 = memref.load %arg2[%c0_4] : memref<3xf32, #tpu.memory_space<smem>>
    %8 = vector.broadcast %7 : f32 to vector<256x128xf32>
    %9 = arith.mulf %5, %8 : vector<256x128xf32>
    %10 = math.roundeven %9 : vector<256x128xf32>
    %11 = vector.broadcast %6 : f32 to vector<256x128xf32>
    %12 = arith.mulf %11, %10 : vector<256x128xf32>
    %13 = arith.subf %5, %12 : vector<256x128xf32>
    %14 = arith.mulf %13, %13 : vector<256x128xf32>
    %15 = arith.addf %0, %14 : vector<256x128xf32>
    %c1 = arith.constant 1 : index
    %c0_5 = arith.constant 0 : index
    %16 = vector.load %arg3[%c1, %c0_5] : memref<3x128xf32, #tpu.memory_space<vmem>>, vector<1x128xf32>
    %c0_6 = arith.constant 0 : index
    %c1_7 = arith.constant 1 : index
    %17 = vector.load %arg4[%c0_6, %c1_7] : memref<256x3xf32, #tpu.memory_space<vmem>>, vector<256x1xf32>
    %18 = vector.broadcast %17 : vector<256x1xf32> to vector<256x128xf32>
    %19 = vector.broadcast %16 : vector<1x128xf32> to vector<256x128xf32>
    %20 = arith.subf %18, %19 : vector<256x128xf32>
    %c1_8 = arith.constant 1 : index
    %21 = memref.load %arg1[%c1_8] : memref<3xf32, #tpu.memory_space<smem>>
    %c1_9 = arith.constant 1 : index
    %22 = memref.load %arg2[%c1_9] : memref<3xf32, #tpu.memory_space<smem>>
    %23 = vector.broadcast %22 : f32 to vector<256x128xf32>
    %24 = arith.mulf %20, %23 : vector<256x128xf32>
    %25 = math.roundeven %24 : vector<256x128xf32>
    %26 = vector.broadcast %21 : f32 to vector<256x128xf32>
    %27 = arith.mulf %26, %25 : vector<256x128xf32>
    %28 = arith.subf %20, %27 : vector<256x128xf32>
    %29 = arith.mulf %28, %28 : vector<256x128xf32>
    %30 = arith.addf %15, %29 : vector<256x128xf32>
    %c2 = arith.constant 2 : index
    %c0_10 = arith.constant 0 : index
    %31 = vector.load %arg3[%c2, %c0_10] : memref<3x128xf32, #tpu.memory_space<vmem>>, vector<1x128xf32>
    %c0_11 = arith.constant 0 : index
    %c2_12 = arith.constant 2 : index
    %32 = vector.load %arg4[%c0_11, %c2_12] : memref<256x3xf32, #tpu.memory_space<vmem>>, vector<256x1xf32>
    %33 = vector.broadcast %32 : vector<256x1xf32> to vector<256x128xf32>
    %34 = vector.broadcast %31 : vector<1x128xf32> to vector<256x128xf32>
    %35 = arith.subf %33, %34 : vector<256x128xf32>
    %c2_13 = arith.constant 2 : index
    %36 = memref.load %arg1[%c2_13] : memref<3xf32, #tpu.memory_space<smem>>
    %c2_14 = arith.constant 2 : index
    %37 = memref.load %arg2[%c2_14] : memref<3xf32, #tpu.memory_space<smem>>
    %38 = vector.broadcast %37 : f32 to vector<256x128xf32>
    %39 = arith.mulf %35, %38 : vector<256x128xf32>
    %40 = math.roundeven %39 : vector<256x128xf32>
    %41 = vector.broadcast %36 : f32 to vector<256x128xf32>
    %42 = arith.mulf %41, %40 : vector<256x128xf32>
    %43 = arith.subf %35, %42 : vector<256x128xf32>
    %44 = arith.mulf %43, %43 : vector<256x128xf32>
    %45 = arith.addf %30, %44 : vector<256x128xf32>
    %46 = tpu.iota {dimensions = array<i32: 0>} : vector<256x128xi32>
    %47 = tpu.bitcast %45 : vector<256x128xf32> -> vector<256x128xi32>
    %c-256_i32 = arith.constant -256 : i32
    %48 = vector.broadcast %c-256_i32 : i32 to vector<256x128xi32>
    %49 = arith.andi %47, %48 : vector<256x128xi32>
    %50 = arith.ori %49, %46 : vector<256x128xi32>
    %c128_i32 = arith.constant 128 : i32
    %51 = arith.muli %arg0, %c128_i32 : i32
    %52 = tpu.iota {dimensions = array<i32: 1>} : vector<256x128xi32>
    %53 = vector.broadcast %51 : i32 to vector<256x128xi32>
    %54 = arith.addi %53, %52 : vector<256x128xi32>
    %55 = arith.cmpi eq, %46, %54 : vector<256x128xi32>
    %c2147483647_i32 = arith.constant 2147483647 : i32
    %56 = vector.broadcast %c2147483647_i32 : i32 to vector<256x128xi32>
    %57 = arith.select %55, %56, %50 : vector<256x128xi1>, vector<256x128xi32>
    %58 = tpu.iota {dimensions = array<i32: 0>} : vector<24x128xi32>
    %c0_i32 = arith.constant 0 : i32
    %59 = vector.broadcast %c0_i32 : i32 to vector<24x128xi32>
    %c2147483647_i32_15 = arith.constant 2147483647 : i32
    %c0_i32_16 = arith.constant 0 : i32
    %c19_i32 = arith.constant 19 : i32
    %60 = arith.addi %c0_i32_16, %c19_i32 : i32
    %c1_i32 = arith.constant 1 : i32
    %61:2 = scf.for %arg6 = %c0_i32_16 to %60 step %c1_i32 iter_args(%arg7 = %57, %arg8 = %59) -> (vector<256x128xi32>, vector<24x128xi32>)  : i32 {
      %cst_20 = arith.constant dense<2147483647> : vector<128xi32>
      %63 = vector.multi_reduction <minsi>, %arg7, %cst_20 [0] : vector<256x128xi32> to vector<128xi32>
      %64 = vector.shape_cast %63 : vector<128xi32> to vector<1x128xi32>
      %c255_i32 = arith.constant 255 : i32
      %65 = vector.broadcast %c255_i32 : i32 to vector<1x128xi32>
      %66 = arith.andi %64, %65 : vector<1x128xi32>
      %67 = vector.broadcast %arg6 : i32 to vector<24x128xi32>
      %68 = arith.cmpi eq, %58, %67 : vector<24x128xi32>
      %69 = vector.shape_cast %66 : vector<1x128xi32> to vector<1x128xi32>
      %70 = vector.broadcast %69 : vector<1x128xi32> to vector<24x128xi32>
      %71 = arith.select %68, %70, %arg8 : vector<24x128xi1>, vector<24x128xi32>
      %72 = vector.broadcast %64 : vector<1x128xi32> to vector<256x128xi32>
      %73 = arith.cmpi eq, %arg7, %72 : vector<256x128xi32>
      %74 = vector.broadcast %c2147483647_i32_15 : i32 to vector<256x128xi32>
      %75 = arith.select %73, %74, %arg7 : vector<256x128xi1>, vector<256x128xi32>
      scf.yield %75, %71 : vector<256x128xi32>, vector<24x128xi32>
    }
    %c19_i32_17 = arith.constant 19 : i32
    %c0_18 = arith.constant 0 : index
    %c0_19 = arith.constant 0 : index
    %62 = vector.load %arg5[%c0_18, %c0_19] : memref<24x128xi32, #tpu.memory_space<vmem>>, vector<24x128xi32>
    tpu.vector_store %arg5[%c0_18, %c0_19], %61#1 {strides = array<i32>} : memref<24x128xi32, #tpu.memory_space<vmem>>, vector<24x128xi32>,
    return
  }
  func.func @transform_0(%arg0: i32) -> i32 {
    %c0_i32 = arith.constant 0 : i32
    %c0_i32_0 = arith.constant 0 : i32
    return %c0_i32 : i32
  }
  func.func @transform_1(%arg0: i32) -> i32 {
    %c0_i32 = arith.constant 0 : i32
    %c0_i32_0 = arith.constant 0 : i32
    return %c0_i32 : i32
  }
  func.func @transform_2(%arg0: i32) -> (i32, i32) {
    %c0_i32 = arith.constant 0 : i32
    %c0_i32_0 = arith.constant 0 : i32
    return %c0_i32, %arg0 : i32, i32
  }
  func.func @transform_3(%arg0: i32) -> (i32, i32) {
    %c0_i32 = arith.constant 0 : i32
    %c0_i32_0 = arith.constant 0 : i32
    %c0_i32_1 = arith.constant 0 : i32
    return %c0_i32, %c0_i32_0 : i32, i32
  }
  func.func @transform_4(%arg0: i32) -> (i32, i32) {
    %c0_i32 = arith.constant 0 : i32
    %c0_i32_0 = arith.constant 0 : i32
    return %c0_i32, %arg0 : i32, i32
  }
}

</mosaic_0001>

<bundles_post_ra>
// kernel: tpu_custom_call.1
= control target key start
LH: loop header
LB: loop body
LE: loop exit
PB: predicated region body
PF: predicated region fallthrough
CT: control target
= control target key end

     0   :  { %9 = vsyncpa [#allocation4], 0  ;;  %s6313_s0 = inlined_call_operand.vmem [shape: f32[3], index: 0, kind: input, shape index: {}]   ;;  %s6314_s1 = inlined_call_operand.vmem [shape: f32[3], index: 1, kind: input, shape index: {}]   ;;  %s6315_s2 = inlined_call_operand.vmem [shape: f32[3,256], index: 2, kind: input, shape index: {}]   ;;  %s6316_s3 = inlined_call_operand.vmem [shape: f32[256,3], index: 3, kind: input, shape index: {}]   ;;  %s6317_s4 = inlined_call_operand.hbm [shape: s32[24,256], index: 4, kind: output, shape index: {}]  }
   0x1   :  { %10 = vsyncpa [#allocation6], 0 }
   0x2   :  { %11 = vsyncpa [#allocation3], 0 }
   0x3   :  { %13 = vsyncpa [#allocation3 + $0x1], 0  ;;  %s3531_s15 = smov 0   ;;  %s3533_s16 = smov 0  }
   0x4   :  { %s3535_s17 = smov 0   ;;  %s3537_s18 = smov 0  }
   0x5 LB: > { %s3552_s19 = sadd.s32 4294967295, %s3351_s18   ;;  %s1959_s20 = sadd.s32 4294967294, %s3351_s18   ;;  %s3351_s18 = sphi %s3537_s18, %s6555_s18   ;;  %s3347_s17 = sphi %s3535_s17, %s6554_s17   ;;  %s3343_s16 = sphi %s3533_s16, %s6553_s16   ;;  %s3339_s15 = sphi %s3531_s15, %s6552_s15  }
   0x6   : > { %s3556_s21 = sadd.s32 1, %s3351_s18   ;;  %s115_s22 = sadd.s32 1, %s3347_s17 }
   0x7   : > { %s112_s23 = ssub.s32 %s3351_s18, %s3556_s21  ;;  %p125_p0 = scmp.ne.s32.totalorder %s3347_s17, %s3343_s16 }
   0x8   : > { %p113_p1 = scmp.eq.s32.totalorder %s112_s23, 0  ;;  %p126_p2 = scmp.eq.s32.totalorder %s3552_s19, 1 }
   0x9   : > { %p131_p3 = scmp.ne.s32.totalorder %s3343_s16, %s3339_s15  ;;  %p132_p4 = scmp.eq.s32.totalorder %s1959_s20, 1 }
   0xa   : > { %s3567_s24 = scalar_select %p113_p1, %s3347_s17, %s115_s22  }
   0xb   : > { %p3569_p5 = por %p126_p2, %p125_p0  ;;  %p3573_p6 = por %p132_p4, %p131_p3 }
   0xc   : > { %p1960_p7 = scmp.ge.s32.totalorder %s3351_s18, 1  ;;  %p139_p8 = scmp.lt.s32.totalorder %s3351_s18, 3 }
   0xd   : > { %s6333_s25 = scalar_select %p3569_p5, 1, 0 }
   0xe   : > { %s6334_s26 = scalar_select %p3573_p6, 1, 0 }
   0xf   : > { %p6318_p9 = scmp.eq.s32.totalorder %s3552_s19, 0  ;;  %p3580_p10 = pnand %p1960_p7, %p139_p8 }
  0x10   : > { %s152_s30 = sshll.u32 %s6313_s0, 4  ;;  %s163_s7 = sshll.u32 %s6314_s1, 4  ;;  %s153_s30 = int_to_ptr.vmem [resolvable:$true] %s152_s30  ;;  %s164_s7 = int_to_ptr.vmem [resolvable:$true] %s163_s7 }
  0x11   : > { %s6335_s27 = scalar_select %p3580_p10, 1, 0 }
  0x12   : > { %p2758_p11 = pneg %p3580_p10  ;;  %s3109_s9 = scalar_lea.vmem %s153_s30, 16 }
  0x13   : > { %p3110_p13 = scmp.ne.s32.totalorder %s153_s30, %s3109_s9  ;;  %p3117_p3 = scmp.lt.s32.totalorder %s153_s30, %s153_s30 }
  0x14   : > { %p3594_p12 = pnand %p6318_p9, %p2758_p11  ;;  %p3118_p4 = scmp.lt.s32.totalorder %s3109_s9, %s3109_s9 }
  0x16   : > { %p3111_p0 = pneg %p3594_p12  ;;  %p3119_p7 = por %p3118_p4, %p3117_p3 }
  0x18   : > { %p3112_p1 = pnand %p3111_p0, %p3110_p13 }
  0x1a   : > { %p3113_p2 = pneg %p3112_p1 }
  0x1c   : > { %p3120_p8 = pnand %p3119_p7, %p3113_p2 }
  0x1e   : > { %3123 = shalt.err (!%p3120_p8)
}
  0x1f   : > { %s3497_s10 = smov [#allocation2]   ;;  %s3124_s11 = scalar_lea.vmem %s164_s7, 16 }
  0x20   : > { %2761 = dma.vmem_to_smem (!%p3594_p12), %s153_s30, 16, %s3497_s10, [#allocation4]  }
  0x21   : > { %p3125_p11 = scmp.ne.s32.totalorder %s164_s7, %s3124_s11  ;;  %p3132_p5 = scmp.lt.s32.totalorder %s164_s7, %s164_s7 }
  0x22   : > { %p3133_p10 = scmp.lt.s32.totalorder %s3124_s11, %s3124_s11 }
  0x23   : > { %p3127_p9 = pnand %p3125_p11, %p3111_p0 }
  0x24   : > { %p3134_p13 = por %p3133_p10, %p3132_p5 }
  0x25   : > { %p3128_p6 = pneg %p3127_p9 }
  0x27   : > { %p3135_p1 = pnand %p3134_p13, %p3128_p6 }
  0x29   : > { %3138 = shalt.err (!%p3135_p1)
}
  0x2a   : > { %s3498_s12 = smov [#allocation5]   ;;  %p6337_p2 = scmp.ne.s32.totalorder %s6335_s27, 0 }
  0x2b   : > { %2764 = dma.vmem_to_smem (!%p3594_p12), %s164_s7, 16, %s3498_s12, [#allocation6]  }
  0x2c   : > { %186 = sbr.rel (%p6337_p2) target bundleno = 633 (0x279), region = 36 }
  0x31   : > { %p6338_p3 = scmp.eq.s32.totalorder %s3552_s19, 0 }
  0x33   : > { %3326 = dma.done.wait (%p6338_p3), [#allocation4], 16   ;;  %p6339_p4 = pmov %p6338_p3 }
  0x34   : > { %p6340_p9 = pmov %p6338_p3 }
  0x35   : > { %3328 = vsyncadd (%p6339_p4), [#allocation4], 4294967280 }
  0x36   : > { %3330 = dma.done.wait (%p6340_p9), [#allocation6], 16   ;;  %p6341_p5 = pmov %p6338_p3 }
  0x38   : > { %3332 = vsyncadd (%p6341_p5), [#allocation6], 4294967280 }
  0x39   : > { %196 = sfence }
  0x3a   : > { %v3617_v0 = vld [vmem:[%s6316_s3 + $0x10] sm:$0xff]  ;;  %v3622_v1 = vld [vmem:[%s6316_s3] sm:$0xff]  ;;  %v3499_v2 = vmov 0   ;;  %v3629_v3 = vld [vmem:[%s6316_s3 + $0x18] sm:$0xff]  ;;  %v3500_v33 = vmov 1   ;;  %p216_p6 = scmp.lt.s32.totalorder %s3552_s19, 1 }
  0x3b   : > { %3103 = vset.pattern.permute.xlu1 %v3499_v2  ;;  %3102 = vset.pattern.permute.xlu0 %v3499_v2  ;;  %v3634_v4 = vld [vmem:[%s6316_s3 + $0x8] sm:$0xff]  ;;  %v3646_v6 = vld [vmem:[%s6316_s3 + $0x20] sm:$0xff]  ;;  %v3653_v7 = vld [vmem:[%s6316_s3 + $0x38] sm:$0xff]  ;;  %s450_s10 = sld [smem:[#allocation5]]  ;;  %v3501_v48 = vmov 2   ;;  %s1975_s29 = sshll.u32 %s3552_s19, 7 }
  0x3c   : > { %265 = vperm.xlu1 %3103, %v3617_v0   ;;  %255 = vperm.xlu0 %3102, %v3622_v1   ;;  %v3641_v5 = vld [vmem:[%s6316_s3 + $0x28] sm:$0xff]  ;;  %v3658_v8 = vld [vmem:[%s6316_s3 + $0x30] sm:$0xff]  ;;  %v3670_v10 = vld [vmem:[%s6316_s3 + $0x40] sm:$0xff]  ;;  %s217_s9 = scalar_select %p216_p6, %s3552_s19, 1 }
  0x3d   : > { %v3665_v9 = vld [vmem:[%s6316_s3 + $0x48] sm:$0xff]  ;;  %v3677_v11 = vld [vmem:[%s6316_s3 + $0x58] sm:$0xff]  ;;  %v3682_v12 = vld [vmem:[%s6316_s3 + $0x50] sm:$0xff]  ;;  %s449_s20 = sld [smem:[#allocation2]]  ;;  %s213_s30 = sand.u32 1, %s3343_s16  }
  0x3e   : > { %v3689_v13 = vld [vmem:[%s6316_s3 + $0x68] sm:$0xff]  ;;  %v3694_v14 = vld [vmem:[%s6316_s3 + $0x60] sm:$0xff]  ;;  %v3701_v15 = vld [vmem:[%s6316_s3 + $0x78] sm:$0xff]  ;;  %s1967_s11 = sshll.u32 %s217_s9, 2  ;;  %s1971_s22 = sld [smem:[#allocation5 + $0x1]] }
  0x3f   : > { %v3706_v16 = vld [vmem:[%s6316_s3 + $0x70] sm:$0xff]  ;;  %v3713_v17 = vld [vmem:[%s6316_s3 + $0x88] sm:$0xff]  ;;  %v3718_v18 = vld [vmem:[%s6316_s3 + $0x80] sm:$0xff]  ;;  %s3839_s14 = scalar_lea.vmem %s6315_s2, %s1967_s11  ;;  %s3907_s23 = sld [smem:[#allocation2 + $0x1]] }
  0x40   : > { %270 = vperm.xlu1 %3103, %v3629_v3   ;;  %260 = vperm.xlu0 %3102, %v3634_v4   ;;  %v3725_v19 = vld [vmem:[%s6316_s3 + $0x98] sm:$0xff]  ;;  %v3730_v20 = vld [vmem:[%s6316_s3 + $0x90] sm:$0xff]  ;;  %v3737_v21 = vld [vmem:[%s6316_s3 + $0xa8] sm:$0xff]  ;;  %s4998_s27 = sld [smem:[#allocation5 + $0x2]]  ;;  %s5222_s5 = smul.u32 24, %s213_s30 }
  0x41   : > { %v3742_v22 = vld [vmem:[%s6316_s3 + $0xa0] sm:$0xff]  ;;  %v3749_v23 = vld [vmem:[%s6316_s3 + $0xb8] sm:$0xff]  ;;  %v3754_v24 = vld [vmem:[%s6316_s3 + $0xb0] sm:$0xff]  ;;  %v3846_v35 = vstv %s450_s10  ;;  %s5024_s28 = sld [smem:[#allocation2 + $0x2]]  ;;  %s5775_s7 = smov 0  }
  0x42   : > { %v3761_v25 = vld [vmem:[%s6316_s3 + $0xc8] sm:$0xff]  ;;  %v3766_v26 = vld [vmem:[%s6316_s3 + $0xc0] sm:$0xff]  ;;  %v3773_v27 = vld [vmem:[%s6316_s3 + $0xd8] sm:$0xff]  ;;  %s5676_s6 = scalar_lea.vmem [#allocation7], %s5222_s5 }
  0x43   : > { %v3778_v28 = vld [vmem:[%s6316_s3 + $0xd0] sm:$0xff]  ;;  %v3785_v29 = vld [vmem:[%s6316_s3 + $0xe8] sm:$0xff]  ;;  %v3790_v30 = vld [vmem:[%s6316_s3 + $0xe0] sm:$0xff] }
  0x44   : > { %280 = vperm.xlu1 %3103, %v3641_v5   ;;  %275 = vperm.xlu0 %3102, %v3646_v6   ;;  %6342 = vst [vmem:[#allocation11_spill] sm:$0xff] %v3785_v29  ;;  %v3797_v31 = vld [vmem:[%s6316_s3 + $0xf8] sm:$0xff]  ;;  %v3802_v32 = vld [vmem:[%s6316_s3 + $0xf0] sm:$0xff]  ;;  %v3844_v34 = vld [vmem:[%s3839_s14] ss:$0 sm:$0xff] }
  0x45   : > { %6343 = vst [vmem:[#allocation12_spill] sm:$0xff] %v3797_v31 }
  0x48   : > { %290 = vperm.xlu1 %3103, %v3653_v7   ;;  %285 = vperm.xlu0 %3102, %v3658_v8  }
  0x4c   : > { %300 = vperm.xlu1 %3103, %v3665_v9   ;;  %295 = vperm.xlu0 %3102, %v3670_v10  }
  0x50   : > { %310 = vperm.xlu1 %3103, %v3677_v11   ;;  %305 = vperm.xlu0 %3102, %v3682_v12  }
  0x54   : > { %320 = vperm.xlu1 %3103, %v3689_v13   ;;  %315 = vperm.xlu0 %3102, %v3694_v14  }
  0x58   : > { %330 = vperm.xlu1 %3103, %v3701_v15   ;;  %325 = vperm.xlu0 %3102, %v3706_v16  }
  0x5c   : > { %340 = vperm.xlu1 %3103, %v3713_v17   ;;  %335 = vperm.xlu0 %3102, %v3718_v18  }
  0x60   : > { %350 = vperm.xlu1 %3103, %v3725_v19   ;;  %345 = vperm.xlu0 %3102, %v3730_v20  }
  0x64   : > { %360 = vperm.xlu1 %3103, %v3737_v21   ;;  %355 = vperm.xlu0 %3102, %v3742_v22  }
  0x68   : > { %370 = vperm.xlu1 %3103, %v3749_v23   ;;  %365 = vperm.xlu0 %3102, %v3754_v24  }
  0x6c   : > { %380 = vperm.xlu1 %3103, %v3761_v25   ;;  %375 = vperm.xlu0 %3102, %v3766_v26  }
  0x70   : > { %390 = vperm.xlu1 %3103, %v3773_v27   ;;  %385 = vperm.xlu0 %3102, %v3778_v28  }
  0x74   : > { %400 = vperm.xlu1 %3103, %v3785_v29   ;;  %395 = vperm.xlu0 %3102, %v3790_v30  }
  0x78   : > { %410 = vperm.xlu1 %3103, %v3797_v31   ;;  %405 = vperm.xlu0 %3102, %v3802_v32  }
  0x7c   : > { %3105 = vset.pattern.permute.xlu1 %v3500_v33  ;;  %3104 = vset.pattern.permute.xlu0 %v3500_v33 }
  0x7d   : > { %651 = vperm.xlu1 %3105, %v3634_v4   ;;  %647 = vperm.xlu0 %3104, %v3622_v1  }
  0x81   : > { %655 = vperm.xlu1 %3105, %v3617_v0   ;;  %659 = vperm.xlu0 %3104, %v3629_v3  }
  0x85   : > { %663 = vperm.xlu1 %3105, %v3646_v6   ;;  %667 = vperm.xlu0 %3104, %v3641_v5  }
  0x89   : > { %671 = vperm.xlu1 %3105, %v3658_v8   ;;  %675 = vperm.xlu0 %3104, %v3653_v7  }
  0x8d   : > { %679 = vperm.xlu1 %3105, %v3670_v10   ;;  %683 = vperm.xlu0 %3104, %v3665_v9  }
  0x91   : > { %687 = vperm.xlu1 %3105, %v3682_v12   ;;  %691 = vperm.xlu0 %3104, %v3677_v11  }
  0x95   : > { %695 = vperm.xlu1 %3105, %v3694_v14   ;;  %699 = vperm.xlu0 %3104, %v3689_v13  }
  0x99   : > { %703 = vperm.xlu1 %3105, %v3706_v16   ;;  %707 = vperm.xlu0 %3104, %v3701_v15  }
  0x9d   : > { %711 = vperm.xlu1 %3105, %v3718_v18   ;;  %715 = vperm.xlu0 %3104, %v3713_v17  }
  0xa1   : > { %719 = vperm.xlu1 %3105, %v3730_v20   ;;  %723 = vperm.xlu0 %3104, %v3725_v19  }
  0xa5   : > { %727 = vperm.xlu1 %3105, %v3742_v22   ;;  %731 = vperm.xlu0 %3104, %v3737_v21  }
  0xa9   : > { %735 = vperm.xlu1 %3105, %v3754_v24   ;;  %739 = vperm.xlu0 %3104, %v3749_v23  }
  0xad   : > { %743 = vperm.xlu1 %3105, %v3766_v26   ;;  %747 = vperm.xlu0 %3104, %v3761_v25  }
  0xb1   : > { %751 = vperm.xlu1 %3105, %v3778_v28   ;;  %755 = vperm.xlu0 %3104, %v3773_v27  }
  0xb5   : > { %759 = vperm.xlu1 %3105, %v3790_v30   ;;  %763 = vperm.xlu0 %3104, %v3785_v29  }
  0xb7   : > { %v266_v36 = vpop.permute.xlu1 %265  ;;  %v256_v37 = vpop.permute.xlu0 %255 }
  0xb8   : > { %v3849_v38 = vsub.f32 %v266_v36, %v3844_v34  ;;  %v3852_v39 = vsub.f32 %v256_v37, %v3844_v34 }
  0xb9   : > { %767 = vperm.xlu1 %3105, %v3802_v32   ;;  %771 = vperm.xlu0 %3104, %v3797_v31  }
  0xba   : > { %v3858_v40 = vmul.f32 %v3846_v35, %v3849_v38  ;;  %v3862_v41 = vmul.f32 %v3846_v35, %v3852_v39 }
  0xbb   : > { %v271_v42 = vpop.permute.xlu1 %270  ;;  %v261_v43 = vpop.permute.xlu0 %260 }
  0xbc   : > { %v1998_v44 = vcvt.f32.s32 %v3858_v40  ;;  %v1982_v45 = vcvt.f32.s32 %v3862_v41  ;;  %v3867_v46 = vsub.f32 %v271_v42, %v3844_v34  ;;  %v3870_v47 = vsub.f32 %v261_v43, %v3844_v34 }
  0xbd   : > { %3106 = vset.pattern.permute.xlu1 %v3501_v48  ;;  %3107 = vset.pattern.permute.xlu0 %v3501_v48  ;;  %v1985_v61 = vand.u32 2147483648, %v3862_v41  ;;  %v2001_v2 = vand.u32 2147483648, %v3858_v40 }
  0xbe   : > { %1008 = vperm.xlu1 %3106, %v3622_v1   ;;  %1012 = vperm.xlu0 %3107, %v3634_v4   ;;  %v1999_v49 = vcvt.s32.f32 %v1998_v44  ;;  %v1983_v52 = vcvt.s32.f32 %v1982_v45  ;;  %v3876_v53 = vmul.f32 %v3846_v35, %v3867_v46  ;;  %v3880_v54 = vmul.f32 %v3846_v35, %v3870_v47 }
  0xbf   : > { %v281_v50 = vpop.permute.xlu1 %280  ;;  %v276_v51 = vpop.permute.xlu0 %275  ;;  %v3909_v44 = vstv %s449_s20 }
  0xc0   : > { %v3883_v55 = vsub.f32 %v281_v50, %v3844_v34  ;;  %v3886_v56 = vsub.f32 %v276_v51, %v3844_v34  ;;  %v2000_v57 = vand.u32 2147483647, %v1999_v49  ;;  %v1984_v60 = vand.u32 2147483647, %v1983_v52 }
  0xc1   : > { %v2006_v62 = vcvt.f32.s32 %v3876_v53  ;;  %v1990_v63 = vcvt.f32.s32 %v3880_v54  ;;  %v3916_v50 = vstv %s1971_s22  ;;  %v1988_v51 = vand.u32 2147483647, %v3880_v54 }
  0xc2   : > { %1016 = vperm.xlu1 %3106, %v3617_v0   ;;  %1024 = vperm.xlu0 %3107, %v3646_v6   ;;  %v3892_v58 = vmul.f32 %v3846_v35, %v3883_v55  ;;  %v1980_v0 = vand.u32 2147483647, %v3862_v41  ;;  %v3901_v4 = vmul.f32 %v3846_v35, %v3886_v56  ;;  %v1996_v6 = vand.u32 2147483647, %v3858_v40  ;;  %6346 = vst [vmem:[#allocation13_spill] sm:$0xff] %v3916_v50 }
  0xc3   : > { %v291_v59 = vpop.permute.xlu1 %290  ;;  %v286_v1 = vpop.permute.xlu0 %285  ;;  %v2002_v36 = vor.u32 %v2001_v2, %v2000_v57  ;;  %v1986_v37 = vor.u32 %v1985_v61, %v1984_v60  ;;  %v2007_v42 = vcvt.s32.f32 %v2006_v62  ;;  %v1991_v43 = vcvt.s32.f32 %v1990_v63 }
  0xc4   : > { %v2022_v33 = vcvt.f32.s32 %v3892_v58  ;;  %vm3911_vm0 = vcmp.lt.f32.partialorder %v1980_v0, 8388608.0  ;;  %v2014_v48 = vcvt.f32.s32 %v3901_v4  ;;  %vm3918_vm1 = vcmp.lt.f32.partialorder %v1996_v6, 8388608.0 }
  0xc5   : > { %v2003_v60 = vsel %vm3918_vm1, %v2002_v36, %v3858_v40  ;;  %v1993_v61 = vand.u32 2147483648, %v3880_v54  ;;  %v3931_v62 = vsub.f32 %v291_v59, %v3844_v34  ;;  %v3934_v63 = vsub.f32 %v286_v1, %v3844_v34 }
  0xc6   : > { %1020 = vperm.xlu1 %3106, %v3629_v3   ;;  %1032 = vperm.xlu0 %3107, %v3658_v8   ;;  %v2004_v8 = vand.u32 2147483647, %v3876_v53  ;;  %v2023_v52 = vcvt.s32.f32 %v2022_v33  ;;  %v1987_v2 = vsel %vm3911_vm0, %v1986_v37, %v3862_v41  ;;  %v1992_v0 = vand.u32 2147483647, %v1991_v43 }
  0xc7   : > { %v301_v49 = vpop.permute.xlu1 %300  ;;  %v296_v57 = vpop.permute.xlu0 %295  ;;  %v2015_v6 = vcvt.s32.f32 %v2014_v48  ;;  %v3944_v40 = vmul.f32 %v3846_v35, %v3931_v62  ;;  %v3948_v59 = vmul.f32 %v3846_v35, %v3934_v63  ;;  %v519_v33 = vmul.f32 %v2003_v60, %v3909_v44 }
  0xc8   : > { %v3951_v1 = vsub.f32 %v296_v57, %v3844_v34  ;;  %v2009_v41 = vand.u32 2147483648, %v3876_v53  ;;  %v2024_v36 = vand.u32 2147483647, %v2023_v52  ;;  %v3957_v37 = vstv %s3907_s23 }
  0xc9   : > { %6349 = vst [vmem:[#allocation14_spill] sm:$0xff] %v3957_v37  ;;  %vm3960_vm2 = vcmp.lt.f32.partialorder %v2004_v8, 8388608.0  ;;  %v2020_v45 = vand.u32 2147483647, %v3892_v58  ;;  %v2038_v52 = vcvt.f32.s32 %v3944_v40  ;;  %v2030_v57 = vcvt.f32.s32 %v3948_v59 }
  0xca   : > { %1028 = vperm.xlu1 %3106, %v3641_v5   ;;  %1040 = vperm.xlu0 %3107, %v3670_v10   ;;  %v2008_v5 = vand.u32 2147483647, %v2007_v42  ;;  %v3940_v10 = vsub.f32 %v301_v49, %v3844_v34  ;;  %v517_v42 = vmul.f32 %v1987_v2, %v3909_v44  ;;  %vm3973_vm3 = vcmp.lt.f32.partialorder %v1988_v51, 8388608.0 }
  0xcb   : > { %v311_v49 = vpop.permute.xlu1 %310  ;;  %v1994_v60 = vor.u32 %v1993_v61, %v1992_v0  ;;  %v2016_v2 = vand.u32 2147483647, %v2015_v6  ;;  %v3979_v37 = vmul.f32 %v3846_v35, %v3951_v1  ;;  %v551_v50 = vsub.f32 %v3849_v38, %v519_v33  ;;  %v306_v31 = vpop.permute.xlu0 %305 }
  0xcc   : > { %v3967_v48 = vmul.f32 %v3846_v35, %v3940_v10  ;;  %v2010_v3 = vor.u32 %v2009_v41, %v2008_v5  ;;  %v2039_v5 = vcvt.s32.f32 %v2038_v52  ;;  %v2031_v41 = vcvt.s32.f32 %v2030_v57 }
  0xcd   : > { %vm3983_vm4 = vcmp.lt.f32.partialorder %v2020_v45, 8388608.0  ;;  %v2012_v51 = vand.u32 2147483647, %v3901_v4  ;;  %v2017_v61 = vand.u32 2147483648, %v3901_v4  ;;  %v549_v38 = vsub.f32 %v3852_v39, %v517_v42 }
  0xce   : > { %1036 = vperm.xlu1 %3106, %v3653_v7   ;;  %1048 = vperm.xlu0 %3107, %v3682_v12   ;;  %v2025_v7 = vand.u32 2147483648, %v3892_v58  ;;  %v2054_v0 = vcvt.f32.s32 %v3967_v48  ;;  %v2011_v6 = vsel %vm3960_vm2, %v2010_v3, %v3876_v53  ;;  %v2040_v33 = vand.u32 2147483647, %v2039_v5 }
  0xcf   : > { %v2018_v45 = vor.u32 %v2017_v61, %v2016_v2  ;;  %v2046_v52 = vcvt.f32.s32 %v3979_v37  ;;  %v321_v57 = vpop.permute.xlu1 %320  ;;  %v2036_v39 = vand.u32 2147483647, %v3944_v40  ;;  %v2033_v53 = vand.u32 2147483648, %v3948_v59  ;;  %v316_v2 = vpop.permute.xlu0 %315 }
  0xd0   : > { %v2026_v12 = vor.u32 %v2025_v7, %v2024_v36  ;;  %v1995_v36 = vsel %vm3973_vm3, %v1994_v60, %v3880_v54  ;;  %v2041_v7 = vand.u32 2147483648, %v3944_v40  ;;  %v2055_v42 = vcvt.s32.f32 %v2054_v0 }
  0xd1   : > { %v2028_v54 = vand.u32 2147483647, %v3948_v59  ;;  %v4008_v3 = vsub.f32 %v311_v49, %v3844_v34  ;;  %v4011_v8 = vsub.f32 %v306_v31, %v3844_v34  ;;  %v4014_v29 = vmul.f32 %v551_v50, %v551_v50 }
  0xd2   : > { %1044 = vperm.xlu1 %3106, %v3665_v9   ;;  %1056 = vperm.xlu0 %3107, %v3694_v14   ;;  %v2032_v9 = vand.u32 2147483647, %v2031_v41  ;;  %v2027_v14 = vsel %vm3983_vm4, %v2026_v12, %v3892_v58  ;;  %v2042_v43 = vor.u32 %v2041_v7, %v2040_v33  ;;  %vm4016_vm5 = vcmp.lt.f32.partialorder %v2012_v51, 8388608.0 }
  0xd3   : > { %v520_v12 = vmul.f32 %v2011_v6, %v3909_v44  ;;  %v518_v49 = vmul.f32 %v1995_v36, %v3909_v44  ;;  %v2019_v31 = vsel %vm4016_vm5, %v2018_v45, %v3901_v4  ;;  %v522_v50 = vmul.f32 %v2027_v14, %v3909_v44  ;;  %v326_v58 = vpop.permute.xlu0 %325 }
  0xd4   : > { %v2034_v60 = vor.u32 %v2033_v53, %v2032_v9  ;;  %vm4029_vm6 = vcmp.lt.f32.partialorder %v2036_v39, 8388608.0  ;;  %v2056_v41 = vand.u32 2147483647, %v2055_v42  ;;  %v4035_v51 = vmul.f32 %v3846_v35, %v4008_v3  ;;  %v331_v42 = vpop.permute.xlu1 %330 }
  0xd5   : > { %v2043_v61 = vsel %vm4029_vm6, %v2042_v43, %v3944_v40  ;;  %vm4041_vm7 = vcmp.lt.f32.partialorder %v2028_v54, 8388608.0  ;;  %v4047_v0 = vmul.f32 %v3846_v35, %v4011_v8  ;;  %v4050_v6 = vsub.f32 %v316_v2, %v3844_v34 }
  0xd6   : > { %1052 = vperm.xlu1 %3106, %v3677_v11   ;;  %1064 = vperm.xlu0 %3107, %v3706_v16   ;;  %v4021_v11 = vsub.f32 %v321_v57, %v3844_v34  ;;  %v2047_v16 = vcvt.s32.f32 %v2046_v52  ;;  %v521_v33 = vmul.f32 %v2019_v31, %v3909_v44  ;;  %v2057_v40 = vand.u32 2147483648, %v3967_v48 }
  0xd7   : > { %v552_v36 = vsub.f32 %v3867_v46, %v520_v12  ;;  %v550_v45 = vsub.f32 %v3870_v47, %v518_v49  ;;  %v2052_v7 = vand.u32 2147483647, %v3967_v48  ;;  %v524_v57 = vmul.f32 %v2043_v61, %v3909_v44 }
  0xd8   : > { %v4060_v9 = vmul.f32 %v3846_v35, %v4021_v11  ;;  %v2048_v52 = vand.u32 2147483647, %v2047_v16  ;;  %v2058_v14 = vor.u32 %v2057_v40, %v2056_v41  ;;  %v2049_v53 = vand.u32 2147483648, %v3979_v37 }
  0xd9   : > { %v2062_v46 = vcvt.f32.s32 %v4047_v0  ;;  %v4074_v47 = vmul.f32 %v3846_v35, %v4050_v6  ;;  %v553_v43 = vsub.f32 %v3886_v56, %v521_v33  ;;  %v2044_v54 = vand.u32 2147483647, %v3979_v37 }
  0xda   : > { %1060 = vperm.xlu1 %3106, %v3689_v13   ;;  %1072 = vperm.xlu0 %3107, %v3718_v18   ;;  %v2035_v13 = vsel %vm4041_vm7, %v2034_v60, %v3948_v59  ;;  %v554_v18 = vsub.f32 %v3883_v55, %v522_v50  ;;  %v2070_v59 = vcvt.f32.s32 %v4035_v51  ;;  %v4077_v55 = vmul.f32 %v549_v38, %v549_v38 }
  0xdb   : > { %v523_v39 = vmul.f32 %v2035_v13, %v3909_v44  ;;  %v4082_v60 = vmul.f32 %v552_v36, %v552_v36  ;;  %v4084_v2 = vmul.f32 %v550_v45, %v550_v45  ;;  %vm4086_vm8 = vcmp.lt.f32.partialorder %v2052_v7, 8388608.0  ;;  %v341_v13 = vpop.permute.xlu1 %340 }
  0xdc   : > { %v2050_v49 = vor.u32 %v2049_v53, %v2048_v52  ;;  %v4090_v31 = vmul.f32 %v554_v18, %v554_v18  ;;  %v2059_v56 = vsel %vm4086_vm8, %v2058_v14, %v3967_v48  ;;  %v2071_v38 = vcvt.s32.f32 %v2070_v59  ;;  %v336_v52 = vpop.permute.xlu0 %335 }
  0xdd   : > { %v555_v16 = vsub.f32 %v3934_v63, %v523_v39  ;;  %v2063_v50 = vcvt.s32.f32 %v2062_v46  ;;  %v2078_v5 = vcvt.f32.s32 %v4074_v47  ;;  %v4100_v41 = vsub.f32 %v331_v42, %v3844_v34 }
  0xde   : > { %1068 = vperm.xlu1 %3106, %v3701_v15   ;;  %1080 = vperm.xlu0 %3107, %v3730_v20   ;;  %v2086_v15 = vcvt.f32.s32 %v4060_v9  ;;  %v556_v20 = vsub.f32 %v3931_v62, %v524_v57  ;;  %v4103_v61 = vmul.f32 %v553_v43, %v553_v43  ;;  %vm4105_vm9 = vcmp.lt.f32.partialorder %v2044_v54, 8388608.0 }
  0xdf   : > { %v4110_v4 = vsub.f32 %v326_v58, %v3844_v34  ;;  %v2051_v63 = vsel %vm4105_vm9, %v2050_v49, %v3979_v37  ;;  %v2068_v33 = vand.u32 2147483647, %v4035_v51  ;;  %v2072_v36 = vand.u32 2147483647, %v2071_v38 }
  0xe0   : > { %v2087_v48 = vcvt.s32.f32 %v2086_v15  ;;  %v4121_v40 = vmul.f32 %v556_v20, %v556_v20  ;;  %v2073_v45 = vand.u32 2147483648, %v4035_v51  ;;  %v4129_v37 = vmul.f32 %v555_v16, %v555_v16  ;;  %v351_v16 = vpop.permute.xlu1 %350 }
  0xe1   : > { %v4126_v7 = vmul.f32 %v3846_v35, %v4110_v4  ;;  %v2064_v18 = vand.u32 2147483647, %v2063_v50  ;;  %v2079_v57 = vcvt.s32.f32 %v2078_v5  ;;  %v525_v59 = vmul.f32 %v2051_v63, %v3909_v44 }
  0xe2   : > { %1076 = vperm.xlu1 %3106, %v3713_v17   ;;  %1088 = vperm.xlu0 %3107, %v3742_v22   ;;  %v526_v17 = vmul.f32 %v2059_v56, %v3909_v44  ;;  %v4119_v22 = vmul.f32 %v3846_v35, %v4100_v41  ;;  %v2060_v39 = vand.u32 2147483647, %v4047_v0  ;;  %v2088_v53 = vand.u32 2147483647, %v2087_v48 }
  0xe3   : > { %v4136_v46 = vsub.f32 %v341_v13, %v3844_v34  ;;  %v2065_v42 = vand.u32 2147483648, %v4047_v0  ;;  %v4141_v54 = vsub.f32 %v336_v52, %v3844_v34  ;;  %v2074_v15 = vor.u32 %v2073_v45, %v2072_v36 }
  0xe4   : > { %v2102_v14 = vcvt.f32.s32 %v4119_v22  ;;  %v2089_v58 = vand.u32 2147483648, %v4060_v9  ;;  %v2094_v12 = vcvt.f32.s32 %v4126_v7  ;;  %v4148_v49 = vsub.f32 %v3940_v10, %v526_v17 }
  0xe5   : > { %vm4150_vm10 = vcmp.lt.f32.partialorder %v2068_v33, 8388608.0  ;;  %v2066_v56 = vor.u32 %v2065_v42, %v2064_v18  ;;  %v2080_v38 = vand.u32 2147483647, %v2079_v57  ;;  %vm4155_vm11 = vcmp.lt.f32.partialorder %v2060_v39, 8388608.0  ;;  %v346_v18 = vpop.permute.xlu0 %345 }
  0xe6   : > { %1084 = vperm.xlu1 %3106, %v3725_v19   ;;  %1096 = vperm.xlu0 %3107, %v3754_v24   ;;  %v2084_v19 = vand.u32 2147483647, %v4060_v9  ;;  %v2103_v43 = vcvt.s32.f32 %v2102_v14  ;;  %v2076_v24 = vand.u32 2147483647, %v4074_v47  ;;  %v2090_v5 = vor.u32 %v2089_v58, %v2088_v53 }
  0xe7   : > { %v2095_v62 = vcvt.s32.f32 %v2094_v12  ;;  %v4164_v10 = vsub.f32 %v3951_v1, %v525_v59  ;;  %v2081_v48 = vand.u32 2147483648, %v4074_v47  ;;  %v4169_v63 = vmul.f32 %v3846_v35, %v4141_v54 }
  0xe8   : > { %v2104_v17 = vand.u32 2147483647, %v2103_v43  ;;  %vm4174_vm12 = vcmp.lt.f32.partialorder %v2084_v19, 8388608.0  ;;  %vm4178_vm13 = vcmp.lt.f32.partialorder %v2076_v24, 8388608.0  ;;  %v2067_v36 = vsel %vm4155_vm11, %v2066_v56, %v4047_v0  ;;  %v361_v19 = vpop.permute.xlu1 %360 }
  0xe9   : > { %v2082_v45 = vor.u32 %v2081_v48, %v2080_v38  ;;  %v2105_v52 = vand.u32 2147483648, %v4119_v22  ;;  %v2091_v57 = vsel %vm4174_vm12, %v2090_v5, %v4060_v9  ;;  %v2100_v14 = vand.u32 2147483647, %v4119_v22  ;;  %v356_v33 = vpop.permute.xlu0 %355 }
  0xea   : > { %1092 = vperm.xlu1 %3106, %v3737_v21   ;;  %1104 = vperm.xlu0 %3107, %v3766_v26   ;;  %v4161_v21 = vmul.f32 %v3846_v35, %v4136_v46  ;;  %v2075_v26 = vsel %vm4150_vm10, %v2074_v15, %v4035_v51  ;;  %v2110_v51 = vcvt.f32.s32 %v4169_v63  ;;  %v2096_v59 = vand.u32 2147483647, %v2095_v62 }
  0xeb   : > { %v528_v39 = vmul.f32 %v2075_v26, %v3909_v44  ;;  %v2106_v53 = vor.u32 %v2105_v52, %v2104_v17  ;;  %v4196_v42 = vsub.f32 %v351_v16, %v3844_v34  ;;  %v527_v43 = vmul.f32 %v2067_v36, %v3909_v44 }
  0xec   : > { %v2118_v1 = vcvt.f32.s32 %v4161_v21  ;;  %v2111_v0 = vcvt.s32.f32 %v2110_v51  ;;  %v4201_v58 = vsub.f32 %v346_v18, %v3844_v34  ;;  %v530_v9 = vmul.f32 %v2091_v57, %v3909_v44 }
  0xed   : > { %v2083_v24 = vsel %vm4178_vm13, %v2082_v45, %v4074_v47  ;;  %v2092_v12 = vand.u32 2147483647, %v4126_v7  ;;  %v4211_v20 = vmul.f32 %v3846_v35, %v4196_v42  ;;  %vm4214_vm14 = vcmp.lt.f32.partialorder %v2100_v14, 8388608.0  ;;  %v371_v45 = vpop.permute.xlu1 %370 }
  0xee   : > { %1100 = vperm.xlu1 %3106, %v3749_v23   ;;  %1112 = vperm.xlu0 %3107, %v3778_v28   ;;  %v2119_v23 = vcvt.s32.f32 %v2118_v1  ;;  %v2097_v28 = vand.u32 2147483648, %v4126_v7  ;;  %v4221_v16 = vmul.f32 %v3846_v35, %v4201_v58  ;;  %v2107_v47 = vsel %vm4214_vm14, %v2106_v53, %v4119_v22 }
  0xef   : > { %v2116_v50 = vand.u32 2147483647, %v4161_v21  ;;  %v2112_v5 = vand.u32 2147483647, %v2111_v0  ;;  %v560_v62 = vsub.f32 %v4008_v3, %v528_v39  ;;  %v529_v48 = vmul.f32 %v2083_v24, %v3909_v44 }
  0xf0   : > { %v2120_v15 = vand.u32 2147483647, %v2119_v23  ;;  %v2098_v38 = vor.u32 %v2097_v28, %v2096_v59  ;;  %v2134_v26 = vcvt.f32.s32 %v4211_v20  ;;  %v559_v13 = vsub.f32 %v4011_v8, %v527_v43  ;;  %v6380_v23 = vld [vmem:[#allocation11_spill] sm:$0xff] }
  0xf1   : > { %vm4235_vm15 = vcmp.lt.f32.partialorder %v2092_v12, 8388608.0  ;;  %v2113_v1 = vand.u32 2147483648, %v4169_v63  ;;  %v2126_v36 = vcvt.f32.s32 %v4221_v16  ;;  %v562_v3 = vsub.f32 %v4021_v11, %v530_v9  ;;  %v381_v12 = vpop.permute.xlu1 %380 }
  0xf2   : > { %1108 = vperm.xlu1 %3106, %v3761_v25   ;;  %1120 = vperm.xlu0 %3107, %v3790_v30   ;;  %v2121_v25 = vand.u32 2147483648, %v4161_v21  ;;  %v4228_v30 = vsub.f32 %v361_v19, %v3844_v34  ;;  %v532_v52 = vmul.f32 %v2107_v47, %v3909_v44  ;;  %v2108_v8 = vand.u32 2147483647, %v4169_v63  ;;  %v6383_v47 = vld [vmem:[#allocation12_spill] sm:$0xff] }
  0xf3   : > { %vm4248_vm0 = vcmp.lt.f32.partialorder %v2116_v50, 8388608.0  ;;  %v2114_v18 = vor.u32 %v2113_v1, %v2112_v5  ;;  %v561_v11 = vsub.f32 %v4050_v6, %v529_v48  ;;  %v2135_v14 = vcvt.s32.f32 %v2134_v26 }
  0xf4   : > { %v2122_v17 = vor.u32 %v2121_v25, %v2120_v15  ;;  %v4254_v57 = vmul.f32 %v3846_v35, %v4228_v30  ;;  %v4264_v59 = vsub.f32 %v371_v45, %v3844_v34  ;;  %v4269_v39 = vmul.f32 %v4148_v49, %v4148_v49  ;;  %v366_v15 = vpop.permute.xlu0 %365 }
  0xf5   : > { %v2127_v0 = vcvt.s32.f32 %v2126_v36  ;;  %v4275_v6 = vmul.f32 %v4164_v10, %v4164_v10  ;;  %v564_v43 = vsub.f32 %v4100_v41, %v532_v52  ;;  %vm4280_vm1 = vcmp.lt.f32.partialorder %v2108_v8, 8388608.0 }
  0xf6   : > { %1116 = vperm.xlu1 %3106, %v3773_v27   ;;  %1128 = vperm.xlu0 %3107, %v3802_v32   ;;  %v2099_v27 = vsel %vm4235_vm15, %v2098_v38, %v4126_v7  ;;  %v4257_v32 = vsub.f32 %v356_v33, %v3844_v34  ;;  %v2123_v7 = vsel %vm4248_vm0, %v2122_v17, %v4161_v21  ;;  %v2150_v19 = vcvt.f32.s32 %v4254_v57 }
  0xf7   : > { %v531_v53 = vmul.f32 %v2099_v27, %v3909_v44  ;;  %v4277_v21 = vmul.f32 %v560_v62, %v560_v62  ;;  %v4284_v49 = vmul.f32 %v559_v13, %v559_v13  ;;  %v534_v9 = vmul.f32 %v2123_v7, %v3909_v44 }
  0xf8   : > { %v2115_v24 = vsel %vm4280_vm1, %v2114_v18, %v4169_v63  ;;  %v4292_v10 = vmul.f32 %v3846_v35, %v4257_v32  ;;  %v4294_v56 = vmul.f32 %v562_v3, %v562_v3  ;;  %v4296_v41 = vmul.f32 %v561_v11, %v561_v11  ;;  %v376_v27 = vpop.permute.xlu0 %375  ;;  %v391_v11 = vpop.permute.xlu1 %390 }
  0xf9   : > { %v2136_v38 = vand.u32 2147483647, %v2135_v14  ;;  %v4300_v25 = vmul.f32 %v3846_v35, %v4264_v59  ;;  %v563_v50 = vsub.f32 %v4110_v4, %v531_v53  ;;  %v2132_v63 = vand.u32 2147483647, %v4211_v20 }
  0xfa   : > { %1124 = vperm.xlu1 %3106, %v6380_v23   ;;  %v2128_v5 = vand.u32 2147483647, %v2127_v0  ;;  %v2151_v62 = vcvt.s32.f32 %v2150_v19  ;;  %v4305_v48 = vmul.f32 %v564_v43, %v564_v43  ;;  %v533_v17 = vmul.f32 %v2115_v24, %v3909_v44 }
  0xfb   : > { %v2137_v26 = vand.u32 2147483648, %v4211_v20  ;;  %v4310_v33 = vsub.f32 %v366_v15, %v3844_v34  ;;  %v566_v13 = vsub.f32 %v4136_v46, %v534_v9  ;;  %v2124_v22 = vand.u32 2147483647, %v4221_v16 }
  0xfc   : > { %v2129_v1 = vand.u32 2147483648, %v4221_v16  ;;  %v2142_v4 = vcvt.f32.s32 %v4292_v10  ;;  %v2166_v45 = vcvt.f32.s32 %v4300_v25  ;;  %v4322_v52 = vsub.f32 %v381_v12, %v3844_v34 }
  0xfd   : > { %v2138_v36 = vor.u32 %v2137_v26, %v2136_v38  ;;  %v4319_v3 = vmul.f32 %v3846_v35, %v4310_v33  ;;  %v4324_v8 = vmul.f32 %v563_v50, %v563_v50  ;;  %vm4326_vm2 = vcmp.lt.f32.partialorder %v2132_v63, 8388608.0 }
  0xfe   : > { %1132 = vperm.xlu1 %3106, %v6383_v47   ;;  %v2130_v51 = vor.u32 %v2129_v1, %v2128_v5  ;;  %v2152_v18 = vand.u32 2147483647, %v2151_v62  ;;  %v565_v7 = vsub.f32 %v4141_v54, %v533_v17  ;;  %v2148_v14 = vand.u32 2147483647, %v4254_v57  ;;  %v401_v1 = vpop.permute.xlu1 %400 }
  0xff   : > { %v2153_v23 = vand.u32 2147483648, %v4254_v57  ;;  %v2158_v53 = vcvt.f32.s32 %v4319_v3  ;;  %v2140_v0 = vand.u32 2147483647, %v4292_v10  ;;  %v2143_v19 = vcvt.s32.f32 %v2142_v4 }
 0x100   : > { %v4337_v43 = vmul.f32 %v3846_v35, %v4322_v52  ;;  %v4340_v28 = vsub.f32 %v376_v27, %v3844_v34  ;;  %v4342_v15 = vmul.f32 %v566_v13, %v566_v13  ;;  %v2139_v54 = vsel %vm4326_vm2, %v2138_v36, %v4211_v20 }
 0x101   : > { %vm4347_vm3 = vcmp.lt.f32.partialorder %v2124_v22, 8388608.0  ;;  %v2167_v24 = vcvt.s32.f32 %v2166_v45  ;;  %v2154_v38 = vor.u32 %v2153_v23, %v2152_v18  ;;  %v2159_v47 = vcvt.s32.f32 %v2158_v53  ;;  %v386_v22 = vpop.permute.xlu0 %385 }
 0x102   : > { %v2131_v12 = vsel %vm4347_vm3, %v2130_v51, %v4221_v16  ;;  %v2182_v50 = vcvt.f32.s32 %v4337_v43  ;;  %v4355_v63 = vmul.f32 %v565_v7, %v565_v7  ;;  %vm4357_vm4 = vcmp.lt.f32.partialorder %v2148_v14, 8388608.0 }
 0x103   : > { %v2145_v20 = vand.u32 2147483648, %v4292_v10  ;;  %v4364_v62 = vmul.f32 %v3846_v35, %v4340_v28  ;;  %v536_v17 = vmul.f32 %v2139_v54, %v3909_v44  ;;  %vm4367_vm5 = vcmp.lt.f32.partialorder %v2140_v0, 8388608.0 }
 0x104   : > { %v2144_v26 = vand.u32 2147483647, %v2143_v19  ;;  %v2183_v13 = vcvt.s32.f32 %v2182_v50  ;;  %v535_v4 = vmul.f32 %v2131_v12, %v3909_v44  ;;  %v2164_v36 = vand.u32 2147483647, %v4300_v25 }
 0x105   : > { %v2168_v45 = vand.u32 2147483647, %v2167_v24  ;;  %v2174_v27 = vcvt.f32.s32 %v4364_v62  ;;  %v2155_v46 = vsel %vm4357_vm4, %v2154_v38, %v4254_v57  ;;  %v2169_v51 = vand.u32 2147483648, %v4300_v25 }
 0x106   : > { %v2160_v18 = vand.u32 2147483647, %v2159_v47  ;;  %v4379_v7 = vsub.f32 %v391_v11, %v3844_v34  ;;  %v2184_v14 = vand.u32 2147483647, %v2183_v13  ;;  %v4382_v53 = vsub.f32 %v386_v22, %v3844_v34 }
 0x107   : > { %v2175_v23 = vcvt.s32.f32 %v2174_v27  ;;  %v4385_v0 = vsub.f32 %v401_v1, %v3844_v34  ;;  %v2146_v19 = vor.u32 %v2145_v20, %v2144_v26  ;;  %v2156_v54 = vand.u32 2147483647, %v4319_v3  ;;  %v396_v26 = vpop.permute.xlu0 %395 }
 0x108   : > { %v2161_v9 = vand.u32 2147483648, %v4319_v3  ;;  %v4391_v57 = vmul.f32 %v3846_v35, %v4379_v7  ;;  %v2170_v24 = vor.u32 %v2169_v51, %v2168_v45  ;;  %v2185_v11 = vand.u32 2147483648, %v4337_v43  ;;  %v411_v51 = vpop.permute.xlu1 %410 }
 0x109   : > { %6392 = vst [vmem:[#allocation11_spill] sm:$0xff] %v4385_v0  ;;  %v2176_v12 = vand.u32 2147483647, %v2175_v23  ;;  %v4396_v38 = vmul.f32 %v3846_v35, %v4382_v53  ;;  %v568_v47 = vsub.f32 %v4196_v42, %v536_v17  ;;  %vm4399_vm6 = vcmp.lt.f32.partialorder %v2164_v36, 8388608.0 }
 0x10a   : > { %v2180_v5 = vand.u32 2147483647, %v4337_v43  ;;  %v2198_v20 = vcvt.f32.s32 %v4391_v57  ;;  %v2162_v13 = vor.u32 %v2161_v9, %v2160_v18  ;;  %v2186_v22 = vor.u32 %v2185_v11, %v2184_v14 }
 0x10b   : > { %v2177_v1 = vand.u32 2147483648, %v4364_v62  ;;  %v4408_v45 = vmul.f32 %v3846_v35, %v4385_v0  ;;  %v538_v27 = vmul.f32 %v2155_v46, %v3909_v44  ;;  %v2172_v42 = vand.u32 2147483647, %v4364_v62 }
 0x10c   : > { %v2199_v17 = vcvt.s32.f32 %v2198_v20  ;;  %v2190_v36 = vcvt.f32.s32 %v4396_v38  ;;  %v2147_v23 = vsel %vm4367_vm5, %v2146_v19, %v4292_v10  ;;  %v2171_v18 = vsel %vm4399_vm6, %v2170_v24, %v4300_v25 }
 0x10d   : > { %vm4419_vm7 = vcmp.lt.f32.partialorder %v2156_v54, 8388608.0  ;;  %v2178_v9 = vor.u32 %v2177_v1, %v2176_v12  ;;  %vm4423_vm8 = vcmp.lt.f32.partialorder %v2180_v5, 8388608.0  ;;  %v2201_v20 = vand.u32 2147483648, %v4391_v57  ;;  %v406_v5 = vpop.permute.xlu0 %405 }
 0x10e   : > { %v2200_v11 = vand.u32 2147483647, %v2199_v17  ;;  %v2191_v0 = vcvt.s32.f32 %v2190_v36  ;;  %v2163_v10 = vsel %vm4419_vm7, %v2162_v13, %v4319_v3  ;;  %v2187_v25 = vsel %vm4423_vm8, %v2186_v22, %v4337_v43 }
 0x10f   : > { %v2196_v16 = vand.u32 2147483647, %v4391_v57  ;;  %v2214_v19 = vcvt.f32.s32 %v4408_v45  ;;  %v567_v54 = vsub.f32 %v4201_v58, %v535_v4  ;;  %vm4437_vm9 = vcmp.lt.f32.partialorder %v2172_v42, 8388608.0 }
 0x110   : > { %v2202_v12 = vor.u32 %v2201_v20, %v2200_v11  ;;  %v2192_v50 = vand.u32 2147483647, %v2191_v0  ;;  %v537_v3 = vmul.f32 %v2147_v23, %v3909_v44  ;;  %v540_v13 = vmul.f32 %v2171_v18, %v3909_v44  ;;  %v652_v0 = vpop.permute.xlu1 %651 }
 0x111   : > { %v2179_v43 = vsel %vm4437_vm9, %v2178_v9, %v4364_v62  ;;  %v4447_v22 = vsub.f32 %v396_v26, %v3844_v34  ;;  %v539_v58 = vmul.f32 %v2163_v10, %v3909_v44  ;;  %v542_v4 = vmul.f32 %v2187_v25, %v3909_v44  ;;  %v4461_v26 = vld [vmem:[%s3839_s14 + $0x1] ss:$0 sm:$0xff] }
 0x112   : > { %v2193_v1 = vand.u32 2147483648, %v4396_v38  ;;  %v2215_v42 = vcvt.s32.f32 %v2214_v19  ;;  %v4452_v17 = vmul.f32 %v568_v47, %v568_v47  ;;  %v570_v36 = vsub.f32 %v4228_v30, %v538_v27 }
 0x113   : > { %6401 = vst [vmem:[#allocation12_spill] sm:$0xff] %v4447_v22  ;;  %vm4455_vm10 = vcmp.lt.f32.partialorder %v2196_v16, 8388608.0  ;;  %v2188_v62 = vand.u32 2147483647, %v4396_v38  ;;  %v4463_v18 = vmul.f32 %v567_v54, %v567_v54  ;;  %v541_v14 = vmul.f32 %v2179_v43, %v3909_v44 }
 0x114   : > { %v2203_v9 = vsel %vm4455_vm10, %v2202_v12, %v4391_v57  ;;  %v2194_v47 = vor.u32 %v2193_v1, %v2192_v50  ;;  %v569_v46 = vsub.f32 %v4257_v32, %v537_v3  ;;  %v572_v30 = vsub.f32 %v4264_v59, %v540_v13  ;;  %v648_v57 = vpop.permute.xlu0 %647  ;;  %v656_v12 = vpop.permute.xlu1 %655 }
 0x115   : > { %v4473_v27 = vmul.f32 %v3846_v35, %v4447_v22  ;;  %v4476_v11 = vsub.f32 %v411_v51, %v3844_v34  ;;  %v571_v20 = vsub.f32 %v4310_v33, %v539_v58  ;;  %v574_v10 = vsub.f32 %v4322_v52, %v542_v4  ;;  %v6411_v4 = vld [vmem:[#allocation13_spill] sm:$0xff] }
 0x116   : > { %v2216_v25 = vand.u32 2147483647, %v2215_v42  ;;  %v4481_v16 = vsub.f32 %v652_v0, %v4461_v26  ;;  %v4483_v19 = vmul.f32 %v570_v36, %v570_v36  ;;  %v544_v32 = vmul.f32 %v2203_v9, %v3909_v44 }
 0x117   : > { %6404 = vst [vmem:[#allocation15_spill] sm:$0xff] %v4476_v11  ;;  %vm4486_vm11 = vcmp.lt.f32.partialorder %v2188_v62, 8388608.0  ;;  %v2212_v51 = vand.u32 2147483647, %v4408_v45  ;;  %v573_v54 = vsub.f32 %v4340_v28, %v541_v14  ;;  %v2217_v52 = vand.u32 2147483648, %v4408_v45 }
 0x118   : > { %6405 = vst [vmem:[#allocation16_spill] sm:$0xff] %v4483_v19  ;;  %v2195_v33 = vsel %vm4486_vm11, %v2194_v47, %v4396_v38  ;;  %v4497_v24 = vsub.f32 %v406_v5, %v3844_v34  ;;  %v4499_v50 = vmul.f32 %v569_v46, %v569_v46  ;;  %v4501_v3 = vmul.f32 %v572_v30, %v572_v30 }
 0x119   : > { %v2206_v13 = vcvt.f32.s32 %v4473_v27  ;;  %v4506_v43 = vmul.f32 %v3846_v35, %v4476_v11  ;;  %v4508_v28 = vmul.f32 %v571_v20, %v571_v20  ;;  %v4510_v58 = vmul.f32 %v574_v10, %v574_v10 }
 0x11a   : > { %6408 = vst [vmem:[#allocation17_spill] sm:$0xff] %v4497_v24  ;;  %6409 = vst [vmem:[#allocation18_spill] sm:$0xff] %v4501_v3  ;;  %v2218_v38 = vor.u32 %v2217_v52, %v2216_v25  ;;  %v814_v34 = vmul.f32 %v6411_v4, %v4481_v16  ;;  %v576_v5 = vsub.f32 %v4379_v7, %v544_v32  ;;  %vm4524_vm12 = vcmp.lt.f32.partialorder %v2212_v51, 8388608.0  ;;  %v660_v7 = vpop.permute.xlu0 %659 }
 0x11b   : > { %6410 = vst [vmem:[#allocation19_spill] sm:$0xff] %v4510_v58  ;;  %v543_v1 = vmul.f32 %v2195_v33, %v3909_v44  ;;  %v4517_v42 = vsub.f32 %v648_v57, %v4461_v26  ;;  %v4520_v0 = vsub.f32 %v656_v12, %v4461_v26  ;;  %v4522_v36 = vmul.f32 %v573_v54, %v573_v54 }
 0x11c   : > { %v4531_v14 = vmul.f32 %v3846_v35, %v4497_v24  ;;  %v4533_v9 = vcvt.s32.f32 %v2206_v13  ;;  %v2246_v30 = vcvt.f32.s32 %v814_v34  ;;  %v2219_v20 = vsel %vm4524_vm12, %v2218_v38, %v4408_v45 }
 0x11d   : > { %v2230_v10 = vcvt.f32.s32 %v4506_v43  ;;  %v813_v25 = vmul.f32 %v6411_v4, %v4517_v42  ;;  %v815_v35 = vmul.f32 %v6411_v4, %v4520_v0  ;;  %v4545_v57 = vmul.f32 %v576_v5, %v576_v5  ;;  %v664_v5 = vpop.permute.xlu1 %663 }
 0x11e   : > { %v575_v32 = vsub.f32 %v4382_v53, %v543_v1  ;;  %v2247_v51 = vcvt.s32.f32 %v2246_v30  ;;  %v2244_v33 = vand.u32 2147483647, %v814_v34  ;;  %v4551_v45 = vsub.f32 %v660_v7, %v4461_v26  ;;  %v668_v30 = vpop.permute.xlu0 %667 }
 0x11f   : > { %6414 = vst [vmem:[#allocation13_spill] sm:$0xff] %v4545_v57  ;;  %v2238_v52 = vcvt.f32.s32 %v813_v25  ;;  %v4554_v12 = vmul.f32 %v2219_v20, %v3909_v44  ;;  %v2249_v38 = vand.u32 2147483648, %v814_v34  ;;  %v2236_v23 = vand.u32 2147483647, %v813_v25 }
 0x120   : > { %v2248_v13 = vand.u32 2147483647, %v2247_v51  ;;  %v2241_v1 = vand.u32 2147483648, %v813_v25  ;;  %v2252_v59 = vand.u32 2147483647, %v815_v35  ;;  %v4557_v47 = vmul.f32 %v575_v32, %v575_v32 }
 0x121   : > { %v2239_v53 = vcvt.s32.f32 %v2238_v52  ;;  %v4559_v54 = vcvt.s32.f32 %v2230_v10  ;;  %v2254_v7 = vcvt.f32.s32 %v815_v35  ;;  %vm2245_vm13 = vcmp.lt.f32.partialorder %v2244_v33, 8388608.0  ;;  %v6418_v10 = vld [vmem:[#allocation14_spill] sm:$0xff] }
 0x122   : > { %6415 = vst [vmem:[#allocation20_spill] sm:$0xff] %v4557_v47  ;;  %v2250_v62 = vor.u32 %v2249_v38, %v2248_v13  ;;  %v816_v20 = vmul.f32 %v6411_v4, %v4551_v45  ;;  %v4564_v51 = vsub.f32 %v664_v5, %v4461_v26  ;;  %vm4566_vm14 = vcmp.lt.f32.partialorder %v2236_v23, 8388608.0 }
 0x123   : > { %v2240_v11 = vand.u32 2147483647, %v2239_v53  ;;  %v2255_v46 = vcvt.s32.f32 %v2254_v7  ;;  %v4571_v32 = vsub.f32 %v668_v30, %v4461_v26  ;;  %vm4574_vm15 = vcmp.lt.f32.partialorder %v2252_v59, 8388608.0 }
 0x124   : > { %v2251_v58 = vsel %vm2245_vm13, %v2250_v62, %v814_v34  ;;  %v2260_v53 = vand.u32 2147483647, %v816_v20  ;;  %v2257_v5 = vand.u32 2147483648, %v815_v35  ;;  %v2262_v3 = vcvt.f32.s32 %v816_v20  ;;  %v672_v62 = vpop.permute.xlu1 %671 }
 0x125   : > { %v879_v13 = vmul.f32 %v2251_v58, %v6418_v10  ;;  %v2242_v38 = vor.u32 %v2241_v1, %v2240_v11  ;;  %v2256_v47 = vand.u32 2147483647, %v2255_v46  ;;  %v817_v34 = vmul.f32 %v6411_v4, %v4564_v51 }
 0x126   : > { %v2265_v7 = vand.u32 2147483648, %v816_v20  ;;  %v818_v11 = vmul.f32 %v6411_v4, %v4571_v32  ;;  %v2263_v1 = vcvt.s32.f32 %v2262_v3  ;;  %vm4586_vm0 = vcmp.lt.f32.partialorder %v2260_v53, 8388608.0 }
 0x127   : > { %v911_v23 = vsub.f32 %v4481_v16, %v879_v13  ;;  %v2243_v30 = vsel %vm4566_vm14, %v2242_v38, %v813_v25  ;;  %v2258_v59 = vor.u32 %v2257_v5, %v2256_v47  ;;  %v2268_v46 = vand.u32 2147483647, %v817_v34 }
 0x128   : > { %v878_v58 = vmul.f32 %v2243_v30, %v6418_v10  ;;  %v2270_v24 = vcvt.f32.s32 %v817_v34  ;;  %v4591_v16 = vsub.f32 %v672_v62, %v4461_v26  ;;  %v2264_v13 = vand.u32 2147483647, %v2263_v1  ;;  %v676_v30 = vpop.permute.xlu0 %675 }
 0x129   : > { %v943_v19 = vmul.f32 %v911_v23, %v911_v23  ;;  %v2259_v52 = vsel %vm4574_vm15, %v2258_v59, %v815_v35  ;;  %v2273_v38 = vand.u32 2147483648, %v817_v34  ;;  %v2276_v5 = vand.u32 2147483647, %v818_v11 }
 0x12a   : > { %v910_v25 = vsub.f32 %v4517_v42, %v878_v58  ;;  %v880_v47 = vmul.f32 %v2259_v52, %v6418_v10  ;;  %v2271_v53 = vcvt.s32.f32 %v2270_v24  ;;  %v2266_v22 = vor.u32 %v2265_v7, %v2264_v13  ;;  %v680_v58 = vpop.permute.xlu1 %679 }
 0x12b   : > { %v4597_v3 = vadd.f32 %v943_v19, %v4084_v2  ;;  %vm4600_vm1 = vcmp.lt.f32.partialorder %v2268_v46, 8388608.0  ;;  %v2278_v42 = vcvt.f32.s32 %v818_v11  ;;  %v819_v59 = vmul.f32 %v6411_v4, %v4591_v16 }
 0x12c   : > { %v942_v23 = vmul.f32 %v910_v25, %v910_v25  ;;  %v912_v35 = vsub.f32 %v4520_v0, %v880_v47  ;;  %v2272_v33 = vand.u32 2147483647, %v2271_v53  ;;  %v4608_v2 = vsub.f32 %v676_v30, %v4461_v26 }
 0x12d   : > { %v2267_v24 = vsel %vm4586_vm0, %v2266_v22, %v816_v20  ;;  %v2279_v7 = vcvt.s32.f32 %v2278_v42  ;;  %v2281_v1 = vand.u32 2147483648, %v818_v11  ;;  %v4617_v0 = vsub.f32 %v680_v58, %v4461_v26  ;;  %v684_v58 = vpop.permute.xlu0 %683 }
 0x12e   : > { %v4611_v19 = vadd.f32 %v942_v23, %v4077_v55  ;;  %v944_v46 = vmul.f32 %v912_v35, %v912_v35  ;;  %v881_v25 = vmul.f32 %v2267_v24, %v6418_v10  ;;  %v2274_v52 = vor.u32 %v2273_v38, %v2272_v33  ;;  %v688_v55 = vpop.permute.xlu1 %687 }
 0x12f   : > { %v2280_v13 = vand.u32 2147483647, %v2279_v7  ;;  %v2284_v47 = vand.u32 2147483647, %v819_v59  ;;  %v2286_v53 = vcvt.f32.s32 %v819_v59  ;;  %v820_v30 = vmul.f32 %v6411_v4, %v4608_v2 }
 0x130   : > { %v4623_v57 = vadd.f32 %v944_v46, %v4014_v29  ;;  %v913_v22 = vsub.f32 %v4551_v45, %v881_v25  ;;  %v2275_v20 = vsel %vm4600_vm1, %v2274_v52, %v817_v34  ;;  %vm2277_vm2 = vcmp.lt.f32.partialorder %v2276_v5, 8388608.0 }
 0x131   : > { %v882_v38 = vmul.f32 %v2275_v20, %v6418_v10  ;;  %v2282_v23 = vor.u32 %v2281_v1, %v2280_v13  ;;  %v2287_v42 = vcvt.s32.f32 %v2286_v53  ;;  %v2289_v33 = vand.u32 2147483648, %v819_v59 }
 0x132   : > { %v945_v35 = vmul.f32 %v913_v22, %v913_v22  ;;  %v2294_v24 = vcvt.f32.s32 %v820_v30  ;;  %v821_v7 = vmul.f32 %v6411_v4, %v4617_v0  ;;  %vm4632_vm3 = vcmp.lt.f32.partialorder %v2284_v47, 8388608.0 }
 0x133   : > { %v914_v29 = vsub.f32 %v4564_v51, %v882_v38  ;;  %v2283_v46 = vsel %vm2277_vm2, %v2282_v23, %v818_v11  ;;  %v2288_v34 = vand.u32 2147483647, %v2287_v42  ;;  %v2292_v1 = vand.u32 2147483647, %v820_v30 }
 0x134   : > { %v4637_v5 = vadd.f32 %v945_v35, %v4082_v60  ;;  %v883_v62 = vmul.f32 %v2283_v46, %v6418_v10  ;;  %v2295_v25 = vcvt.s32.f32 %v2294_v24  ;;  %v2297_v53 = vand.u32 2147483648, %v820_v30  ;;  %v692_v35 = vpop.permute.xlu0 %691 }
 0x135   : > { %v946_v52 = vmul.f32 %v914_v29, %v914_v29  ;;  %v2290_v13 = vor.u32 %v2289_v33, %v2288_v34  ;;  %v2302_v22 = vcvt.f32.s32 %v821_v7  ;;  %v2300_v11 = vand.u32 2147483647, %v821_v7 }
 0x136   : > { %v915_v20 = vsub.f32 %v4571_v32, %v883_v62  ;;  %v2296_v51 = vand.u32 2147483647, %v2295_v25  ;;  %v4642_v47 = vsub.f32 %v684_v58, %v4461_v26  ;;  %v4650_v42 = vsub.f32 %v688_v55, %v4461_v26  ;;  %v696_v58 = vpop.permute.xlu1 %695 }
 0x137   : > { %v4645_v38 = vadd.f32 %v946_v52, %v4103_v61  ;;  %v2291_v60 = vsel %vm4632_vm3, %v2290_v13, %v819_v59  ;;  %v2303_v23 = vcvt.s32.f32 %v2302_v22  ;;  %vm2293_vm4 = vcmp.lt.f32.partialorder %v2292_v1, 8388608.0 }
 0x138   : > { %v947_v33 = vmul.f32 %v915_v20, %v915_v20  ;;  %v884_v24 = vmul.f32 %v2291_v60, %v6418_v10  ;;  %v2298_v32 = vor.u32 %v2297_v53, %v2296_v51  ;;  %v822_v29 = vmul.f32 %v6411_v4, %v4642_v47 }
 0x139   : > { %v2304_v46 = vand.u32 2147483647, %v2303_v23  ;;  %v2305_v61 = vand.u32 2147483648, %v821_v7  ;;  %v823_v45 = vmul.f32 %v6411_v4, %v4650_v42  ;;  %v4662_v62 = vsub.f32 %v692_v35, %v4461_v26 }
 0x13a   : > { %v4658_v59 = vadd.f32 %v947_v33, %v4090_v31  ;;  %v916_v55 = vsub.f32 %v4591_v16, %v884_v24  ;;  %v2299_v34 = vsel %vm2293_vm4, %v2298_v32, %v820_v30  ;;  %v2310_v13 = vcvt.f32.s32 %v822_v29 }
 0x13b   : > { %v885_v25 = vmul.f32 %v2299_v34, %v6418_v10  ;;  %v2306_v52 = vor.u32 %v2305_v61, %v2304_v46  ;;  %v4666_v1 = vsub.f32 %v696_v58, %v4461_v26  ;;  %vm2301_vm5 = vcmp.lt.f32.partialorder %v2300_v11, 8388608.0  ;;  %v700_v46 = vpop.permute.xlu0 %699 }
 0x13c   : > { %v948_v53 = vmul.f32 %v916_v55, %v916_v55  ;;  %v2308_v22 = vand.u32 2147483647, %v822_v29  ;;  %v2318_v20 = vcvt.f32.s32 %v823_v45  ;;  %v2311_v60 = vcvt.s32.f32 %v2310_v13  ;;  %v704_v55 = vpop.permute.xlu1 %703 }
 0x13d   : > { %v917_v31 = vsub.f32 %v4608_v2, %v885_v25  ;;  %v2307_v51 = vsel %vm2301_vm5, %v2306_v52, %v821_v7  ;;  %v2316_v16 = vand.u32 2147483647, %v823_v45  ;;  %v2313_v35 = vand.u32 2147483648, %v822_v29 }
 0x13e   : > { %v4670_v30 = vadd.f32 %v948_v53, %v4129_v37  ;;  %v886_v23 = vmul.f32 %v2307_v51, %v6418_v10  ;;  %v2319_v33 = vcvt.s32.f32 %v2318_v20  ;;  %v2312_v32 = vand.u32 2147483647, %v2311_v60 }
 0x13f   : > { %v949_v24 = vmul.f32 %v917_v31, %v917_v31  ;;  %v824_v58 = vmul.f32 %v6411_v4, %v4662_v62  ;;  %v825_v11 = vmul.f32 %v6411_v4, %v4666_v1  ;;  %vm4678_vm6 = vcmp.lt.f32.partialorder %v2308_v22, 8388608.0 }
 0x140   : > { %v918_v2 = vsub.f32 %v4617_v0, %v886_v23  ;;  %v2320_v37 = vand.u32 2147483647, %v2319_v33  ;;  %v2321_v61 = vand.u32 2147483648, %v823_v45  ;;  %v2314_v25 = vor.u32 %v2313_v35, %v2312_v32 }
 0x141   : > { %v4683_v34 = vadd.f32 %v949_v24, %v4121_v40  ;;  %vm2317_vm7 = vcmp.lt.f32.partialorder %v2316_v16, 8388608.0  ;;  %v2326_v52 = vcvt.f32.s32 %v824_v58  ;;  %v2324_v20 = vand.u32 2147483647, %v824_v58 }
 0x142   : > { %v950_v13 = vmul.f32 %v918_v2, %v918_v2  ;;  %v2322_v53 = vor.u32 %v2321_v61, %v2320_v37  ;;  %v4686_v31 = vsub.f32 %v700_v46, %v4461_v26  ;;  %v2315_v0 = vsel %vm4678_vm6, %v2314_v25, %v822_v29  ;;  %v708_v2 = vpop.permute.xlu0 %707  ;;  %v712_v61 = vpop.permute.xlu1 %711 }
 0x143   : > { %v2327_v22 = vcvt.s32.f32 %v2326_v52  ;;  %v2334_v51 = vcvt.f32.s32 %v825_v11  ;;  %v4691_v60 = vsub.f32 %v704_v55, %v4461_v26  ;;  %v887_v16 = vmul.f32 %v2315_v0, %v6418_v10 }
 0x144   : > { %v4694_v40 = vadd.f32 %v950_v13, %v4275_v6  ;;  %v2323_v23 = vsel %vm2317_vm7, %v2322_v53, %v823_v45  ;;  %v2332_v35 = vand.u32 2147483647, %v825_v11  ;;  %v2329_v32 = vand.u32 2147483648, %v824_v58 }
 0x145   : > { %v888_v33 = vmul.f32 %v2323_v23, %v6418_v10  ;;  %v2328_v24 = vand.u32 2147483647, %v2327_v22  ;;  %v2335_v46 = vcvt.s32.f32 %v2334_v51  ;;  %v919_v29 = vsub.f32 %v4642_v47, %v887_v16 }
 0x146   : > { %vm4699_vm8 = vcmp.lt.f32.partialorder %v2324_v20, 8388608.0  ;;  %v2337_v37 = vand.u32 2147483648, %v825_v11  ;;  %v826_v6 = vmul.f32 %v6411_v4, %v4686_v31  ;;  %v827_v52 = vmul.f32 %v6411_v4, %v4691_v60 }
 0x147   : > { %v920_v45 = vsub.f32 %v4650_v42, %v888_v33  ;;  %v2330_v55 = vor.u32 %v2329_v32, %v2328_v24  ;;  %v2336_v25 = vand.u32 2147483647, %v2335_v46  ;;  %v951_v13 = vmul.f32 %v919_v29, %v919_v29 }
 0x148   : > { %vm4708_vm9 = vcmp.lt.f32.partialorder %v2332_v35, 8388608.0  ;;  %v2342_v47 = vcvt.f32.s32 %v826_v6  ;;  %v4713_v20 = vsub.f32 %v708_v2, %v4461_v26  ;;  %v2340_v42 = vand.u32 2147483647, %v826_v6 }
 0x149   : > { %v952_v0 = vmul.f32 %v920_v45, %v920_v45  ;;  %v2331_v22 = vsel %vm4699_vm8, %v2330_v55, %v824_v58  ;;  %v2338_v51 = vor.u32 %v2337_v37, %v2336_v25  ;;  %v4718_v16 = vadd.f32 %v951_v13, %v4269_v39  ;;  %v716_v37 = vpop.permute.xlu0 %715  ;;  %v720_v45 = vpop.permute.xlu1 %719 }
 0x14a   : > { %v889_v23 = vmul.f32 %v2331_v22, %v6418_v10  ;;  %v2343_v33 = vcvt.s32.f32 %v2342_v47  ;;  %v4722_v35 = vsub.f32 %v712_v61, %v4461_v26  ;;  %v2345_v46 = vand.u32 2147483648, %v826_v6 }
 0x14b   : > { %v4725_v24 = vadd.f32 %v952_v0, %v4284_v49  ;;  %v2339_v32 = vsel %vm4708_vm9, %v2338_v51, %v825_v11  ;;  %v2350_v2 = vcvt.f32.s32 %v827_v52  ;;  %v2348_v7 = vand.u32 2147483647, %v827_v52 }
 0x14c   : > { %v921_v58 = vsub.f32 %v4662_v62, %v889_v23  ;;  %v890_v29 = vmul.f32 %v2339_v32, %v6418_v10  ;;  %v2344_v39 = vand.u32 2147483647, %v2343_v33  ;;  %vm4731_vm10 = vcmp.lt.f32.partialorder %v2340_v42, 8388608.0 }
 0x14d   : > { %v2351_v61 = vcvt.s32.f32 %v2350_v2  ;;  %v2353_v49 = vand.u32 2147483648, %v827_v52  ;;  %v828_v25 = vmul.f32 %v6411_v4, %v4713_v20  ;;  %v829_v62 = vmul.f32 %v6411_v4, %v4722_v35 }
 0x14e   : > { %v953_v11 = vmul.f32 %v921_v58, %v921_v58  ;;  %v922_v13 = vsub.f32 %v4666_v1, %v890_v29  ;;  %v2346_v53 = vor.u32 %v2345_v46, %v2344_v39  ;;  %v4741_v22 = vsub.f32 %v716_v37, %v4461_v26 }
 0x14f   : > { %v2352_v47 = vand.u32 2147483647, %v2351_v61  ;;  %v2358_v0 = vcvt.f32.s32 %v828_v25  ;;  %v4744_v51 = vsub.f32 %v720_v45, %v4461_v26  ;;  %v2356_v1 = vand.u32 2147483647, %v828_v25  ;;  %v724_v45 = vpop.permute.xlu0 %723 }
 0x150   : > { %v4747_v42 = vadd.f32 %v953_v11, %v4277_v21  ;;  %v954_v23 = vmul.f32 %v922_v13, %v922_v13  ;;  %v2347_v33 = vsel %vm4731_vm10, %v2346_v53, %v826_v6  ;;  %vm2349_vm11 = vcmp.lt.f32.partialorder %v2348_v7, 8388608.0 }
 0x151   : > { %v891_v32 = vmul.f32 %v2347_v33, %v6418_v10  ;;  %v2354_v46 = vor.u32 %v2353_v49, %v2352_v47  ;;  %v2359_v2 = vcvt.s32.f32 %v2358_v0  ;;  %v2361_v29 = vand.u32 2147483648, %v828_v25 }
 0x152   : > { %v4753_v58 = vadd.f32 %v954_v23, %v4296_v41  ;;  %v2364_v39 = vand.u32 2147483647, %v829_v62  ;;  %v2366_v37 = vcvt.f32.s32 %v829_v62  ;;  %v830_v6 = vmul.f32 %v6411_v4, %v4741_v22 }
 0x153   : > { %v923_v21 = vsub.f32 %v4686_v31, %v891_v32  ;;  %v2355_v61 = vsel %vm2349_vm11, %v2354_v46, %v827_v52  ;;  %v2360_v11 = vand.u32 2147483647, %v2359_v2  ;;  %vm4759_vm12 = vcmp.lt.f32.partialorder %v2356_v1, 8388608.0  ;;  %v728_v1 = vpop.permute.xlu1 %727 }
 0x154   : > { %v892_v55 = vmul.f32 %v2355_v61, %v6418_v10  ;;  %v2367_v49 = vcvt.s32.f32 %v2366_v37  ;;  %v831_v41 = vmul.f32 %v6411_v4, %v4744_v51  ;;  %v2374_v47 = vcvt.f32.s32 %v830_v6 }
 0x155   : > { %v955_v13 = vmul.f32 %v923_v21, %v923_v21  ;;  %v2362_v53 = vor.u32 %v2361_v29, %v2360_v11  ;;  %v4766_v31 = vsub.f32 %v724_v45, %v4461_v26  ;;  %vm4769_vm13 = vcmp.lt.f32.partialorder %v2364_v39, 8388608.0 }
 0x156   : > { %v924_v52 = vsub.f32 %v4691_v60, %v892_v55  ;;  %v2368_v23 = vand.u32 2147483647, %v2367_v49  ;;  %v2369_v33 = vand.u32 2147483648, %v829_v62  ;;  %v2372_v2 = vand.u32 2147483647, %v830_v6 }
 0x157   : > { %v4774_v32 = vadd.f32 %v955_v13, %v4294_v56  ;;  %v2363_v46 = vsel %vm4759_vm12, %v2362_v53, %v828_v25  ;;  %v2375_v29 = vcvt.s32.f32 %v2374_v47  ;;  %v2380_v60 = vand.u32 2147483647, %v831_v41  ;;  %v736_v0 = vpop.permute.xlu1 %735 }
 0x158   : > { %v956_v37 = vmul.f32 %v924_v52, %v924_v52  ;;  %v893_v45 = vmul.f32 %v2363_v46, %v6418_v10  ;;  %v2370_v21 = vor.u32 %v2369_v33, %v2368_v23  ;;  %v2377_v61 = vand.u32 2147483648, %v830_v6  ;;  %v732_v52 = vpop.permute.xlu0 %731 }
 0x159   : > { %6439 = vst [vmem:[#allocation14_spill] sm:$0xff] %v4774_v32  ;;  %v2376_v39 = vand.u32 2147483647, %v2375_v29  ;;  %v2382_v11 = vcvt.f32.s32 %v831_v41  ;;  %v832_v55 = vmul.f32 %v6411_v4, %v4766_v31  ;;  %v4788_v7 = vsub.f32 %v728_v1, %v4461_v26 }
 0x15a   : > { %v4782_v49 = vadd.f32 %v956_v37, %v4324_v8  ;;  %v925_v56 = vsub.f32 %v4713_v20, %v893_v45  ;;  %v2371_v25 = vsel %vm4769_vm13, %v2370_v21, %v829_v62  ;;  %vm2373_vm14 = vcmp.lt.f32.partialorder %v2372_v2, 8388608.0 }
 0x15b   : > { %v894_v13 = vmul.f32 %v2371_v25, %v6418_v10  ;;  %v2378_v53 = vor.u32 %v2377_v61, %v2376_v39  ;;  %v2383_v47 = vcvt.s32.f32 %v2382_v11  ;;  %vm4791_vm15 = vcmp.lt.f32.partialorder %v2380_v60, 8388608.0 }
 0x15c   : > { %v957_v23 = vmul.f32 %v925_v56, %v925_v56  ;;  %v2390_v8 = vcvt.f32.s32 %v832_v55  ;;  %v833_v20 = vmul.f32 %v6411_v4, %v4788_v7  ;;  %v2385_v29 = vand.u32 2147483648, %v831_v41 }
 0x15d   : > { %v926_v62 = vsub.f32 %v4722_v35, %v894_v13  ;;  %v2379_v1 = vsel %vm2373_vm14, %v2378_v53, %v830_v6  ;;  %v2384_v46 = vand.u32 2147483647, %v2383_v47  ;;  %v2388_v45 = vand.u32 2147483647, %v832_v55  ;;  %v740_v47 = vpop.permute.xlu0 %739 }
 0x15e   : > { %v4799_v2 = vadd.f32 %v957_v23, %v4305_v48  ;;  %v895_v37 = vmul.f32 %v2379_v1, %v6418_v10  ;;  %v2391_v21 = vcvt.s32.f32 %v2390_v8  ;;  %v2393_v61 = vand.u32 2147483648, %v832_v55 }
 0x15f   : > { %v958_v60 = vmul.f32 %v926_v62, %v926_v62  ;;  %v2386_v39 = vor.u32 %v2385_v29, %v2384_v46  ;;  %v2398_v11 = vcvt.f32.s32 %v833_v20  ;;  %v2396_v32 = vand.u32 2147483647, %v833_v20 }
 0x160   : > { %v927_v56 = vsub.f32 %v4741_v22, %v895_v37  ;;  %v2392_v25 = vand.u32 2147483647, %v2391_v21  ;;  %v4804_v35 = vsub.f32 %v732_v52, %v4461_v26  ;;  %v4812_v53 = vsub.f32 %v736_v0, %v4461_v26 }
 0x161   : > { %v4807_v6 = vadd.f32 %v958_v60, %v4355_v63  ;;  %v2387_v48 = vsel %vm4791_vm15, %v2386_v39, %v831_v41  ;;  %v2399_v13 = vcvt.s32.f32 %v2398_v11  ;;  %v6442_v23 = vand.u32 2147483647, %v4473_v27  ;;  %v744_v41 = vpop.permute.xlu1 %743 }
 0x162   : > { %v959_v8 = vmul.f32 %v927_v56, %v927_v56  ;;  %v896_v52 = vmul.f32 %v2387_v48, %v6418_v10  ;;  %v2394_v62 = vor.u32 %v2393_v61, %v2392_v25  ;;  %v4823_v63 = vmul.f32 %v6411_v4, %v4804_v35  ;;  %v6445_v25 = vld [vmem:[#allocation11_spill] sm:$0xff] }
 0x163   : > { %vm4816_vm0 = vcmp.lt.f32.partialorder %v6442_v23, 8388608.0  ;;  %vm2389_vm1 = vcmp.lt.f32.partialorder %v2388_v45, 8388608.0  ;;  %v2400_v33 = vand.u32 2147483647, %v2399_v13  ;;  %v2401_v0 = vand.u32 2147483648, %v833_v20 }
 0x164   : > { %v835_v1 = vmul.f32 %v6411_v4, %v4812_v53  ;;  %v4828_v46 = vadd.f32 %v959_v8, %v4342_v15  ;;  %v928_v29 = vsub.f32 %v4744_v51, %v896_v52  ;;  %v2395_v37 = vsel %vm2389_vm1, %v2394_v62, %v832_v55 }
 0x165   : > { %v4832_v21 = vsub.f32 %v740_v47, %v4461_v26  ;;  %v897_v60 = vmul.f32 %v2395_v37, %v6418_v10  ;;  %v2402_v39 = vor.u32 %v2401_v0, %v2400_v33  ;;  %v2406_v61 = vcvt.f32.s32 %v4823_v63  ;;  %v748_v0 = vpop.permute.xlu0 %747 }
 0x166   : > { %v4837_v45 = vsub.f32 %v744_v41, %v4461_v26  ;;  %v2225_v11 = vand.u32 2147483648, %v4531_v14  ;;  %v960_v56 = vmul.f32 %v928_v29, %v928_v29  ;;  %vm2397_vm2 = vcmp.lt.f32.partialorder %v2396_v32, 8388608.0 }
 0x167   : > { %v2414_v15 = vcvt.f32.s32 %v835_v1  ;;  %v4842_v51 = vsub.f32 %v6445_v25, %v4554_v12  ;;  %v6447_v55 = vand.u32 2147483647, %v4533_v9  ;;  %v6448_v48 = vand.u32 2147483648, %v4473_v27 }
 0x168   : > { %v929_v47 = vsub.f32 %v4766_v31, %v897_v60  ;;  %v2403_v23 = vsel %vm2397_vm2, %v2402_v39, %v833_v20  ;;  %v4852_v8 = vadd.f32 %v960_v56, %v4463_v18  ;;  %v2407_v32 = vcvt.s32.f32 %v2406_v61  ;;  %v752_v60 = vpop.permute.xlu1 %751 }
 0x169   : > { %6446 = vst [vmem:[#allocation11_spill] sm:$0xff] %v4842_v51  ;;  %v4848_v13 = vor.u32 %v6448_v48, %v6447_v55  ;;  %v898_v52 = vmul.f32 %v2403_v23, %v6418_v10  ;;  %v2415_v62 = vcvt.s32.f32 %v2414_v15  ;;  %v2412_v33 = vand.u32 2147483647, %v835_v1 }
 0x16a   : > { %v961_v41 = vmul.f32 %v929_v47, %v929_v47  ;;  %v4857_v12 = vmul.f32 %v6411_v4, %v4832_v21  ;;  %v837_v9 = vmul.f32 %v6411_v4, %v4837_v45  ;;  %v6449_v31 = vcvt.f32.s32 %v4531_v14 }
 0x16b   : > { %v930_v18 = vsub.f32 %v4788_v7, %v898_v52  ;;  %v2416_v29 = vand.u32 2147483647, %v2415_v62  ;;  %v2417_v37 = vand.u32 2147483648, %v835_v1  ;;  %v2232_v61 = vand.u32 2147483647, %v4559_v54 }
 0x16c   : > { %v2223_v20 = vcvt.s32.f32 %v6449_v31  ;;  %v4870_v56 = vadd.f32 %v961_v41, %v4452_v17  ;;  %v2422_v15 = vcvt.f32.s32 %v4857_v12  ;;  %v2408_v55 = vand.u32 2147483647, %v2407_v32 }
 0x16d   : > { %v962_v25 = vmul.f32 %v930_v18, %v930_v18  ;;  %v2418_v48 = vor.u32 %v2417_v37, %v2416_v29  ;;  %v4874_v7 = vsub.f32 %v748_v0, %v4461_v26  ;;  %vm2413_vm3 = vcmp.lt.f32.partialorder %v2412_v33, 8388608.0 }
 0x16e   : > { %6450 = vst [vmem:[#allocation21_spill] sm:$0xff] %v4870_v56  ;;  %v2423_v47 = vcvt.s32.f32 %v2422_v15  ;;  %v2430_v23 = vcvt.f32.s32 %v837_v9  ;;  %v4877_v52 = vsub.f32 %v752_v60, %v4461_v26  ;;  %v2224_v62 = vand.u32 2147483647, %v2223_v20  ;;  %v756_v20 = vpop.permute.xlu0 %755 }
 0x16f   : > { %v4880_v54 = vadd.f32 %v962_v25, %v4499_v50  ;;  %v2409_v17 = vand.u32 2147483648, %v4823_v63  ;;  %v2419_v41 = vsel %vm2413_vm3, %v2418_v48, %v835_v1  ;;  %v2404_v31 = vand.u32 2147483647, %v4823_v63 }
 0x170   : > { %v900_v32 = vmul.f32 %v2419_v41, %v6418_v10  ;;  %v2424_v18 = vand.u32 2147483647, %v2423_v47  ;;  %v2431_v0 = vcvt.s32.f32 %v2430_v23  ;;  %v2425_v33 = vand.u32 2147483648, %v4857_v12  ;;  %v760_v47 = vpop.permute.xlu1 %759 }
 0x171   : > { %6451 = vst [vmem:[#allocation22_spill] sm:$0xff] %v4880_v54  ;;  %v2410_v29 = vor.u32 %v2409_v17, %v2408_v55  ;;  %v2428_v37 = vand.u32 2147483647, %v837_v9  ;;  %v4888_v60 = vmul.f32 %v6411_v4, %v4874_v7  ;;  %v6452_v50 = vand.u32 2147483647, %v4531_v14 }
 0x172   : > { %v932_v1 = vsub.f32 %v4812_v53, %v900_v32  ;;  %v2432_v25 = vand.u32 2147483647, %v2431_v0  ;;  %v2433_v48 = vand.u32 2147483648, %v837_v9  ;;  %v4899_v55 = vmul.f32 %v6411_v4, %v4877_v52 }
 0x173   : > { %vm4892_vm4 = vcmp.lt.f32.partialorder %v6452_v50, 8388608.0  ;;  %v6455_v23 = vand.u32 2147483648, %v4506_v43  ;;  %v2226_v41 = vor.u32 %v2225_v11, %v2224_v62  ;;  %v2420_v39 = vand.u32 2147483647, %v4857_v12 }
 0x174   : > { %v2438_v50 = vcvt.f32.s32 %v4888_v60  ;;  %v964_v51 = vmul.f32 %v932_v1, %v932_v1  ;;  %v2426_v56 = vor.u32 %v2425_v33, %v2424_v18  ;;  %v2434_v54 = vor.u32 %v2433_v48, %v2432_v25  ;;  %v764_v25 = vpop.permute.xlu0 %763 }
 0x175   : > { %v4903_v17 = vor.u32 %v6455_v23, %v2232_v61  ;;  %v4908_v53 = vsub.f32 %v756_v20, %v4461_v26  ;;  %vm4910_vm5 = vcmp.lt.f32.partialorder %v2404_v31, 8388608.0  ;;  %vm2429_vm6 = vcmp.lt.f32.partialorder %v2428_v37, 8388608.0 }
 0x176   : > { %v2439_v0 = vcvt.s32.f32 %v2438_v50  ;;  %v4915_v61 = vsub.f32 %v760_v47, %v4461_v26  ;;  %v2411_v11 = vsel %vm4910_vm5, %v2410_v29, %v4823_v63  ;;  %v4921_v62 = vadd.f32 %v964_v51, %v4508_v28  ;;  %v768_v50 = vpop.permute.xlu1 %767 }
 0x177   : > { %v2435_v18 = vsel %vm2429_vm6, %v2434_v54, %v837_v9  ;;  %v2446_v33 = vcvt.f32.s32 %v4899_v55  ;;  %vm4924_vm7 = vcmp.lt.f32.partialorder %v2420_v39, 8388608.0  ;;  %v2441_v1 = vand.u32 2147483648, %v4888_v60 }
 0x178   : > { %v902_v37 = vmul.f32 %v2435_v18, %v6418_v10  ;;  %v2440_v20 = vand.u32 2147483647, %v2439_v0  ;;  %v6460_v48 = vand.u32 2147483647, %v4506_v43  ;;  %v2427_v28 = vsel %vm4924_vm7, %v2426_v56, %v4857_v12 }
 0x179   : > { %v2436_v51 = vand.u32 2147483647, %v4888_v60  ;;  %v2447_v9 = vcvt.s32.f32 %v2446_v33  ;;  %v840_v39 = vmul.f32 %v6411_v4, %v4908_v53  ;;  %v2444_v47 = vand.u32 2147483647, %v4899_v55 }
 0x17a   : > { %vm4932_vm8 = vcmp.lt.f32.partialorder %v6460_v48, 8388608.0  ;;  %v934_v54 = vsub.f32 %v4837_v45, %v902_v37  ;;  %v2442_v29 = vor.u32 %v2441_v1, %v2440_v20  ;;  %v4946_v23 = vmul.f32 %v6411_v4, %v4915_v61 }
 0x17b   : > { %v2448_v32 = vand.u32 2147483647, %v2447_v9  ;;  %v2449_v0 = vand.u32 2147483648, %v4899_v55  ;;  %v2454_v12 = vcvt.f32.s32 %v840_v39  ;;  %v4950_v56 = vsub.f32 %v764_v25, %v4461_v26 }
 0x17c   : > { %v2227_v18 = vsel %vm4892_vm4, %v2226_v41, %v4531_v14  ;;  %v899_v45 = vmul.f32 %v2411_v11, %v6418_v10  ;;  %v901_v33 = vmul.f32 %v2427_v28, %v6418_v10  ;;  %v966_v31 = vmul.f32 %v934_v54, %v934_v54 }
 0x17d   : > { %6463 = vst [vmem:[#allocation23_spill] sm:$0xff] %v4950_v56  ;;  %vm4957_vm9 = vcmp.lt.f32.partialorder %v2436_v51, 8388608.0  ;;  %v2450_v20 = vor.u32 %v2449_v0, %v2448_v32  ;;  %v2455_v1 = vcvt.s32.f32 %v2454_v12  ;;  %v4962_v48 = vsub.f32 %v768_v50, %v4461_v26 }
 0x17e   : > { %v4965_v25 = vadd.f32 %v966_v31, %v4522_v36  ;;  %v2443_v14 = vsel %vm4957_vm9, %v2442_v29, %v4888_v60  ;;  %v2452_v15 = vand.u32 2147483647, %v840_v39  ;;  %v2462_v41 = vcvt.f32.s32 %v4946_v23 }
 0x17f   : > { %vm4971_vm10 = vcmp.lt.f32.partialorder %v2444_v47, 8388608.0  ;;  %v2456_v28 = vand.u32 2147483647, %v2455_v1  ;;  %v2457_v51 = vand.u32 2147483648, %v840_v39  ;;  %v4977_v9 = vmul.f32 %v6411_v4, %v4950_v56 }
 0x180   : > { %v6468_v36 = vsel %vm4816_vm0, %v4848_v13, %v4473_v27  ;;  %v547_v54 = vmul.f32 %v2227_v18, %v3909_v44  ;;  %v2451_v29 = vsel %vm4971_vm10, %v2450_v20, %v4899_v55  ;;  %v2463_v47 = vcvt.s32.f32 %v2462_v41  ;;  %v6469_v20 = vld [vmem:[#allocation12_spill] sm:$0xff] }
 0x181   : > { %v545_v60 = vmul.f32 %v6468_v36, %v3909_v44  ;;  %v903_v50 = vmul.f32 %v2443_v14, %v6418_v10  ;;  %v2458_v32 = vor.u32 %v2457_v51, %v2456_v28  ;;  %v2470_v0 = vcvt.f32.s32 %v4977_v9 }
 0x182   : > { %v843_v12 = vmul.f32 %v6411_v4, %v4962_v48  ;;  %v2235_v27 = vsel %vm4932_vm8, %v4903_v17, %v4506_v43  ;;  %v931_v22 = vsub.f32 %v4804_v35, %v899_v45  ;;  %vm2453_vm11 = vcmp.lt.f32.partialorder %v2452_v15, 8388608.0  ;;  %v772_v35 = vpop.permute.xlu0 %771  ;;  %v6471_v45 = vld [vmem:[#allocation17_spill] sm:$0xff] }
 0x183   : > { %v2464_v13 = vand.u32 2147483647, %v2463_v47  ;;  %v933_v55 = vsub.f32 %v4832_v21, %v901_v33  ;;  %v904_v18 = vmul.f32 %v2451_v29, %v6418_v10  ;;  %v2459_v31 = vsel %vm2453_vm11, %v2458_v32, %v840_v39 }
 0x184   : > { %v2471_v37 = vcvt.s32.f32 %v2470_v0  ;;  %v577_v1 = vsub.f32 %v6469_v20, %v545_v60  ;;  %v905_v14 = vmul.f32 %v2459_v31, %v6418_v10  ;;  %v2460_v63 = vand.u32 2147483647, %v4946_v23 }
 0x185   : > { %v2465_v43 = vand.u32 2147483648, %v4946_v23  ;;  %v5007_v17 = vmul.f32 %v2235_v27, %v3909_v44  ;;  %v579_v15 = vsub.f32 %v6471_v45, %v547_v54  ;;  %v935_v21 = vsub.f32 %v4874_v7, %v903_v50  ;;  %v5017_v44 = vld [vmem:[%s3839_s14 + $0x2] ss:$0 sm:$0xff]  ;;  %v1009_v50 = vpop.permute.xlu1 %1008  ;;  %v6477_v45 = vld [vmem:[#allocation16_spill] sm:$0xff] }
 0x186   : > { %v2478_v33 = vcvt.f32.s32 %v843_v12  ;;  %v963_v39 = vmul.f32 %v931_v22, %v931_v22  ;;  %v937_v41 = vsub.f32 %v4908_v53, %v905_v14  ;;  %v2472_v28 = vand.u32 2147483647, %v2471_v37  ;;  %v1013_v31 = vpop.permute.xlu0 %1012 }
 0x187   : > { %6470 = vst [vmem:[#allocation12_spill] sm:$0xff] %v5007_v17  ;;  %v2466_v11 = vor.u32 %v2465_v43, %v2464_v13  ;;  %v965_v51 = vmul.f32 %v933_v55, %v933_v55  ;;  %v936_v36 = vsub.f32 %v4877_v52, %v904_v18  ;;  %v5014_v29 = vsub.f32 %v772_v35, %v4461_v26  ;;  %v6475_v26 = vld [vmem:[#allocation13_spill] sm:$0xff] }
 0x188   : > { %v2479_v60 = vcvt.s32.f32 %v2478_v33  ;;  %v969_v47 = vmul.f32 %v937_v41, %v937_v41  ;;  %vm5019_vm12 = vcmp.lt.f32.partialorder %v2460_v63, 8388608.0  ;;  %v2473_v7 = vand.u32 2147483648, %v4977_v9 }
 0x189   : > { %6472 = vst [vmem:[#allocation17_spill] sm:$0xff] %v5014_v29  ;;  %v2476_v53 = vand.u32 2147483647, %v843_v12  ;;  %v967_v32 = vmul.f32 %v935_v21, %v935_v21  ;;  %v2468_v52 = vand.u32 2147483647, %v4977_v9  ;;  %v2481_v27 = vand.u32 2147483648, %v843_v12 }
 0x18a   : > { %v2480_v0 = vand.u32 2147483647, %v2479_v60  ;;  %v5028_v22 = vadd.f32 %v969_v47, %v6475_v26  ;;  %v2467_v13 = vsel %vm5019_vm12, %v2466_v11, %v4946_v23  ;;  %v2474_v55 = vor.u32 %v2473_v7, %v2472_v28  ;;  %v1017_v7 = vpop.permute.xlu1 %1016 }
 0x18b   : > { %v5034_v18 = vstv %s4998_s27  ;;  %v968_v37 = vmul.f32 %v936_v36, %v936_v36  ;;  %v5038_v14 = vmul.f32 %v6411_v4, %v5014_v29  ;;  %v1139_v63 = vsub.f32 %v1009_v50, %v5017_v44  ;;  %v6480_v4 = vld [vmem:[#allocation18_spill] sm:$0xff]  ;;  %v6481_v36 = vld [vmem:[#allocation19_spill] sm:$0xff] }
 0x18c   : > { %6476 = vst [vmem:[#allocation13_spill] sm:$0xff] %v5028_v22  ;;  %v2482_v20 = vor.u32 %v2481_v27, %v2480_v0  ;;  %v5041_v43 = vmul.f32 %v577_v1, %v577_v1  ;;  %v611_v35 = vmul.f32 %v579_v15, %v579_v15  ;;  %v5044_v21 = vadd.f32 %v963_v39, %v6477_v45  ;;  %v1025_v0 = vpop.permute.xlu0 %1024 }
 0x18d   : > { %vm2477_vm13 = vcmp.lt.f32.partialorder %v2476_v53, 8388608.0  ;;  %v906_v23 = vmul.f32 %v2467_v13, %v6418_v10  ;;  %vm5047_vm14 = vcmp.lt.f32.partialorder %v2468_v52, 8388608.0  ;;  %v1174_v11 = vmul.f32 %v5034_v18, %v1139_v63 }
 0x18e   : > { %v2483_v41 = vsel %vm2477_vm13, %v2482_v20, %v843_v12  ;;  %v5053_v28 = vadd.f32 %v965_v51, %v6480_v4  ;;  %v2475_v1 = vsel %vm5047_vm14, %v2474_v55, %v4977_v9  ;;  %v5060_v39 = vsub.f32 %v1013_v31, %v5017_v44  ;;  %v6482_v12 = vld [vmem:[#allocation20_spill] sm:$0xff] }
 0x18f   : > { %v908_v15 = vmul.f32 %v2483_v41, %v6418_v10  ;;  %v5063_v60 = vadd.f32 %v967_v32, %v6481_v36  ;;  %v5066_v47 = vadd.f32 %v968_v37, %v6482_v12  ;;  %v2486_v51 = vcvt.f32.s32 %v5038_v14 }
 0x190   : > { %v2494_v54 = vcvt.f32.s32 %v1174_v11  ;;  %v1367_v52 = vlaneseq  ;;  %v938_v27 = vsub.f32 %v4915_v61, %v906_v23  ;;  %v5074_v32 = vmul.f32 %v2475_v1, %v6418_v10 }
 0x191   : > { %v940_v53 = vsub.f32 %v4962_v48, %v908_v15  ;;  %v5077_v26 = vstv %s5024_s28  ;;  %v2492_v31 = vand.u32 2147483647, %v1174_v11  ;;  %v1175_v48 = vmul.f32 %v5034_v18, %v5060_v39 }
 0x192   : > { %v2495_v13 = vcvt.s32.f32 %v2494_v54  ;;  %v5083_v37 = vsub.f32 %v1017_v7, %v5017_v44  ;;  %v5085_v20 = vcvt.s32.f32 %v2486_v51  ;;  %v2497_v61 = vand.u32 2147483648, %v1174_v11 }
 0x193   : > { %v972_v55 = vmul.f32 %v940_v53, %v940_v53  ;;  %v5088_v23 = vsub.f32 %v1025_v0, %v5017_v44  ;;  %v5092_v41 = vshrl.u32 %v1367_v52, 7  ;;  %v1498_v4 = vand.u32 127, %v1367_v52 }
 0x194   : > { %v2496_v45 = vand.u32 2147483647, %v2495_v13  ;;  %v2502_v1 = vcvt.f32.s32 %v1175_v48  ;;  %v1499_v15 = vstv %s1975_s29  ;;  %v2500_v12 = vand.u32 2147483647, %v1175_v48 }
 0x195   : > { %v5090_v33 = vadd.f32 %v972_v55, %v611_v35  ;;  %v1176_v54 = vmul.f32 %v5034_v18, %v5083_v37  ;;  %vm2493_vm15 = vcmp.lt.f32.partialorder %v2492_v31, 8388608.0  ;;  %v2505_v7 = vand.u32 2147483648, %v1175_v48  ;;  %v1021_v31 = vpop.permute.xlu1 %1020 }
 0x196   : > { %v2498_v36 = vor.u32 %v2497_v61, %v2496_v45  ;;  %v2503_v51 = vcvt.s32.f32 %v2502_v1  ;;  %v1178_v53 = vmul.f32 %v5034_v18, %v5088_v23  ;;  %v5100_v0 = vmul.f32 %v938_v27, %v938_v27 }
 0x197   : > { %6483 = vst [vmem:[#allocation16_spill] sm:$0xff] %v5090_v33  ;;  %v2510_v52 = vcvt.f32.s32 %v1176_v54  ;;  %v5103_v55 = vadd.s32 %v1499_v15, %v1498_v4  ;;  %v5107_v61 = vadd.s32 8, %v5092_v41  ;;  %vm5109_vm0 = vcmp.lt.f32.partialorder %v2500_v12, 8388608.0  ;;  %v1033_v33 = vpop.permute.xlu0 %1032 }
 0x198   : > { %v2499_v13 = vsel %vm2493_vm15, %v2498_v36, %v1174_v11  ;;  %v2504_v9 = vand.u32 2147483647, %v2503_v51  ;;  %v2508_v50 = vand.u32 2147483647, %v1176_v54  ;;  %v2526_v17 = vcvt.f32.s32 %v1178_v53 }
 0x199   : > { %v1239_v45 = vmul.f32 %v2499_v13, %v5077_v26  ;;  %6484 = vst [vmem:[#allocation18_spill] sm:$0xff] %v5107_v61  ;;  %v2511_v27 = vcvt.s32.f32 %v2510_v52  ;;  %v2513_v36 = vand.u32 2147483648, %v1176_v54  ;;  %v2524_v4 = vand.u32 2147483647, %v1178_v53 }
 0x19a   : > { %v2506_v11 = vor.u32 %v2505_v7, %v2504_v9  ;;  %v2527_v29 = vcvt.s32.f32 %v2526_v17  ;;  %v2529_v13 = vand.u32 2147483648, %v1178_v53  ;;  %v5114_v22 = vsub.f32 %v1021_v31, %v5017_v44 }
 0x19b   : > { %v1271_v35 = vsub.f32 %v1139_v63, %v1239_v45  ;;  %v2512_v15 = vand.u32 2147483647, %v2511_v27  ;;  %vm1501_vm1 = vcmp.eq.s32.totalorder %v5092_v41, %v5103_v55  ;;  %v5121_v52 = vsub.f32 %v1033_v33, %v5017_v44 }
 0x19c   : > { %v2507_v51 = vsel %vm5109_vm0, %v2506_v11, %v1175_v48  ;;  %v2528_v7 = vand.u32 2147483647, %v2527_v29  ;;  %v1177_v17 = vmul.f32 %v5034_v18, %v5114_v22  ;;  %vm2509_vm2 = vcmp.lt.f32.partialorder %v2508_v50, 8388608.0 }
 0x19d   : > { %v1303_v12 = vmul.f32 %v1271_v35, %v1271_v35  ;;  %v1240_v63 = vmul.f32 %v2507_v51, %v5077_v26  ;;  %v2514_v9 = vor.u32 %v2513_v36, %v2512_v15  ;;  %vm5127_vm3 = vcmp.lt.f32.partialorder %v2524_v4, 8388608.0  ;;  %v1029_v51 = vpop.permute.xlu1 %1028 }
 0x19e   : > { %v1180_v48 = vmul.f32 %v5034_v18, %v5121_v52  ;;  %v2530_v1 = vor.u32 %v2529_v13, %v2528_v7  ;;  %v2516_v27 = vand.u32 2147483647, %v1177_v17  ;;  %vm1502_vm4 = vcmp.eq.s32.totalorder %v5107_v61, %v5103_v55 }
 0x19f   : > { %v1335_v45 = vadd.f32 %v1303_v12, %v4611_v19  ;;  %v1272_v33 = vsub.f32 %v5060_v39, %v1240_v63  ;;  %v2515_v35 = vsel %vm2509_vm2, %v2514_v9, %v1176_v54  ;;  %v2518_v19 = vcvt.f32.s32 %v1177_v17 }
 0x1a0   : > { %v1241_v29 = vmul.f32 %v2515_v35, %v5077_v26  ;;  %v5138_v36 = vadd.s32 16, %v5092_v41  ;;  %v1372_v4 = vadd.s32 32, %v5092_v41  ;;  %v2531_v15 = vsel %vm5127_vm3, %v2530_v1, %v1178_v53  ;;  %v1041_v35 = vpop.permute.xlu0 %1040 }
 0x1a1   : > { %v1432_v11 = vand.u32 4294967040, %v1335_v45  ;;  %v1304_v50 = vmul.f32 %v1272_v33, %v1272_v33  ;;  %v1243_v13 = vmul.f32 %v2531_v15, %v5077_v26  ;;  %v2519_v12 = vcvt.s32.f32 %v2518_v19 }
 0x1a2   : > { %6489 = vst [vmem:[#allocation19_spill] sm:$0xff] %v5138_v36  ;;  %v1273_v54 = vsub.f32 %v5083_v37, %v1241_v29  ;;  %vm5147_vm5 = vcmp.lt.f32.partialorder %v2516_v27, 8388608.0  ;;  %v2521_v7 = vand.u32 2147483648, %v1177_v17  ;;  %v2542_v45 = vcvt.f32.s32 %v1180_v48 }
 0x1a3   : > { %v1464_v39 = vor.u32 %v1432_v11, %v5092_v41  ;;  %v1336_v63 = vadd.f32 %v1304_v50, %v4597_v3  ;;  %v1275_v37 = vsub.f32 %v5088_v23, %v1243_v13  ;;  %v2520_v33 = vand.u32 2147483647, %v2519_v12 }
 0x1a4   : > { %v1305_v31 = vmul.f32 %v1273_v54, %v1273_v54  ;;  %v2540_v11 = vand.u32 2147483647, %v1180_v48  ;;  %v2543_v29 = vcvt.s32.f32 %v2542_v45  ;;  %v5158_v3 = vsub.f32 %v1029_v51, %v5017_v44 }
 0x1a5   : > { %v5154_v53 = vsel %vm1501_vm1, 2147483647, %v1464_v39   ;;  %v1433_v1 = vand.u32 4294967040, %v1336_v63  ;;  %v1307_v19 = vmul.f32 %v1275_v37, %v1275_v37  ;;  %v2522_v50 = vor.u32 %v2521_v7, %v2520_v33 }
 0x1a6   : > { %6492 = vst [vmem:[#allocation20_spill] sm:$0xff] %v5154_v53  ;;  %v1337_v27 = vadd.f32 %v1305_v31, %v4623_v57  ;;  %v2545_v15 = vand.u32 2147483648, %v1180_v48  ;;  %v2544_v39 = vand.u32 2147483647, %v2543_v29  ;;  %v1179_v54 = vmul.f32 %v5034_v18, %v5158_v3 }
 0x1a7   : > { %v1465_v56 = vor.u32 %v1433_v1, %v5107_v61  ;;  %v5165_v23 = vsub.f32 %v1041_v35, %v5017_v44  ;;  %vm1503_vm6 = vcmp.eq.s32.totalorder %v5138_v36, %v5103_v55  ;;  %v1339_v12 = vadd.f32 %v1307_v19, %v4645_v38 }
 0x1a8   : > { %v1434_v13 = vand.u32 4294967040, %v1337_v27  ;;  %v2523_v57 = vsel %vm5147_vm5, %v2522_v50, %v1177_v17  ;;  %vm1505_vm7 = vcmp.eq.s32.totalorder %v1372_v4, %v5103_v55  ;;  %v2546_v7 = vor.u32 %v2545_v15, %v2544_v39  ;;  %v1037_v27 = vpop.permute.xlu1 %1036 }
 0x1a9   : > { %v5175_v51 = vsel %vm1502_vm4, 2147483647, %v1465_v56   ;;  %v1242_v63 = vmul.f32 %v2523_v57, %v5077_v26  ;;  %v1436_v31 = vand.u32 4294967040, %v1339_v12  ;;  %vm2541_vm8 = vcmp.lt.f32.partialorder %v2540_v11, 8388608.0  ;;  %v1049_v12 = vpop.permute.xlu0 %1048 }
 0x1aa   : > { %6493 = vst [vmem:[#allocation24_spill] sm:$0xff] %v5175_v51  ;;  %v1466_v45 = vor.u32 %v1434_v13, %v5138_v36  ;;  %v2534_v37 = vcvt.f32.s32 %v1179_v54  ;;  %v2547_v33 = vsel %vm2541_vm8, %v2546_v7, %v1180_v48  ;;  %v2532_v9 = vand.u32 2147483647, %v1179_v54 }
 0x1ab   : > { %v1274_v38 = vsub.f32 %v5114_v22, %v1242_v63  ;;  %v1182_v17 = vmul.f32 %v5034_v18, %v5165_v23  ;;  %v1468_v35 = vor.u32 %v1436_v31, %v1372_v4  ;;  %v1245_v1 = vmul.f32 %v2547_v33, %v5077_v26 }
 0x1ac   : > { %v5186_v56 = vsel %vm1503_vm6, 2147483647, %v1466_v45   ;;  %v2535_v29 = vcvt.s32.f32 %v2534_v37  ;;  %v1371_v11 = vadd.s32 24, %v5092_v41  ;;  %v1374_v22 = vadd.s32 48, %v5092_v41 }
 0x1ad   : > { %v1306_v19 = vmul.f32 %v1274_v38, %v1274_v38  ;;  %v2558_v48 = vcvt.f32.s32 %v1182_v17  ;;  %v5193_v50 = vsel %vm1505_vm7, 2147483647, %v1468_v35   ;;  %v1277_v15 = vsub.f32 %v5121_v52, %v1245_v1 }
 0x1ae   : > { %v2536_v39 = vand.u32 2147483647, %v2535_v29  ;;  %v2537_v13 = vand.u32 2147483648, %v1179_v54  ;;  %vm5197_vm9 = vcmp.lt.f32.partialorder %v2532_v9, 8388608.0  ;;  %v5202_v45 = vsub.f32 %v1037_v27, %v5017_v44 }
 0x1af   : > { %v1338_v57 = vadd.f32 %v1306_v19, %v4637_v5  ;;  %v2559_v7 = vcvt.s32.f32 %v2558_v48  ;;  %v1309_v31 = vmul.f32 %v1277_v15, %v1277_v15  ;;  %v2556_v37 = vand.u32 2147483647, %v1182_v17 }
 0x1b0   : > { %v2538_v4 = vor.u32 %v2537_v13, %v2536_v39  ;;  %v2561_v38 = vand.u32 2147483648, %v1182_v17  ;;  %v1181_v35 = vmul.f32 %v5034_v18, %v5202_v45  ;;  %v5207_v5 = vsub.f32 %v1049_v12, %v5017_v44 }
 0x1b1   : > { %v1435_v52 = vand.u32 4294967040, %v1338_v57  ;;  %v2560_v33 = vand.u32 2147483647, %v2559_v7  ;;  %v5211_v9 = vadd.f32 %v5100_v0, %v5041_v43  ;;  %vm1504_vm10 = vcmp.eq.s32.totalorder %v1371_v11, %v5103_v55  ;;  %v1045_v7 = vpop.permute.xlu1 %1044 }
 0x1b2   : > { %v1341_v1 = vadd.f32 %v1309_v31, %v4670_v30  ;;  %v2539_v29 = vsel %vm5197_vm9, %v2538_v4, %v1179_v54  ;;  %vm1507_vm11 = vcmp.eq.s32.totalorder %v1374_v22, %v5103_v55  ;;  %vm2557_vm12 = vcmp.lt.f32.partialorder %v2556_v37, 8388608.0 }
 0x1b3   : > { %v1467_v27 = vor.u32 %v1435_v52, %v1371_v11  ;;  %v1244_v19 = vmul.f32 %v2539_v29, %v5077_v26  ;;  %v2562_v48 = vor.u32 %v2561_v38, %v2560_v33  ;;  %v2550_v43 = vcvt.f32.s32 %v1181_v35  ;;  %v1057_v52 = vpop.permute.xlu0 %1056 }
 0x1b4   : > { %v1438_v15 = vand.u32 4294967040, %v1341_v1  ;;  %v1184_v0 = vmul.f32 %v5034_v18, %v5207_v5  ;;  %v2548_v11 = vand.u32 2147483647, %v1181_v35  ;;  %v1373_v12 = vadd.s32 40, %v5092_v41 }
 0x1b5   : > { %v5226_v30 = vsel %vm1504_vm10, 2147483647, %v1467_v27   ;;  %v1276_v54 = vsub.f32 %v5158_v3, %v1244_v19  ;;  %v2563_v39 = vsel %vm2557_vm12, %v2562_v48, %v1182_v17  ;;  %v2551_v63 = vcvt.s32.f32 %v2550_v43 }
 0x1b6   : > { %v1470_v13 = vor.u32 %v1438_v15, %v1374_v22  ;;  %v1247_v57 = vmul.f32 %v2563_v39, %v5077_v26  ;;  %v1376_v4 = vadd.s32 64, %v5092_v41  ;;  %v5233_v37 = vadd.s32 56, %v5092_v41 }
 0x1b7   : > { %v1308_v31 = vmul.f32 %v1276_v54, %v1276_v54  ;;  %v2574_v38 = vcvt.f32.s32 %v1184_v0  ;;  %v2552_v33 = vand.u32 2147483647, %v2551_v63  ;;  %v2553_v1 = vand.u32 2147483648, %v1181_v35 }
 0x1b8   : > { %v5237_v3 = vsel %vm1507_vm11, 2147483647, %v1470_v13   ;;  %v1279_v17 = vsub.f32 %v5165_v23, %v1247_v57  ;;  %vm5241_vm13 = vcmp.lt.f32.partialorder %v2548_v11, 8388608.0  ;;  %v5246_v48 = vsub.f32 %v1045_v7, %v5017_v44 }
 0x1b9   : > { %v1340_v29 = vadd.f32 %v1308_v31, %v4658_v59  ;;  %v2575_v19 = vcvt.s32.f32 %v2574_v38  ;;  %v2554_v43 = vor.u32 %v2553_v1, %v2552_v33  ;;  %v2572_v54 = vand.u32 2147483647, %v1184_v0  ;;  %v1053_v1 = vpop.permute.xlu1 %1052 }
 0x1ba   : > { %v1311_v15 = vmul.f32 %v1279_v17, %v1279_v17  ;;  %v5249_v22 = vsub.f32 %v1057_v52, %v5017_v44  ;;  %v2577_v13 = vand.u32 2147483648, %v1184_v0  ;;  %v1183_v59 = vmul.f32 %v5034_v18, %v5246_v48 }
 0x1bb   : > { %v1437_v39 = vand.u32 4294967040, %v1340_v29  ;;  %v2576_v23 = vand.u32 2147483647, %v2575_v19  ;;  %vm1506_vm14 = vcmp.eq.s32.totalorder %v1373_v12, %v5103_v55  ;;  %v2555_v57 = vsel %vm5241_vm13, %v2554_v43, %v1181_v35  ;;  %v1065_v43 = vpop.permute.xlu0 %1064 }
 0x1bc   : > { %v1343_v11 = vadd.f32 %v1311_v15, %v4694_v40  ;;  %v5258_v63 = vadd.s32 80, %v5092_v41  ;;  %v1246_v31 = vmul.f32 %v2555_v57, %v5077_v26  ;;  %v1186_v52 = vmul.f32 %v5034_v18, %v5249_v22 }
 0x1bd   : > { %v1469_v7 = vor.u32 %v1437_v39, %v1373_v12  ;;  %v2578_v38 = vor.u32 %v2577_v13, %v2576_v23  ;;  %vm1509_vm15 = vcmp.eq.s32.totalorder %v1376_v4, %v5103_v55  ;;  %vm2573_vm0 = vcmp.lt.f32.partialorder %v2572_v54, 8388608.0 }
 0x1be   : > { %v1440_v17 = vand.u32 4294967040, %v1343_v11  ;;  %v2566_v33 = vcvt.f32.s32 %v1183_v59  ;;  %vm1508_vm1 = vcmp.eq.s32.totalorder %v5233_v37, %v5103_v55  ;;  %v1278_v35 = vsub.f32 %v5202_v45, %v1246_v31 }
 0x1bf   : > { %v5264_v40 = vsel %vm1506_vm14, 2147483647, %v1469_v7   ;;  %v2579_v12 = vsel %vm2573_vm0, %v2578_v38, %v1184_v0  ;;  %v2564_v19 = vand.u32 2147483647, %v1183_v59  ;;  %vm1511_vm2 = vcmp.eq.s32.totalorder %v5258_v63, %v5103_v55 }
 0x1c0   : > { %v1472_v29 = vor.u32 %v1440_v17, %v1376_v4  ;;  %v1249_v27 = vmul.f32 %v2579_v12, %v5077_v26  ;;  %v2567_v15 = vcvt.s32.f32 %v2566_v33  ;;  %v1310_v39 = vmul.f32 %v1278_v35, %v1278_v35 }
 0x1c1   : > { %v5273_v54 = vadd.s32 72, %v5092_v41  ;;  %v2590_v23 = vcvt.f32.s32 %v1186_v52  ;;  %v5276_v13 = vsub.f32 %v1053_v1, %v5017_v44  ;;  %v2569_v57 = vand.u32 2147483648, %v1183_v59 }
 0x1c2   : > { %v5280_v45 = vsel %vm1509_vm15, 2147483647, %v1472_v29   ;;  %v1281_v0 = vsub.f32 %v5207_v5, %v1249_v27  ;;  %v2568_v11 = vand.u32 2147483647, %v2567_v15  ;;  %v1342_v7 = vadd.f32 %v1310_v39, %v4683_v34 }
 0x1c3   : > { %v2591_v31 = vcvt.s32.f32 %v2590_v23  ;;  %v1185_v38 = vmul.f32 %v5034_v18, %v5276_v13  ;;  %v5287_v17 = vsub.f32 %v1065_v43, %v5017_v44  ;;  %vm2565_vm3 = vcmp.lt.f32.partialorder %v2564_v19, 8388608.0 }
 0x1c4   : > { %v1313_v33 = vmul.f32 %v1281_v0, %v1281_v0  ;;  %v2570_v1 = vor.u32 %v2569_v57, %v2568_v11  ;;  %v2588_v35 = vand.u32 2147483647, %v1186_v52  ;;  %v1439_v4 = vand.u32 4294967040, %v1342_v7  ;;  %v1061_v7 = vpop.permute.xlu1 %1060 }
 0x1c5   : > { %v2592_v12 = vand.u32 2147483647, %v2591_v31  ;;  %v2593_v29 = vand.u32 2147483648, %v1186_v52  ;;  %v2582_v36 = vcvt.f32.s32 %v1185_v38  ;;  %v2580_v15 = vand.u32 2147483647, %v1185_v38 }
 0x1c6   : > { %v1345_v5 = vadd.f32 %v1313_v33, %v4725_v24  ;;  %v2571_v27 = vsel %vm2565_vm3, %v2570_v1, %v1183_v59  ;;  %v1188_v34 = vmul.f32 %v5034_v18, %v5287_v17  ;;  %v1471_v39 = vor.u32 %v1439_v4, %v5233_v37 }
 0x1c7   : > { %v1248_v43 = vmul.f32 %v2571_v27, %v5077_v26  ;;  %v5295_v23 = vadd.s32 96, %v5092_v41  ;;  %v2594_v19 = vor.u32 %v2593_v29, %v2592_v12  ;;  %vm2589_vm4 = vcmp.lt.f32.partialorder %v2588_v35, 8388608.0  ;;  %v1073_v35 = vpop.permute.xlu0 %1072 }
 0x1c8   : > { %v1442_v0 = vand.u32 4294967040, %v1345_v5  ;;  %v2583_v11 = vcvt.s32.f32 %v2582_v36  ;;  %v2606_v57 = vcvt.f32.s32 %v1188_v34  ;;  %v5300_v24 = vsel %vm1508_vm1, 2147483647, %v1471_v39  }
 0x1c9   : > { %v1280_v59 = vsub.f32 %v5246_v48, %v1248_v43  ;;  %v2595_v31 = vsel %vm2589_vm4, %v2594_v19, %v1186_v52  ;;  %v2585_v33 = vand.u32 2147483648, %v1185_v38  ;;  %vm5305_vm5 = vcmp.lt.f32.partialorder %v2580_v15, 8388608.0 }
 0x1ca   : > { %v1474_v1 = vor.u32 %v1442_v0, %v5258_v63  ;;  %v1251_v4 = vmul.f32 %v2595_v31, %v5077_v26  ;;  %v2584_v36 = vand.u32 2147483647, %v2583_v11  ;;  %v2604_v5 = vand.u32 2147483647, %v1188_v34 }
 0x1cb   : > { %v1312_v29 = vmul.f32 %v1280_v59, %v1280_v59  ;;  %v2607_v27 = vcvt.s32.f32 %v2606_v57  ;;  %v5310_v37 = vsub.f32 %v1061_v7, %v5017_v44  ;;  %v2609_v15 = vand.u32 2147483648, %v1188_v34 }
 0x1cc   : > { %v5315_v48 = vsel %vm1511_vm2, 2147483647, %v1474_v1   ;;  %v1283_v52 = vsub.f32 %v5249_v22, %v1251_v4  ;;  %v2586_v39 = vor.u32 %v2585_v33, %v2584_v36  ;;  %v5322_v11 = vsub.f32 %v1073_v35, %v5017_v44 }
 0x1cd   : > { %v1344_v43 = vadd.f32 %v1312_v29, %v4718_v16  ;;  %v2608_v19 = vand.u32 2147483647, %v2607_v27  ;;  %v1187_v0 = vmul.f32 %v5034_v18, %v5310_v37  ;;  %vm1510_vm6 = vcmp.eq.s32.totalorder %v5273_v54, %v5103_v55 }
 0x1ce   : > { %v1315_v57 = vmul.f32 %v1283_v52, %v1283_v52  ;;  %v1379_v63 = vadd.s32 88, %v5092_v41  ;;  %v2587_v22 = vsel %vm5305_vm5, %v2586_v39, %v1185_v38  ;;  %vm2605_vm7 = vcmp.lt.f32.partialorder %v2604_v5, 8388608.0 }
 0x1cf   : > { %v1441_v7 = vand.u32 4294967040, %v1344_v43  ;;  %v1250_v59 = vmul.f32 %v2587_v22, %v5077_v26  ;;  %v2610_v16 = vor.u32 %v2609_v15, %v2608_v19  ;;  %v2596_v33 = vand.u32 2147483647, %v1187_v0  ;;  %v1081_v22 = vpop.permute.xlu0 %1080 }
 0x1d0   : > { %v1347_v31 = vadd.f32 %v1315_v57, %v4753_v58  ;;  %v2598_v1 = vcvt.f32.s32 %v1187_v0  ;;  %v1190_v4 = vmul.f32 %v5034_v18, %v5322_v11  ;;  %vm1513_vm8 = vcmp.eq.s32.totalorder %v5295_v23, %v5103_v55  ;;  %v1069_v58 = vpop.permute.xlu1 %1068 }
 0x1d1   : > { %v1473_v36 = vor.u32 %v1441_v7, %v5273_v54  ;;  %v1282_v12 = vsub.f32 %v5276_v13, %v1250_v59  ;;  %v2611_v38 = vsel %vm2605_vm7, %v2610_v16, %v1188_v34  ;;  %v1382_v29 = vadd.s32 112, %v5092_v41 }
 0x1d2   : > { %v1444_v35 = vand.u32 4294967040, %v1347_v31  ;;  %v1253_v5 = vmul.f32 %v2611_v38, %v5077_v26  ;;  %v2599_v27 = vcvt.s32.f32 %v2598_v1  ;;  %v2601_v15 = vand.u32 2147483648, %v1187_v0 }
 0x1d3   : > { %v5342_v52 = vsel %vm1510_vm6, 2147483647, %v1473_v36   ;;  %v1314_v39 = vmul.f32 %v1282_v12, %v1282_v12  ;;  %v2622_v43 = vcvt.f32.s32 %v1190_v4  ;;  %vm5346_vm9 = vcmp.lt.f32.partialorder %v2596_v33, 8388608.0 }
 0x1d4   : > { %v1476_v19 = vor.u32 %v1444_v35, %v5295_v23  ;;  %v1285_v13 = vsub.f32 %v5287_v17, %v1253_v5  ;;  %v2600_v57 = vand.u32 2147483647, %v2599_v27  ;;  %v2620_v59 = vand.u32 2147483647, %v1190_v4 }
 0x1d5   : > { %v1346_v7 = vadd.f32 %v1314_v39, %v4747_v42  ;;  %v2623_v16 = vcvt.s32.f32 %v2622_v43  ;;  %v5352_v54 = vsub.f32 %v1069_v58, %v5017_v44  ;;  %v2625_v33 = vand.u32 2147483648, %v1190_v4 }
 0x1d6   : > { %v5357_v31 = vsel %vm1513_vm8, 2147483647, %v1476_v19   ;;  %v1317_v1 = vmul.f32 %v1285_v13, %v1285_v13  ;;  %v2602_v17 = vor.u32 %v2601_v15, %v2600_v57  ;;  %v5362_v42 = vsub.f32 %v1081_v22, %v5017_v44 }
 0x1d7   : > { %v1443_v36 = vand.u32 4294967040, %v1346_v7  ;;  %v2624_v12 = vand.u32 2147483647, %v2623_v16  ;;  %v1189_v38 = vmul.f32 %v5034_v18, %v5352_v54  ;;  %v6502_v35 = vand.u32 2147483647, %v5085_v20 }
 0x1d8   : > { %v6503_v5 = vand.u32 2147483648, %v5038_v14  ;;  %vm1512_vm10 = vcmp.eq.s32.totalorder %v1379_v63, %v5103_v55  ;;  %v1349_v23 = vadd.f32 %v1317_v1, %v4782_v49  ;;  %v2603_v58 = vsel %vm5346_vm9, %v2602_v17, %v1187_v0  ;;  %v1077_v1 = vpop.permute.xlu1 %1076 }
 0x1d9   : > { %v1475_v39 = vor.u32 %v1443_v36, %v1379_v63  ;;  %vm1515_vm11 = vcmp.eq.s32.totalorder %v1382_v29, %v5103_v55  ;;  %v1252_v15 = vmul.f32 %v2603_v58, %v5077_v26  ;;  %v2626_v43 = vor.u32 %v2625_v33, %v2624_v12  ;;  %v1089_v12 = vpop.permute.xlu0 %1088 }
 0x1da   : > { %v5368_v27 = vor.u32 %v6503_v5, %v6502_v35  ;;  %v1446_v19 = vand.u32 4294967040, %v1349_v23  ;;  %vm2621_vm12 = vcmp.lt.f32.partialorder %v2620_v59, 8388608.0  ;;  %v2614_v20 = vcvt.f32.s32 %v1189_v38  ;;  %v6504_v23 = vld [vmem:[#allocation14_spill] sm:$0xff] }
 0x1db   : > { %v1192_v13 = vmul.f32 %v5034_v18, %v5362_v42  ;;  %v5378_v57 = vsel %vm1512_vm10, 2147483647, %v1475_v39   ;;  %v1284_v22 = vsub.f32 %v5310_v37, %v1252_v15  ;;  %v2627_v49 = vsel %vm2621_vm12, %v2626_v43, %v1190_v4 }
 0x1dc   : > { %v2612_v7 = vand.u32 2147483647, %v1189_v38  ;;  %v1478_v34 = vor.u32 %v1446_v19, %v1382_v29  ;;  %v1381_v0 = vadd.s32 104, %v5092_v41  ;;  %v1255_v63 = vmul.f32 %v2627_v49, %v5077_v26 }
 0x1dd   : > { %v2615_v16 = vcvt.s32.f32 %v2614_v20  ;;  %v1316_v17 = vmul.f32 %v1284_v22, %v1284_v22  ;;  %v1384_v59 = vadd.s32 128, %v5092_v41  ;;  %v5385_v33 = vadd.s32 120, %v5092_v41 }
 0x1de   : > { %v2638_v36 = vcvt.f32.s32 %v1192_v13  ;;  %v5389_v37 = vsel %vm1515_vm11, 2147483647, %v1478_v34   ;;  %v1287_v4 = vsub.f32 %v5322_v11, %v1255_v63  ;;  %v2617_v5 = vand.u32 2147483648, %v1189_v38 }
 0x1df   : > { %v2616_v35 = vand.u32 2147483647, %v2615_v16  ;;  %v1348_v58 = vadd.f32 %v1316_v17, %v6504_v23  ;;  %vm5393_vm13 = vcmp.lt.f32.partialorder %v2612_v7, 8388608.0  ;;  %v5398_v43 = vsub.f32 %v1077_v1, %v5017_v44  ;;  %v1085_v23 = vpop.permute.xlu1 %1084 }
 0x1e0   : > { %v2639_v15 = vcvt.s32.f32 %v2638_v36  ;;  %v1319_v19 = vmul.f32 %v1287_v4, %v1287_v4  ;;  %v2636_v22 = vand.u32 2147483647, %v1192_v13  ;;  %v5401_v29 = vsub.f32 %v1089_v12, %v5017_v44 }
 0x1e1   : > { %v2618_v20 = vor.u32 %v2617_v5, %v2616_v35  ;;  %v1445_v49 = vand.u32 4294967040, %v1348_v58  ;;  %v2641_v34 = vand.u32 2147483648, %v1192_v13  ;;  %v1191_v63 = vmul.f32 %v5034_v18, %v5398_v43 }
 0x1e2   : > { %v2640_v11 = vand.u32 2147483647, %v2639_v15  ;;  %vm1514_vm14 = vcmp.eq.s32.totalorder %v1381_v0, %v5103_v55  ;;  %v1351_v7 = vadd.f32 %v1319_v19, %v4807_v6  ;;  %v5410_v1 = vadd.s32 144, %v5092_v41 }
 0x1e3   : > { %v2619_v16 = vsel %vm5393_vm13, %v2618_v20, %v1189_v38  ;;  %v1477_v17 = vor.u32 %v1445_v49, %v1381_v0  ;;  %v1194_v4 = vmul.f32 %v5034_v18, %v5401_v29  ;;  %vm1517_vm15 = vcmp.eq.s32.totalorder %v1384_v59, %v5103_v55  ;;  %v1097_v20 = vpop.permute.xlu0 %1096 }
 0x1e4   : > { %v1254_v36 = vmul.f32 %v2619_v16, %v5077_v26  ;;  %v2642_v12 = vor.u32 %v2641_v34, %v2640_v11  ;;  %v1448_v35 = vand.u32 4294967040, %v1351_v7  ;;  %vm2637_vm0 = vcmp.lt.f32.partialorder %v2636_v22, 8388608.0 }
 0x1e5   : > { %v2630_v5 = vcvt.f32.s32 %v1191_v63  ;;  %v5416_v6 = vsel %vm1514_vm14, 2147483647, %v1477_v17   ;;  %vm1516_vm1 = vcmp.eq.s32.totalorder %v5385_v33, %v5103_v55  ;;  %v2628_v15 = vand.u32 2147483647, %v1191_v63 }
 0x1e6   : > { %v1286_v38 = vsub.f32 %v5352_v54, %v1254_v36  ;;  %v2643_v0 = vsel %vm2637_vm0, %v2642_v12, %v1192_v13  ;;  %v1480_v58 = vor.u32 %v1448_v35, %v1384_v59  ;;  %vm1519_vm2 = vcmp.eq.s32.totalorder %v5410_v1, %v5103_v55 }
 0x1e7   : > { %v1257_v39 = vmul.f32 %v2643_v0, %v5077_v26  ;;  %v2631_v19 = vcvt.s32.f32 %v2630_v5  ;;  %v5425_v22 = vadd.s32 136, %v5092_v41  ;;  %v2654_v11 = vcvt.f32.s32 %v1194_v4 }
 0x1e8   : > { %v1318_v49 = vmul.f32 %v1286_v38, %v1286_v38  ;;  %v5428_v34 = vsub.f32 %v1085_v23, %v5017_v44  ;;  %v5432_v54 = vsel %vm1517_vm15, 2147483647, %v1480_v58   ;;  %v2633_v16 = vand.u32 2147483648, %v1191_v63 }
 0x1e9   : > { %v1289_v13 = vsub.f32 %v5362_v42, %v1257_v39  ;;  %v2632_v7 = vand.u32 2147483647, %v2631_v19  ;;  %v2655_v36 = vcvt.s32.f32 %v2654_v11  ;;  %v5439_v35 = vsub.f32 %v1097_v20, %v5017_v44 }
 0x1ea   : > { %v1350_v17 = vadd.f32 %v1318_v49, %v4799_v2  ;;  %v1193_v12 = vmul.f32 %v5034_v18, %v5428_v34  ;;  %vm2629_vm3 = vcmp.lt.f32.partialorder %v2628_v15, 8388608.0  ;;  %v2652_v38 = vand.u32 2147483647, %v1194_v4 }
 0x1eb   : > { %v1321_v5 = vmul.f32 %v1289_v13, %v1289_v13  ;;  %v2634_v23 = vor.u32 %v2633_v16, %v2632_v7  ;;  %v2656_v0 = vand.u32 2147483647, %v2655_v36  ;;  %v2657_v58 = vand.u32 2147483648, %v1194_v4 }
 0x1ec   : > { %v1447_v59 = vand.u32 4294967040, %v1350_v17  ;;  %v2646_v61 = vcvt.f32.s32 %v1193_v12  ;;  %v2644_v19 = vand.u32 2147483647, %v1193_v12  ;;  %v1196_v2 = vmul.f32 %v5034_v18, %v5439_v35  ;;  %v1093_v17 = vpop.permute.xlu1 %1092 }
 0x1ed   : > { %v1353_v42 = vadd.f32 %v1321_v5, %v4852_v8  ;;  %v2635_v39 = vsel %vm2629_vm3, %v2634_v23, %v1191_v63  ;;  %v5447_v11 = vadd.s32 160, %v5092_v41  ;;  %v2658_v15 = vor.u32 %v2657_v58, %v2656_v0 }
 0x1ee   : > { %v1479_v49 = vor.u32 %v1447_v59, %v5385_v33  ;;  %v1256_v20 = vmul.f32 %v2635_v39, %v5077_v26  ;;  %vm2653_vm4 = vcmp.lt.f32.partialorder %v2652_v38, 8388608.0  ;;  %v2647_v7 = vcvt.s32.f32 %v2646_v61  ;;  %v1105_v38 = vpop.permute.xlu0 %1104 }
 0x1ef   : > { %v1450_v13 = vand.u32 4294967040, %v1353_v42  ;;  %v2670_v16 = vcvt.f32.s32 %v1196_v2  ;;  %v2659_v36 = vsel %vm2653_vm4, %v2658_v15, %v1194_v4  ;;  %v2649_v5 = vand.u32 2147483648, %v1193_v12 }
 0x1f0   : > { %v5452_v8 = vsel %vm1516_vm1, 2147483647, %v1479_v49   ;;  %v1288_v63 = vsub.f32 %v5398_v43, %v1256_v20  ;;  %v1259_v59 = vmul.f32 %v2659_v36, %v5077_v26  ;;  %vm5457_vm5 = vcmp.lt.f32.partialorder %v2644_v19, 8388608.0 }
 0x1f1   : > { %v1482_v23 = vor.u32 %v1450_v13, %v5410_v1  ;;  %v2648_v61 = vand.u32 2147483647, %v2647_v7  ;;  %v2668_v42 = vand.u32 2147483647, %v1196_v2  ;;  %v2671_v39 = vcvt.s32.f32 %v2670_v16 }
 0x1f2   : > { %v1320_v58 = vmul.f32 %v1288_v63, %v1288_v63  ;;  %v5462_v33 = vsub.f32 %v1093_v17, %v5017_v44  ;;  %v1291_v4 = vsub.f32 %v5401_v29, %v1259_v59  ;;  %v2673_v19 = vand.u32 2147483648, %v1196_v2 }
 0x1f3   : > { %v5467_v43 = vsel %vm1519_vm2, 2147483647, %v1482_v23   ;;  %v2650_v49 = vor.u32 %v2649_v5, %v2648_v61  ;;  %v2672_v15 = vand.u32 2147483647, %v2671_v39  ;;  %v5474_v7 = vsub.f32 %v1105_v38, %v5017_v44  ;;  %v6512_v23 = vld [vmem:[#allocation22_spill] sm:$0xff] }
 0x1f4   : > { %v1352_v20 = vadd.f32 %v1320_v58, %v4828_v46  ;;  %v1195_v13 = vmul.f32 %v5034_v18, %v5462_v33  ;;  %vm1518_vm6 = vcmp.eq.s32.totalorder %v5425_v22, %v5103_v55  ;;  %v1323_v16 = vmul.f32 %v1291_v4, %v1291_v4 }
 0x1f5   : > { %v1387_v1 = vadd.s32 152, %v5092_v41  ;;  %v2651_v29 = vsel %vm5457_vm5, %v2650_v49, %v1193_v12  ;;  %v6509_v17 = vand.u32 2147483647, %v5038_v14  ;;  %vm2669_vm8 = vcmp.lt.f32.partialorder %v2668_v42, 8388608.0 }
 0x1f6   : > { %v1449_v63 = vand.u32 4294967040, %v1352_v20  ;;  %v1258_v36 = vmul.f32 %v2651_v29, %v5077_v26  ;;  %v2674_v5 = vor.u32 %v2673_v19, %v2672_v15  ;;  %v1355_v59 = vadd.f32 %v1323_v16, %v6512_v23  ;;  %v1101_v20 = vpop.permute.xlu1 %1100  ;;  %v6515_v23 = vld [vmem:[#allocation21_spill] sm:$0xff] }
 0x1f7   : > { %vm5483_vm7 = vcmp.lt.f32.partialorder %v6509_v17, 8388608.0  ;;  %v2660_v61 = vand.u32 2147483647, %v1195_v13  ;;  %v2662_v38 = vcvt.f32.s32 %v1195_v13  ;;  %v1198_v58 = vmul.f32 %v5034_v18, %v5474_v7 }
 0x1f8   : > { %v1481_v12 = vor.u32 %v1449_v63, %v5425_v22  ;;  %vm1521_vm9 = vcmp.eq.s32.totalorder %v5447_v11, %v5103_v55  ;;  %v1290_v0 = vsub.f32 %v5428_v34, %v1258_v36  ;;  %v2675_v39 = vsel %vm2669_vm8, %v2674_v5, %v1196_v2  ;;  %v1113_v5 = vpop.permute.xlu0 %1112 }
 0x1f9   : > { %v1452_v4 = vand.u32 4294967040, %v1355_v59  ;;  %v1390_v49 = vadd.s32 176, %v5092_v41  ;;  %v1261_v42 = vmul.f32 %v2675_v39, %v5077_v26  ;;  %v2663_v19 = vcvt.s32.f32 %v2662_v38 }
 0x1fa   : > { %v5500_v15 = vsel %vm1518_vm6, 2147483647, %v1481_v12   ;;  %v1322_v16 = vmul.f32 %v1290_v0, %v1290_v0  ;;  %v2665_v29 = vand.u32 2147483648, %v1195_v13  ;;  %v2686_v17 = vcvt.f32.s32 %v1198_v58 }
 0x1fb   : > { %v1484_v63 = vor.u32 %v1452_v4, %v5447_v11  ;;  %v1293_v34 = vsub.f32 %v5439_v35, %v1261_v42  ;;  %vm5504_vm10 = vcmp.lt.f32.partialorder %v2660_v61, 8388608.0  ;;  %v2664_v36 = vand.u32 2147483647, %v2663_v19 }
 0x1fc   : > { %v1354_v59 = vadd.f32 %v1322_v16, %v6515_v23  ;;  %v2684_v38 = vand.u32 2147483647, %v1198_v58  ;;  %v2687_v39 = vcvt.s32.f32 %v2686_v17  ;;  %v5510_v22 = vsub.f32 %v1101_v20, %v5017_v44 }
 0x1fd   : > { %v5515_v12 = vsel %vm1521_vm9, 2147483647, %v1484_v63   ;;  %v1325_v0 = vmul.f32 %v1293_v34, %v1293_v34  ;;  %v2666_v35 = vor.u32 %v2665_v29, %v2664_v36  ;;  %v2689_v61 = vand.u32 2147483648, %v1198_v58 }
 0x1fe   : > { %v1451_v4 = vand.u32 4294967040, %v1354_v59  ;;  %v2688_v42 = vand.u32 2147483647, %v2687_v39  ;;  %v1197_v19 = vmul.f32 %v5034_v18, %v5510_v22  ;;  %v5520_v16 = vsub.f32 %v1113_v5, %v5017_v44 }
 0x1ff   : > { %vm1520_vm11 = vcmp.eq.s32.totalorder %v1387_v1, %v5103_v55  ;;  %v1357_v11 = vadd.f32 %v1325_v0, %v4921_v62  ;;  %v2667_v29 = vsel %vm5504_vm10, %v2666_v35, %v1195_v13  ;;  %vm1523_vm12 = vcmp.eq.s32.totalorder %v1390_v49, %v5103_v55  ;;  %v1109_v35 = vpop.permute.xlu1 %1108 }
 0x200   : > { %v1483_v17 = vor.u32 %v1451_v4, %v1387_v1  ;;  %v1260_v63 = vmul.f32 %v2667_v29, %v5077_v26  ;;  %v2690_v34 = vor.u32 %v2689_v61, %v2688_v42  ;;  %vm2685_vm13 = vcmp.lt.f32.partialorder %v2684_v38, 8388608.0 }
 0x201   : > { %v1454_v44 = vand.u32 4294967040, %v1357_v11  ;;  %v2678_v36 = vcvt.f32.s32 %v1197_v19  ;;  %v1200_v5 = vmul.f32 %v5034_v18, %v5520_v16  ;;  %v2676_v39 = vand.u32 2147483647, %v1197_v19  ;;  %v1121_v11 = vpop.permute.xlu0 %1120 }
 0x202   : > { %v5534_v23 = vsel %vm1520_vm11, 2147483647, %v1483_v17   ;;  %v1292_v59 = vsub.f32 %v5462_v33, %v1260_v63  ;;  %v2691_v62 = vsel %vm2685_vm13, %v2690_v34, %v1198_v58  ;;  %v1389_v13 = vadd.s32 168, %v5092_v41 }
 0x203   : > { %v1486_v2 = vor.u32 %v1454_v44, %v1390_v49  ;;  %v1263_v1 = vmul.f32 %v2691_v62, %v5077_v26  ;;  %v2679_v0 = vcvt.s32.f32 %v2678_v36  ;;  %v1392_v38 = vadd.s32 192, %v5092_v41  ;;  %v5554_v36 = vld [vmem:[%s3839_s14 + $0x2] ss:$0 sm:$0xff] }
 0x204   : > { %v1324_v61 = vmul.f32 %v1292_v59, %v1292_v59  ;;  %v5541_v4 = vadd.s32 184, %v5092_v41  ;;  %v2702_v42 = vcvt.f32.s32 %v1200_v5  ;;  %v2681_v17 = vand.u32 2147483648, %v1197_v19 }
 0x205   : > { %v5545_v33 = vsel %vm1523_vm12, 2147483647, %v1486_v2   ;;  %v1295_v58 = vsub.f32 %v5474_v7, %v1263_v1  ;;  %v2680_v29 = vand.u32 2147483647, %v2679_v0  ;;  %vm5549_vm14 = vcmp.lt.f32.partialorder %v2676_v39, 8388608.0 }
 0x206   : > { %v1356_v63 = vadd.f32 %v1324_v61, %v5044_v21  ;;  %v2703_v44 = vcvt.s32.f32 %v2702_v42  ;;  %v5557_v59 = vsub.f32 %v1109_v35, %v5554_v36  ;;  %v2700_v2 = vand.u32 2147483647, %v1200_v5 }
 0x207   : > { %v1327_v62 = vmul.f32 %v1295_v58, %v1295_v58  ;;  %v2682_v49 = vor.u32 %v2681_v17, %v2680_v29  ;;  %v5560_v20 = vsub.f32 %v1121_v11, %v5554_v36  ;;  %v2705_v0 = vand.u32 2147483648, %v1200_v5 }
 0x208   : > { %v1453_v7 = vand.u32 4294967040, %v1356_v63  ;;  %v2704_v1 = vand.u32 2147483647, %v2703_v44  ;;  %v1199_v21 = vmul.f32 %v5034_v18, %v5557_v59  ;;  %vm1522_vm15 = vcmp.eq.s32.totalorder %v1389_v13, %v5103_v55  ;;  %v1117_v44 = vpop.permute.xlu1 %1116 }
 0x209   : > { %v1359_v39 = vadd.f32 %v1327_v62, %v4965_v25  ;;  %v2683_v35 = vsel %vm5549_vm14, %v2682_v49, %v1197_v19  ;;  %v5569_v61 = vadd.s32 208, %v5092_v41  ;;  %v1202_v29 = vmul.f32 %v5034_v18, %v5560_v20 }
 0x20a   : > { %v1485_v42 = vor.u32 %v1453_v7, %v1389_v13  ;;  %v1262_v11 = vmul.f32 %v2683_v35, %v5077_v26  ;;  %v2706_v58 = vor.u32 %v2705_v0, %v2704_v1  ;;  %vm1525_vm0 = vcmp.eq.s32.totalorder %v1392_v38, %v5103_v55  ;;  %v1129_v1 = vpop.permute.xlu0 %1128 }
 0x20b   : > { %v1456_v17 = vand.u32 4294967040, %v1359_v39  ;;  %vm2701_vm1 = vcmp.lt.f32.partialorder %v2700_v2, 8388608.0  ;;  %v2694_v63 = vcvt.f32.s32 %v1199_v21  ;;  %vm1524_vm2 = vcmp.eq.s32.totalorder %v5541_v4, %v5103_v55 }
 0x20c   : > { %v5575_v25 = vsel %vm1522_vm15, 2147483647, %v1485_v42   ;;  %v1294_v19 = vsub.f32 %v5510_v22, %v1262_v11  ;;  %v2707_v13 = vsel %vm2701_vm1, %v2706_v58, %v1200_v5  ;;  %v2692_v49 = vand.u32 2147483647, %v1199_v21 }
 0x20d   : > { %v1488_v34 = vor.u32 %v1456_v17, %v1392_v38  ;;  %v1265_v62 = vmul.f32 %v2707_v13, %v5077_v26  ;;  %v2695_v7 = vcvt.s32.f32 %v2694_v63  ;;  %vm1527_vm3 = vcmp.eq.s32.totalorder %v5569_v61, %v5103_v55  ;;  %v1125_v38 = vpop.permute.xlu1 %1124 }
 0x20e   : > { %v1326_v0 = vmul.f32 %v1294_v19, %v1294_v19  ;;  %v2718_v2 = vcvt.f32.s32 %v1202_v29  ;;  %v5584_v39 = vsub.f32 %v1117_v44, %v5554_v36  ;;  %v2697_v42 = vand.u32 2147483648, %v1199_v21 }
 0x20f   : > { %v5588_v35 = vsel %vm1525_vm0, 2147483647, %v1488_v34   ;;  %v1297_v22 = vsub.f32 %v5520_v16, %v1265_v62  ;;  %v2696_v5 = vand.u32 2147483647, %v2695_v7  ;;  %v5595_v63 = vsub.f32 %v1129_v1, %v5554_v36 }
 0x210   : > { %v1358_v11 = vadd.f32 %v1326_v0, %v5053_v28  ;;  %v2719_v58 = vcvt.s32.f32 %v2718_v2  ;;  %v1201_v17 = vmul.f32 %v5034_v18, %v5584_v39  ;;  %vm2693_vm4 = vcmp.lt.f32.partialorder %v2692_v49, 8388608.0 }
 0x211   : > { %v1329_v19 = vmul.f32 %v1297_v22, %v1297_v22  ;;  %v2698_v44 = vor.u32 %v2697_v42, %v2696_v5  ;;  %v2716_v13 = vand.u32 2147483647, %v1202_v29  ;;  %v2721_v51 = vand.u32 2147483648, %v1202_v29 }
 0x212   : > { %v1455_v34 = vand.u32 4294967040, %v1358_v11  ;;  %v2720_v53 = vand.u32 2147483647, %v2719_v58  ;;  %v2710_v16 = vcvt.f32.s32 %v1201_v17  ;;  %v2708_v28 = vand.u32 2147483647, %v1201_v17 }
 0x213   : > { %v1361_v62 = vadd.f32 %v1329_v19, %v5066_v47  ;;  %v2699_v7 = vsel %vm2693_vm4, %v2698_v44, %v1199_v21  ;;  %v1204_v0 = vmul.f32 %v5034_v18, %v5595_v63  ;;  %v1393_v1 = vadd.s32 200, %v5092_v41 }
 0x214   : > { %v1487_v2 = vor.u32 %v1455_v34, %v5541_v4  ;;  %v1264_v49 = vmul.f32 %v2699_v7, %v5077_v26  ;;  %v2722_v22 = vor.u32 %v2721_v51, %v2720_v53  ;;  %vm2717_vm5 = vcmp.lt.f32.partialorder %v2716_v13, 8388608.0  ;;  %v1133_v51 = vpop.permute.xlu1 %1132 }
 0x215   : > { %v1458_v5 = vand.u32 4294967040, %v1361_v62  ;;  %v2711_v42 = vcvt.s32.f32 %v2710_v16  ;;  %v2734_v11 = vcvt.f32.s32 %v1204_v0  ;;  %v2713_v19 = vand.u32 2147483648, %v1201_v17 }
 0x216   : > { %v5606_v47 = vsel %vm1524_vm2, 2147483647, %v1487_v2   ;;  %v1296_v21 = vsub.f32 %v5557_v59, %v1264_v49  ;;  %v2723_v58 = vsel %vm2717_vm5, %v2722_v22, %v1202_v29  ;;  %vm5611_vm6 = vcmp.lt.f32.partialorder %v2708_v28, 8388608.0 }
 0x217   : > { %v1490_v44 = vor.u32 %v1458_v5, %v5569_v61  ;;  %v1267_v34 = vmul.f32 %v2723_v58, %v5077_v26  ;;  %v2712_v53 = vand.u32 2147483647, %v2711_v42  ;;  %v2732_v16 = vand.u32 2147483647, %v1204_v0 }
 0x218   : > { %v1328_v13 = vmul.f32 %v1296_v21, %v1296_v21  ;;  %v2735_v62 = vcvt.s32.f32 %v2734_v11  ;;  %v5616_v4 = vsub.f32 %v1125_v38, %v5554_v36  ;;  %v2737_v28 = vand.u32 2147483648, %v1204_v0 }
 0x219   : > { %v5621_v59 = vsel %vm1527_vm3, 2147483647, %v1490_v44   ;;  %v1299_v29 = vsub.f32 %v5560_v20, %v1267_v34  ;;  %v2714_v2 = vor.u32 %v2713_v19, %v2712_v53  ;;  %v5628_v42 = vsub.f32 %v1133_v51, %v5554_v36 }
 0x21a   : > { %v1360_v49 = vadd.f32 %v1328_v13, %v5063_v60  ;;  %v2736_v22 = vand.u32 2147483647, %v2735_v62  ;;  %v1203_v5 = vmul.f32 %v5034_v18, %v5616_v4  ;;  %v6520_v61 = vsel %vm5483_vm7, %v5368_v27, %v5038_v14 }
 0x21b   : > { %v909_v38 = vmul.f32 %v6520_v61, %v6418_v10  ;;  %v1396_v20 = vadd.s32 224, %v5092_v41  ;;  %v1331_v11 = vmul.f32 %v1299_v29, %v1299_v29  ;;  %v2715_v60 = vsel %vm5611_vm6, %v2714_v2, %v1201_v17 }
 0x21c   : > { %vm1526_vm8 = vcmp.eq.s32.totalorder %v1393_v1, %v5103_v55  ;;  %v1457_v21 = vand.u32 4294967040, %v1360_v49  ;;  %v1266_v58 = vmul.f32 %v2715_v60, %v5077_v26  ;;  %v2738_v36 = vor.u32 %v2737_v28, %v2736_v22  ;;  %v6522_v28 = vld [vmem:[#allocation13_spill] sm:$0xff] }
 0x21d   : > { %v1363_v19 = vadd.f32 %v1331_v11, %v5211_v9  ;;  %vm2733_vm9 = vcmp.lt.f32.partialorder %v2732_v16, 8388608.0  ;;  %v2726_v46 = vcvt.f32.s32 %v1203_v5  ;;  %v1205_v14 = vmul.f32 %v5034_v18, %v5628_v42 }
 0x21e   : > { %v1489_v10 = vor.u32 %v1457_v21, %v1393_v1  ;;  %v1395_v27 = vadd.s32 216, %v5092_v41  ;;  %v1298_v44 = vsub.f32 %v5584_v39, %v1266_v58  ;;  %v2739_v34 = vsel %vm2733_vm9, %v2738_v36, %v1204_v0  ;;  %v6521_v39 = vld [vmem:[#allocation23_spill] sm:$0xff] }
 0x21f   : > { %vm1529_vm7 = vcmp.eq.s32.totalorder %v1396_v20, %v5103_v55  ;;  %v1460_v17 = vand.u32 4294967040, %v1363_v19  ;;  %v1269_v7 = vmul.f32 %v2739_v34, %v5077_v26  ;;  %v2727_v53 = vcvt.s32.f32 %v2726_v46  ;;  %v6523_v19 = vld [vmem:[#allocation17_spill] sm:$0xff] }
 0x220   : > { %v5650_v9 = vsel %vm1526_vm8, 2147483647, %v1489_v10   ;;  %v1330_v51 = vmul.f32 %v1298_v44, %v1298_v44  ;;  %v2724_v13 = vand.u32 2147483647, %v1203_v5  ;;  %v2742_v16 = vcvt.f32.s32 %v1205_v14 }
 0x221   : > { %v1492_v18 = vor.u32 %v1460_v17, %v1396_v20  ;;  %v1301_v62 = vsub.f32 %v5595_v63, %v1269_v7  ;;  %v2728_v29 = vand.u32 2147483647, %v2727_v53  ;;  %v2729_v2 = vand.u32 2147483648, %v1203_v5  ;;  %v6525_v53 = vld [vmem:[#allocation11_spill] sm:$0xff] }
 0x222   : > { %v939_v0 = vsub.f32 %v6521_v39, %v5074_v32  ;;  %v1362_v49 = vadd.f32 %v1330_v51, %v6522_v28  ;;  %v1398_v22 = vadd.s32 240, %v5092_v41  ;;  %v2743_v61 = vcvt.s32.f32 %v2742_v16  ;;  %v6524_v32 = vld [vmem:[#allocation16_spill] sm:$0xff] }
 0x223   : > { %v1561_v1 = vsel %vm1529_vm7, 2147483647, %v1492_v18   ;;  %v1333_v11 = vmul.f32 %v1301_v62, %v1301_v62  ;;  %v2730_v60 = vor.u32 %v2729_v2, %v2728_v29  ;;  %v2740_v21 = vand.u32 2147483647, %v1205_v14  ;;  %v6526_v16 = vld [vmem:[#allocation12_spill] sm:$0xff]  ;;  %v6527_v18 = vld [vmem:[#allocation15_spill] sm:$0xff] }
 0x224   : > { %v1459_v58 = vand.u32 4294967040, %v1362_v49  ;;  %vm2725_vm10 = vcmp.lt.f32.partialorder %v2724_v13, 8388608.0  ;;  %v2744_v36 = vand.u32 2147483647, %v2743_v61  ;;  %v2745_v63 = vand.u32 2147483648, %v1205_v14 }
 0x225   : > { %v941_v46 = vsub.f32 %v6523_v19, %v909_v38  ;;  %vm1528_vm11 = vcmp.eq.s32.totalorder %v1395_v27, %v5103_v55  ;;  %v1365_v10 = vadd.f32 %v1333_v11, %v6524_v32  ;;  %v2731_v44 = vsel %vm2725_vm10, %v2730_v60, %v1203_v5 }
 0x226   : > { %v971_v34 = vmul.f32 %v939_v0, %v939_v0  ;;  %v1491_v17 = vor.u32 %v1459_v58, %v1395_v27  ;;  %v1268_v7 = vmul.f32 %v2731_v44, %v5077_v26  ;;  %v2746_v20 = vor.u32 %v2745_v63, %v2744_v36 }
 0x227   : > { %v610_v51 = vmul.f32 %v6525_v53, %v6525_v53  ;;  %v580_v13 = vsub.f32 %v6527_v18, %v6526_v16  ;;  %v1462_v62 = vand.u32 4294967040, %v1365_v10  ;;  %vm2741_vm12 = vcmp.lt.f32.partialorder %v2740_v21, 8388608.0 }
 0x228   : > { %v1560_v29 = vsel %vm1528_vm11, 2147483647, %v1491_v17   ;;  %vm1531_vm13 = vcmp.eq.s32.totalorder %v1398_v22, %v5103_v55  ;;  %v1300_v38 = vsub.f32 %v5616_v4, %v1268_v7  ;;  %v2747_v2 = vsel %vm2741_vm12, %v2746_v20, %v1205_v14 }
 0x229   : > { %v973_v5 = vmul.f32 %v941_v46, %v941_v46  ;;  %v1494_v39 = vor.u32 %v1462_v62, %v1398_v22  ;;  %v1270_v27 = vmul.f32 %v2747_v2, %v5077_v26  ;;  %v1003_v0 = vadd.f32 %v971_v34, %v610_v51  ;;  %v6529_v34 = vld [vmem:[#allocation20_spill] sm:$0xff] }
 0x22a   : > { %v1332_v28 = vmul.f32 %v1300_v38, %v1300_v38  ;;  %v612_v49 = vmul.f32 %v580_v13, %v580_v13  ;;  %v1397_v11 = vadd.s32 232, %v5092_v41  ;;  %v1399_v4 = vadd.s32 248, %v5092_v41 }
 0x22b   : > { %v1563_v61 = vsel %vm1531_vm13, 2147483647, %v1494_v39   ;;  %v1302_v60 = vsub.f32 %v5628_v42, %v1270_v27  ;;  %v5678_v10 = vmov 0   ;;  %v5680_v42 = vmov 0  }
 0x22c   : > { %v1364_v21 = vadd.f32 %v1332_v28, %v1003_v0  ;;  %v1005_v58 = vadd.f32 %v973_v5, %v612_v49  ;;  %vm1530_vm14 = vcmp.eq.s32.totalorder %v1397_v11, %v5103_v55  ;;  %vm1532_vm15 = vcmp.eq.s32.totalorder %v1399_v4, %v5103_v55  ;;  %v6528_v55 = vld [vmem:[#allocation24_spill] sm:$0xff] }
 0x22d   : > { %v1334_v36 = vmul.f32 %v1302_v60, %v1302_v60  ;;  %v5682_v44 = vmov 0  }
 0x22e   : > { %v1461_v63 = vand.u32 4294967040, %v1364_v21 }
 0x22f   : > { %v1366_v14 = vadd.f32 %v1334_v36, %v1005_v58 }
 0x230   : > { %v1493_v22 = vor.u32 %v1461_v63, %v1397_v11 }
 0x231   : > { %v1463_v26 = vand.u32 4294967040, %v1366_v14 }
 0x232   : > { %v1562_v19 = vsel %vm1530_vm14, 2147483647, %v1493_v22  }
 0x233   : > { %v1495_v46 = vor.u32 %v1463_v26, %v1399_v4 }
 0x235   : > { %v1564_v32 = vsel %vm1532_vm15, 2147483647, %v1495_v46  }
 0x236 LB: >> { %vm1606_vm0 = vcmp.lt.s32.totalorder %v3491_v34, %v3475_v50  ;;  %vm1608_vm1 = vcmp.lt.s32.totalorder %v3487_v55, %v3471_v40  ;;  %vm1610_vm2 = vcmp.lt.s32.totalorder %v3483_v56, %v3467_v3  ;;  %vm1612_vm3 = vcmp.lt.s32.totalorder %v3479_v30, %v3463_v24  ;;  %s1570_s8 = sadd.s32 1, %s3495_s7   ;;  %s3495_s7 = sphi %s5775_s7, %s6549_s7   ;;  %v3491_v34 = vphi %v6529_v34, %v6019_v34   ;;  %v3487_v55 = vphi %v6528_v55, %v6025_v55   ;;  %v3483_v56 = vphi %v5186_v56, %v6031_v56   ;;  %v3479_v30 = vphi %v5226_v30, %v6039_v30   ;;  %v3475_v50 = vphi %v5193_v50, %v6045_v50   ;;  %v3471_v40 = vphi %v5264_v40, %v6051_v40   ;;  %v3467_v3 = vphi %v5237_v3, %v1723_v3   ;;  %v3463_v24 = vphi %v5300_v24, %v1724_v24   ;;  %v3459_v45 = vphi %v5280_v45, %v1725_v45   ;;  %v3455_v52 = vphi %v5342_v52, %v1726_v52   ;;  %v3451_v48 = vphi %v5315_v48, %v1727_v48   ;;  %v3447_v57 = vphi %v5378_v57, %v1728_v57   ;;  %v3443_v31 = vphi %v5357_v31, %v1729_v31   ;;  %v3439_v6 = vphi %v5416_v6, %v1730_v6   ;;  %v3435_v37 = vphi %v5389_v37, %v1731_v37   ;;  %v3431_v8 = vphi %v5452_v8, %v1732_v8   ;;  %v3427_v54 = vphi %v5432_v54, %v1733_v54   ;;  %v3423_v15 = vphi %v5500_v15, %v1734_v15   ;;  %v3419_v43 = vphi %v5467_v43, %v1735_v43   ;;  %v3415_v23 = vphi %v5534_v23, %v1736_v23   ;;  %v3411_v12 = vphi %v5515_v12, %v1737_v12   ;;  %v3407_v25 = vphi %v5575_v25, %v1738_v25   ;;  %v3403_v33 = vphi %v5545_v33, %v1739_v33   ;;  %v3399_v47 = vphi %v5606_v47, %v1740_v47   ;;  %v3395_v35 = vphi %v5588_v35, %v1741_v35   ;;  %v3391_v9 = vphi %v5650_v9, %v1742_v9   ;;  %v3387_v59 = vphi %v5621_v59, %v1743_v59   ;;  %v3383_v29 = vphi %v1560_v29, %v1744_v29   ;;  %v3379_v1 = vphi %v1561_v1, %v1745_v1   ;;  %v3375_v19 = vphi %v1562_v19, %v1746_v19   ;;  %v3371_v61 = vphi %v1563_v61, %v1747_v61   ;;  %v3367_v32 = vphi %v1564_v32, %v1748_v32   ;;  %v3363_v44 = vphi %v5682_v44, %v6548_v44   ;;  %v3359_v42 = vphi %v5680_v42, %v6547_v42   ;;  %v3355_v10 = vphi %v5678_v10, %v6546_v10  }
 0x237   : >> { %v1607_v17 = vsel %vm1606_vm0, %v3491_v34, %v3475_v50  ;;  %v1609_v7 = vsel %vm1608_vm1, %v3487_v55, %v3471_v40  ;;  %v1611_v20 = vsel %vm1610_vm2, %v3483_v56, %v3467_v3  ;;  %v1613_v53 = vsel %vm1612_vm3, %v3479_v30, %v3463_v24  ;;  %p6166_p10 = scmp.ge.s32.totalorder %s1570_s8, 19  }
 0x238   : >> { %vm1614_vm4 = vcmp.lt.s32.totalorder %v1607_v17, %v3459_v45  ;;  %vm1616_vm5 = vcmp.lt.s32.totalorder %v1609_v7, %v3455_v52  ;;  %vm1618_vm6 = vcmp.lt.s32.totalorder %v1611_v20, %v3451_v48  ;;  %vm1620_vm8 = vcmp.lt.s32.totalorder %v1613_v53, %v3447_v57  ;;  %s6266_s12 = scalar_lea.hbm (%p6166_p10), %s6317_s4, %s1975_s29  ;;  %s1765_s13 = sshll.u32 (%p6166_p10), %s5676_s6, 4  ;;  %s6269_s13 = int_to_ptr.vmem [resolvable:$true] %s1765_s13 }
 0x239   : >> { %v1615_v51 = vsel %vm1614_vm4, %v1607_v17, %v3459_v45  ;;  %v1617_v16 = vsel %vm1616_vm5, %v1609_v7, %v3455_v52  ;;  %v1619_v18 = vsel %vm1618_vm6, %v1611_v20, %v3451_v48  ;;  %v1621_v13 = vsel %vm1620_vm8, %v1613_v53, %v3447_v57  ;;  %s6273_s14 = scalar_lea.sflag (%p6166_p10), [#allocation3], %s213_s30  ;;  %s3139_s20 = scalar_lea.vmem (%p6166_p10), %s6269_s13, 384 }
 0x23a   : >> { %vm1622_vm9 = vcmp.lt.s32.totalorder %v1615_v51, %v3443_v31  ;;  %vm1624_vm7 = vcmp.lt.s32.totalorder %v1617_v16, %v3439_v6  ;;  %vm1626_vm10 = vcmp.lt.s32.totalorder %v1619_v18, %v3435_v37  ;;  %vm1628_vm11 = vcmp.lt.s32.totalorder %v1621_v13, %v3431_v8  ;;  %p3140_p12 = scmp.ne.s32.totalorder (%p6166_p10), %s6269_s13, %s3139_s20  ;;  %p6550_p0 = scmp.ne.s32.totalorder (%p6166_p10), %s6333_s25, 0 }
 0x23b   : >> { %v1623_v62 = vsel %vm1622_vm9, %v1615_v51, %v3443_v31  ;;  %v1625_v38 = vsel %vm1624_vm7, %v1617_v16, %v3439_v6  ;;  %v1627_v2 = vsel %vm1626_vm10, %v1619_v18, %v3435_v37  ;;  %v1629_v5 = vsel %vm1628_vm11, %v1621_v13, %v3431_v8  ;;  %s3502_s19 = smov (%p6166_p10), [#allocation7]  }
 0x23c   : >> { %vm1630_vm12 = vcmp.lt.s32.totalorder %v1623_v62, %v3427_v54  ;;  %vm1632_vm13 = vcmp.lt.s32.totalorder %v1625_v38, %v3423_v15  ;;  %vm1634_vm14 = vcmp.lt.s32.totalorder %v1627_v2, %v3419_v43  ;;  %vm1636_vm15 = vcmp.lt.s32.totalorder %v1629_v5, %v3415_v23  ;;  %p3141_p7 = pnand (%p6166_p10), %p3140_p12, %p6550_p0  ;;  %s3143_s22 = sshll.u32 (%p6166_p10), %s3502_s19, 4  ;;  %s3144_s22 = int_to_ptr.vmem [resolvable:$false] %s3143_s22 }
 0x23d   : >> { %v1631_v39 = vsel %vm1630_vm12, %v1623_v62, %v3427_v54  ;;  %v1633_v27 = vsel %vm1632_vm13, %v1625_v38, %v3423_v15  ;;  %v1635_v0 = vsel %vm1634_vm14, %v1627_v2, %v3419_v43  ;;  %v1637_v28 = vsel %vm1636_vm15, %v1629_v5, %v3415_v23  ;;  %v6530_v2 = vld [vmem:[#allocation18_spill] sm:$0xff]  ;;  %v6531_v5 = vld [vmem:[#allocation19_spill] sm:$0xff]  ;;  %s3145_s23 = scalar_lea.vmem (%p6166_p10), %s3144_s22, 768  ;;  %p3146_p11 = scmp.lt.s32.totalorder (%p6166_p10), %s6269_s13, %s3144_s22 }
 0x23e   : >> { %vm1638_vm0 = vcmp.lt.s32.totalorder %v1631_v39, %v3411_v12  ;;  %vm1640_vm1 = vcmp.lt.s32.totalorder %v1633_v27, %v3407_v25  ;;  %vm1642_vm2 = vcmp.lt.s32.totalorder %v1635_v0, %v3403_v33  ;;  %vm1644_vm3 = vcmp.lt.s32.totalorder %v1637_v28, %v3399_v47  ;;  %p3142_p8 = pneg (%p6166_p10), %p3141_p7  ;;  %p3147_p13 = scmp.lt.s32.totalorder (%p6166_p10), %s3145_s23, %s3139_s20 }
 0x23f   : >> { %v1639_v49 = vsel %vm1638_vm0, %v1631_v39, %v3411_v12  ;;  %v1641_v11 = vsel %vm1640_vm1, %v1633_v27, %v3407_v25  ;;  %v1643_v60 = vsel %vm1642_vm2, %v1635_v0, %v3403_v33  ;;  %v1645_v21 = vsel %vm1644_vm3, %v1637_v28, %v3399_v47 }
 0x240   : >> { %vm1646_vm4 = vcmp.lt.s32.totalorder %v1639_v49, %v3395_v35  ;;  %vm1648_vm5 = vcmp.lt.s32.totalorder %v1641_v11, %v3391_v9  ;;  %vm1650_vm6 = vcmp.lt.s32.totalorder %v1643_v60, %v3387_v59  ;;  %vm1652_vm8 = vcmp.lt.s32.totalorder %v1645_v21, %v3383_v29  ;;  %p3148_p1 = por (%p6166_p10), %p3147_p13, %p3146_p11 }
 0x241   : >> { %v1647_v58 = vsel %vm1646_vm4, %v1639_v49, %v3395_v35  ;;  %v1649_v36 = vsel %vm1648_vm5, %v1641_v11, %v3391_v9  ;;  %v1651_v63 = vsel %vm1650_vm6, %v1643_v60, %v3387_v59  ;;  %v1653_v4 = vsel %vm1652_vm8, %v1645_v21, %v3383_v29 }
 0x242   : >> { %vm1654_vm9 = vcmp.lt.s32.totalorder %v1647_v58, %v3379_v1  ;;  %vm1656_vm7 = vcmp.lt.s32.totalorder %v1649_v36, %v3375_v19  ;;  %vm1658_vm10 = vcmp.lt.s32.totalorder %v1651_v63, %v3371_v61  ;;  %vm1660_vm11 = vcmp.lt.s32.totalorder %v1653_v4, %v3367_v32  ;;  %p3149_p2 = pnand (%p6166_p10), %p3148_p1, %p3142_p8 }
 0x243   : >> { %v1655_v14 = vsel %vm1654_vm9, %v1647_v58, %v3379_v1  ;;  %v1657_v22 = vsel %vm1656_vm7, %v1649_v36, %v3375_v19  ;;  %v1659_v26 = vsel %vm1658_vm10, %v1651_v63, %v3371_v61  ;;  %v1661_v46 = vsel %vm1660_vm11, %v1653_v4, %v3367_v32 }
 0x244   : >> { %vm1662_vm12 = vcmp.lt.s32.totalorder %v1655_v14, %v1657_v22  ;;  %vm1664_vm13 = vcmp.lt.s32.totalorder %v1659_v26, %v1661_v46  ;;  %v1678_v62 = vstv %s3495_s7  ;;  %s6549_s7 = smov %s1570_s8 }
 0x245   : >> { %v1663_v17 = vsel %vm1662_vm12, %v1655_v14, %v1657_v22  ;;  %v1665_v7 = vsel %vm1664_vm13, %v1659_v26, %v1661_v46  ;;  %vm1679_vm2 = vcmp.eq.s32.totalorder %v5092_v41, %v1678_v62  ;;  %vm1680_vm3 = vcmp.eq.s32.totalorder %v6530_v2, %v1678_v62 }
 0x246   : >> { %vm1666_vm14 = vcmp.lt.s32.totalorder %v1663_v17, %v1665_v7  ;;  %vm1681_vm4 = vcmp.eq.s32.totalorder %v6531_v5, %v1678_v62 }
 0x247   : >> { %v1667_v20 = vsel %vm1666_vm14, %v1663_v17, %v1665_v7 }
 0x248   : >> { %v1668_v53 = vrot.slane %v1667_v20, 4 }
 0x24a   : >> { %vm1669_vm15 = vcmp.lt.s32.totalorder %v1667_v20, %v1668_v53 }
 0x24b   : >> { %v1670_v51 = vsel %vm1669_vm15, %v1667_v20, %v1668_v53 }
 0x24c   : >> { %v1671_v16 = vrot.slane %v1670_v51, 2 }
 0x24e   : >> { %vm1672_vm0 = vcmp.lt.s32.totalorder %v1670_v51, %v1671_v16 }
 0x24f   : >> { %v1673_v18 = vsel %vm1672_vm0, %v1670_v51, %v1671_v16 }
 0x250   : >> { %v1674_v13 = vrot.slane %v1673_v18, 1 }
 0x252   : >> { %vm1675_vm1 = vcmp.lt.s32.totalorder %v1673_v18, %v1674_v13 }
 0x253   : >> { %v5950_v38 = vsel %vm1675_vm1, %v1673_v18, %v1674_v13 }
 0x254   : >> { %v1677_v39 = vand.u32 255, %v5950_v38  ;;  %vm1685_vm5 = vcmp.eq.s32.totalorder %v3491_v34, %v5950_v38  ;;  %vm1686_vm6 = vcmp.eq.s32.totalorder %v3487_v55, %v5950_v38  ;;  %vm1687_vm8 = vcmp.eq.s32.totalorder %v3483_v56, %v5950_v38 }
 0x255   : >> { %vm1688_vm9 = vcmp.eq.s32.totalorder %v3479_v30, %v5950_v38  ;;  %vm1689_vm7 = vcmp.eq.s32.totalorder %v3475_v50, %v5950_v38  ;;  %vm1690_vm10 = vcmp.eq.s32.totalorder %v3471_v40, %v5950_v38  ;;  %vm1691_vm11 = vcmp.eq.s32.totalorder %v3467_v3, %v5950_v38 }
 0x256   : >> { %v5957_v44 = vsel %vm1679_vm2, %v1677_v39, %v3363_v44   ;;  %v5960_v42 = vsel %vm1680_vm3, %v1677_v39, %v3359_v42   ;;  %v5963_v10 = vsel %vm1681_vm4, %v1677_v39, %v3355_v10   ;;  %vm1692_vm12 = vcmp.eq.s32.totalorder %v3463_v24, %v5950_v38 }
 0x257   : >> { %v6532_v27 = vmov %v5957_v44  ;;  %v6533_v0 = vmov %v5960_v42  ;;  %v6534_v28 = vmov %v5963_v10  ;;  %vm1693_vm13 = vcmp.eq.s32.totalorder %v3459_v45, %v5950_v38 }
 0x258   : >> { %vm1703_vm0 = vcmp.eq.s32.totalorder %v3419_v43, %v5950_v38  ;;  %vm1704_vm1 = vcmp.eq.s32.totalorder %v3415_v23, %v5950_v38  ;;  %vm1705_vm2 = vcmp.eq.s32.totalorder %v3411_v12, %v5950_v38  ;;  %vm1706_vm3 = vcmp.eq.s32.totalorder %v3407_v25, %v5950_v38  ;;  %1749 = vst [vmem:[%s5676_s6] sm:$0xff] (%p6166_p10), %v6532_v27 }
 0x259   : >> { %vm1707_vm4 = vcmp.eq.s32.totalorder %v3403_v33, %v5950_v38  ;;  %vm1708_vm14 = vcmp.eq.s32.totalorder %v3399_v47, %v5950_v38  ;;  %v6019_v34 = vsel %vm1685_vm5, 2147483647, %v3491_v34   ;;  %v6025_v55 = vsel %vm1686_vm6, 2147483647, %v3487_v55   ;;  %1750 = vst [vmem:[%s5676_s6 + $0x8] sm:$0xff] (%p6166_p10), %v6533_v0  ;;  %1751 = vst [vmem:[%s5676_s6 + $0x10] sm:$0xff] (%p6166_p10), %v6534_v28 }
 0x25a   : >> { %v6031_v56 = vsel %vm1687_vm8, 2147483647, %v3483_v56   ;;  %vm1710_vm15 = vcmp.eq.s32.totalorder %v3391_v9, %v5950_v38  ;;  %v6039_v30 = vsel %vm1688_vm9, 2147483647, %v3479_v30   ;;  %v6045_v50 = vsel %vm1689_vm7, 2147483647, %v3475_v50  }
 0x25b   : >> { %v6051_v40 = vsel %vm1690_vm10, 2147483647, %v3471_v40   ;;  %vm1711_vm5 = vcmp.eq.s32.totalorder %v3387_v59, %v5950_v38  ;;  %v1723_v3 = vsel %vm1691_vm11, 2147483647, %v3467_v3   ;;  %v1724_v24 = vsel %vm1692_vm12, 2147483647, %v3463_v24  }
 0x25c   : >> { %v1725_v45 = vsel %vm1693_vm13, 2147483647, %v3459_v45   ;;  %vm1712_vm6 = vcmp.eq.s32.totalorder %v3383_v29, %v5950_v38  ;;  %vm6535_vm8 = vcmp.eq.s32.totalorder %v3455_v52, %v5950_v38  ;;  %vm6536_vm9 = vcmp.eq.s32.totalorder %v3451_v48, %v5950_v38 }
 0x25d   : >> { %v1726_v52 = vsel %vm6535_vm8, 2147483647, %v3455_v52   ;;  %v1727_v48 = vsel %vm6536_vm9, 2147483647, %v3451_v48   ;;  %vm6537_vm7 = vcmp.eq.s32.totalorder %v3447_v57, %v5950_v38  ;;  %vm1713_vm10 = vcmp.eq.s32.totalorder %v3379_v1, %v5950_v38 }
 0x25e   : >> { %v1728_v57 = vsel %vm6537_vm7, 2147483647, %v3447_v57   ;;  %vm6538_vm11 = vcmp.eq.s32.totalorder %v3443_v31, %v5950_v38  ;;  %vm6539_vm12 = vcmp.eq.s32.totalorder %v3439_v6, %v5950_v38  ;;  %vm6540_vm13 = vcmp.eq.s32.totalorder %v3435_v37, %v5950_v38 }
 0x25f   : >> { %v1729_v31 = vsel %vm6538_vm11, 2147483647, %v3443_v31   ;;  %v1730_v6 = vsel %vm6539_vm12, 2147483647, %v3439_v6   ;;  %v1731_v37 = vsel %vm6540_vm13, 2147483647, %v3435_v37   ;;  %vm1714_vm8 = vcmp.eq.s32.totalorder %v3375_v19, %v5950_v38 }
 0x260   : >> { %vm6541_vm9 = vcmp.eq.s32.totalorder %v3431_v8, %v5950_v38  ;;  %vm6542_vm7 = vcmp.eq.s32.totalorder %v3427_v54, %v5950_v38  ;;  %vm6543_vm11 = vcmp.eq.s32.totalorder %v3423_v15, %v5950_v38  ;;  %vm1715_vm12 = vcmp.eq.s32.totalorder %v3371_v61, %v5950_v38 }
 0x261   : >> { %v1732_v8 = vsel %vm6541_vm9, 2147483647, %v3431_v8   ;;  %v1733_v54 = vsel %vm6542_vm7, 2147483647, %v3427_v54   ;;  %v1734_v15 = vsel %vm6543_vm11, 2147483647, %v3423_v15   ;;  %vm1716_vm13 = vcmp.eq.s32.totalorder %v3367_v32, %v5950_v38 }
 0x262   : >> { %v1735_v43 = vsel %vm1703_vm0, 2147483647, %v3419_v43   ;;  %v1736_v23 = vsel %vm1704_vm1, 2147483647, %v3415_v23   ;;  %v1737_v12 = vsel %vm1705_vm2, 2147483647, %v3411_v12   ;;  %vm6544_vm0 = vcmp.eq.s32.totalorder %v3395_v35, %v5950_v38 }
 0x263   : >> { %v1738_v25 = vsel %vm1706_vm3, 2147483647, %v3407_v25   ;;  %v1739_v33 = vsel %vm1707_vm4, 2147483647, %v3403_v33   ;;  %v1740_v47 = vsel %vm1708_vm14, 2147483647, %v3399_v47   ;;  %v6546_v10 = vmov %v6534_v28 }
 0x264   : >> { %v1741_v35 = vsel %vm6544_vm0, 2147483647, %v3395_v35   ;;  %v1742_v9 = vsel %vm1710_vm15, 2147483647, %v3391_v9   ;;  %v1743_v59 = vsel %vm1711_vm5, 2147483647, %v3387_v59   ;;  %v6547_v42 = vmov %v6533_v0 }
 0x265   : >> { %v1744_v29 = vsel %vm1712_vm6, 2147483647, %v3383_v29   ;;  %v1745_v1 = vsel %vm1713_vm10, 2147483647, %v3379_v1   ;;  %v1746_v19 = vsel %vm1714_vm8, 2147483647, %v3375_v19   ;;  %v6548_v44 = vmov %v6532_v27 }
 0x266   : >> { %v1747_v61 = vsel %vm1715_vm12, 2147483647, %v3371_v61   ;;  %v1748_v32 = vsel %vm1716_vm13, 2147483647, %v3367_v32   ;;  %1569 = sbr.rel (!%p6166_p10) target bundleno = 566 (0x236), region = 87 }
 0x26b   : > { %3152 = shalt.err (!%p3149_p2)
}
 0x26c   : > { %s3153_s27 = scalar_lea.hbm %s6266_s12, 384  ;;  %s3157_s30 = scalar_lea.hbm %s6317_s4, 768 }
 0x26d   : > { %p3154_p3 = scmp.ne.s32.totalorder %s6266_s12, %s3153_s27  ;;  %p3158_p5 = scmp.lt.s32.totalorder %s6266_s12, %s6317_s4 }
 0x26e   : > { %p3159_p6 = scmp.lt.s32.totalorder %s3157_s30, %s3153_s27 }
 0x26f   : > { %p3155_p4 = pnand %p3154_p3, %p6550_p0 }
 0x270   : > { %p3160_p10 = por %p3159_p6, %p3158_p5 }
 0x271   : > { %p3156_p9 = pneg %p3155_p4 }
 0x273   : > { %p3161_p12 = pnand %p3160_p10, %p3156_p9 }
 0x275   : > { %3164 = shalt.err (!%p3161_p12)
}
 0x276   : > { %s3503_s7 = smov 128   ;;  %s3504_s8 = smov 256  }
 0x277   : > { %s3505_s9 = smov 8  }
 0x278   : > { %2756 = dma.vmem_to_hbm [thread:$0]  (%p6550_p0), %s6269_s13, 384, %s6266_s12, %s6273_s14, %s3503_s7, %s3504_s8, %s3505_s9  }
 0x279 PF: > { %p2773_p7 = scmp.ge.s32.totalorder %s3351_s18, 2  ;;  %s1780_s10 = sand.u32 1, %s3339_s15  }
 0x27a   : > { %p6551_p8 = scmp.ne.s32.totalorder %s6334_s26, 0  ;;  %s1781_s11 = scalar_lea.sflag [#allocation3], %s1780_s10 }
 0x27c   : > { %p2766_p11 = pnand %p2773_p7, %p6551_p8 }
 0x27e   : > { %p2767_p13 = pneg %p2766_p11 }
 0x280   : > { %3334 = dma.done.wait (%p2767_p13), %s1781_s11, 384  }
 0x281   : > { %3336 = vsyncadd (%p2767_p13), %s1781_s11, 4294966912  ;;  %p16_p1 = scmp.ge.s32.totalorder %s3556_s21, 4   ;;  %s6552_s15 = smov %s3343_s16 }
 0x282   : > { %s6553_s16 = smov %s3347_s17  ;;  %s6554_s17 = smov %s3567_s24 }
 0x283   : > { %s6555_s18 = smov %s3556_s21  ;;  %18 = sbr.rel (!%p16_p1) target bundleno = 5 (0x5), region = 98 }
 0x288   :  { %1786 = vsyncpa [#allocation3], 1 }
 0x289   :  { %1788 = vsyncpa [#allocation3 + $0x1], 1 }
 0x28a   :  { %1789 = vsyncpa [#allocation4], 1 }
 0x28b   :  { %1791 = vsyncpa [#allocation4 + $0x1], 1 }
 0x28c   :  { %1792 = vsyncpa [#allocation6], 1 }

</bundles_post_ra>
